<compile_context>
chip_gen: v7x
topology: tpu7x:2x2x1
jax: 0.10.0
libtpu: 0.0.40
codegen_flags: <defaults>
</compile_context>

<pallas_src>
import jax
import jax.numpy as jnp
from jax import lax
from jax.experimental import pallas as pl
from jax.experimental.pallas import tpu as pltpu

EXPANSION = 4
BN_EPS = 1e-5
LANE = 128
COMPUTE_DTYPE = jnp.bfloat16  # MXU input dtype; all accumulation is f32.


def _round_up(n, m):
    return ((n + m - 1) // m) * m


def _pad2d(a, rows, cols):
    """Zero-pad a 2-D array up to (rows, cols)."""
    return jnp.zeros((rows, cols), a.dtype).at[: a.shape[0], : a.shape[1]].set(a)


# --------------------------------------------------------------------------
# Fused Pallas kernel (one grid step = one image)
# --------------------------------------------------------------------------
def _make_block_kernel(H, W, Ho, Wo, stride, has_shortcut):
    f32 = jnp.float32

    def _sp(start, size):
        # static spatial index: contiguous slice for stride 1, strided pl.ds otherwise
        if stride == 1:
            return slice(start, start + size)
        return pl.ds(start, size, stride=stride)

    def kernel(*refs):
        if has_shortcut:
            (x_ref, s1_ref, b1_ref, w1_ref, b2_ref, w2_ref, b3_ref, w3_ref,
             wsc_ref, o_ref, tpad_ref) = refs
        else:
            (x_ref, s1_ref, b1_ref, w1_ref, b2_ref, w2_ref, b3_ref, w3_ref,
             o_ref, tpad_ref) = refs

        s1 = s1_ref[...]                       # (1, Cin_p) f32
        b1 = b1_ref[...]

        # ---- bn1 + relu (f32 math, single cast to bf16 for the MXU)
        x = x_ref[0]                                               # (H, W, Cin_p) bf16
        a = jnp.maximum(x.astype(f32) * s1 + b1, 0.0)              # (H, W, Cin_p) f32
        a_bf = a.astype(COMPUTE_DTYPE)                             # reused by conv1 + shortcut

        # ---- conv1 (1x1, bn2 scale folded into w1), bn2 bias + relu
        t = jnp.dot(a_bf.reshape(H * W, -1), w1_ref[...],
                    preferred_element_type=f32)
        t = jnp.maximum(t + b2_ref[...], 0.0)                      # (H*W, Pp) f32

        # ---- spatially zero-padded bf16 copy of t resident in VMEM (conv2's pad=1)
        tpad_ref[...] = jnp.zeros_like(tpad_ref)
        tpad_ref[1:H + 1, 1:W + 1, :] = t.reshape(H, W, -1).astype(tpad_ref.dtype)

        # ---- conv2 (3x3, stride) as 9 tap GEMMs accumulated in f32
        #      (bn3 scale folded into w2 columns, bn3 bias seeds the accumulator)
        pp = w2_ref.shape[-1]
        acc = jnp.broadcast_to(b3_ref[...], (Ho * Wo, pp)).astype(f32)
        for di in range(3):
            for dj in range(3):
                tap = tpad_ref[_sp(di, Ho), _sp(dj, Wo), :]        # (Ho, Wo, Pp) bf16
                acc = acc + jnp.dot(tap.reshape(Ho * Wo, -1),
                                    w2_ref[3 * di + dj],
                                    preferred_element_type=f32)
        u = jnp.maximum(acc, 0.0).astype(COMPUTE_DTYPE)            # bn3 bias + relu

        # ---- conv3 (1x1) + shortcut + residual add
        out = jnp.dot(u, w3_ref[...], preferred_element_type=f32)  # (Ho*Wo, Cout_p)
        if has_shortcut:
            if stride == 1:
                a_s = a_bf
            else:
                xs = x_ref[0, _sp(0, Ho), _sp(0, Wo), :]
                a_s = jnp.maximum(xs.astype(f32) * s1 + b1, 0.0).astype(COMPUTE_DTYPE)
            out = out + jnp.dot(a_s.reshape(Ho * Wo, -1),
                                wsc_ref[...], preferred_element_type=f32)
        else:
            out = out + x.reshape(H * W, -1).astype(f32)

        o_ref[...] = out.reshape(1, Ho, Wo, -1).astype(o_ref.dtype)

    return kernel


# --------------------------------------------------------------------------
# Forward pass (Pallas)
# --------------------------------------------------------------------------
def preact_bottleneck_forward(x_nchw, params, stride):
    N, Cin, H, W = x_nchw.shape
    planes = params["planes"]
    cout = EXPANSION * planes
    cin_p, p_p, cout_p = params["cin_p"], params["p_p"], params["cout_p"]
    has_shortcut = params["has_shortcut"]

    Ho = (H + 2 - 3) // stride + 1
    Wo = (W + 2 - 3) // stride + 1

    # NHWC, channels zero-padded to a lane-dense multiple of 128, bf16 storage.
    x = jnp.transpose(x_nchw, (0, 2, 3, 1))
    x = jnp.pad(x, ((0, 0), (0, 0), (0, 0), (0, cin_p - Cin))).astype(COMPUTE_DTYPE)

    kernel = _make_block_kernel(H, W, Ho, Wo, stride, has_shortcut)

    full2 = lambda n: (0, 0)
    in_specs = [
        pl.BlockSpec((1, H, W, cin_p), lambda n: (n, 0, 0, 0)),     # x (per image)
        pl.BlockSpec((1, cin_p), full2),                            # s1 (bn1 scale)
        pl.BlockSpec((1, cin_p), full2),                            # b1 (bn1 bias)
        pl.BlockSpec((cin_p, p_p), full2),                          # w1 (bn2 scale folded)
        pl.BlockSpec((1, p_p), full2),                              # b2
        pl.BlockSpec((9, p_p, p_p), lambda n: (0, 0, 0)),           # w2 taps (bn3 scale folded)
        pl.BlockSpec((1, p_p), full2),                              # b3
        pl.BlockSpec((p_p, cout_p), full2),                         # w3
    ]
    args = [x, params["s1"], params["b1"], params["w1"], params["b2"],
            params["w2"], params["b3"], params["w3"]]
    if has_shortcut:
        in_specs.append(pl.BlockSpec((cin_p, cout_p), full2))       # wsc
        args.append(params["wsc"])

    gemm_flops = 2 * N * (H * W * cin_p * p_p                       # conv1
                          + Ho * Wo * 9 * p_p * p_p                 # conv2
                          + Ho * Wo * p_p * cout_p)                 # conv3
    if has_shortcut:
        gemm_flops += 2 * N * Ho * Wo * cin_p * cout_p
    bytes_accessed = (x.size * x.dtype.itemsize
                      + sum(a.size * a.dtype.itemsize for a in args[1:])
                      + N * Ho * Wo * cout_p * 4)

    out = pl.pallas_call(
        kernel,
        out_shape=jax.ShapeDtypeStruct((N, Ho, Wo, cout_p), jnp.float32),
        grid=(N,),
        in_specs=in_specs,
        out_specs=pl.BlockSpec((1, Ho, Wo, cout_p), lambda n: (n, 0, 0, 0)),
        scratch_shapes=[pltpu.VMEM((H + 2, W + 2, p_p), COMPUTE_DTYPE)],
        compiler_params=pltpu.CompilerParams(
            dimension_semantics=("parallel",),
            vmem_limit_bytes=32 * 1024 * 1024,
        ),
        cost_estimate=pl.CostEstimate(flops=gemm_flops, transcendentals=0,
                                      bytes_accessed=bytes_accessed),
    )(*args)

    out = out[..., :cout]                       # drop channel padding
    return jnp.transpose(out, (0, 3, 1, 2))     # back to NCHW


# --------------------------------------------------------------------------
# Parameter construction (deterministic, synthetic)
# --------------------------------------------------------------------------
def _fold_bn(gamma, beta, mean, var):
    scale = gamma / jnp.sqrt(var + BN_EPS)
    bias = beta - mean * scale
    return scale.astype(jnp.float32), bias.astype(jnp.float32)


def init_params(key, in_planes, planes, stride):
    cout = EXPANSION * planes
    ks = jax.random.split(key, 8)

    def bn_params(k, c):
        k1, k2, k3, k4 = jax.random.split(k, 4)
        gamma = 1.0 + 0.1 * jax.random.normal(k1, (c,), jnp.float32)
        beta = 0.1 * jax.random.normal(k2, (c,), jnp.float32)
        mean = 0.1 * jax.random.normal(k3, (c,), jnp.float32)
        var = 0.5 + jnp.abs(jax.random.normal(k4, (c,), jnp.float32))
        return gamma, beta, mean, var

    bn1 = bn_params(ks[0], in_planes)
    bn2 = bn_params(ks[1], planes)
    bn3 = bn_params(ks[2], planes)

    def rnd(k, shape):
        # Round raw weights through the compute dtype so the f32 reference and
        # the bf16 kernel consume bit-identical weight values.
        w = 0.2 * jax.random.normal(k, shape, jnp.float32)
        return w.astype(COMPUTE_DTYPE).astype(jnp.float32)

    w1_raw = rnd(ks[3], (planes, in_planes, 1, 1))
    w2_raw = rnd(ks[4], (planes, planes, 3, 3))
    w3_raw = rnd(ks[5], (cout, planes, 1, 1))

    has_shortcut = (stride != 1) or (in_planes != cout)
    wsc_raw = rnd(ks[6], (cout, in_planes, 1, 1)) if has_shortcut else None

    s1, b1 = _fold_bn(*bn1)          # (in_planes,)
    s2, b2 = _fold_bn(*bn2)          # (planes,)
    s3, b3 = _fold_bn(*bn3)          # (planes,)

    cin_p = _round_up(in_planes, LANE)
    p_p = _round_up(planes, LANE)
    cout_p = _round_up(cout, LANE)

    # GEMM-layout weights with bn2 / bn3 scales folded into the output columns,
    # zero-padded to lane-dense channel counts, stored in bf16 for the MXU.
    w1g = _pad2d(w1_raw[:, :, 0, 0].T * s2[None, :], cin_p, p_p).astype(COMPUTE_DTYPE)
    w2_taps = [
        _pad2d(w2_raw[:, :, di, dj].T * s3[None, :], p_p, p_p)
        for di in range(3) for dj in range(3)
    ]
    w2g = jnp.stack(w2_taps, axis=0).astype(COMPUTE_DTYPE)          # (9, Pp, Pp)
    w3g = _pad2d(w3_raw[:, :, 0, 0].T, p_p, cout_p).astype(COMPUTE_DTYPE)
    wscg = (_pad2d(wsc_raw[:, :, 0, 0].T, cin_p, cout_p).astype(COMPUTE_DTYPE)
            if has_shortcut else None)

    return {
        "planes": planes,
        "cin_p": cin_p, "p_p": p_p, "cout_p": cout_p,
        "has_shortcut": has_shortcut,
        "s1": _pad2d(s1[None, :], 1, cin_p),
        "b1": _pad2d(b1[None, :], 1, cin_p),
        "b2": _pad2d(b2[None, :], 1, p_p),
        "b3": _pad2d(b3[None, :], 1, p_p),
        "w1": w1g, "w2": w2g, "w3": w3g, "wsc": wscg,
        # raw (PyTorch-layout) params for the pure-JAX reference
        "raw": {"bn1": bn1, "bn2": bn2, "bn3": bn3,
                "w1": w1_raw, "w2": w2_raw, "w3": w3_raw, "wsc": wsc_raw},
    }


# --------------------------------------------------------------------------
# Pure-JAX reference (eval-mode BN), NCHW like PyTorch
# --------------------------------------------------------------------------
def reference_forward(x, params, stride):
    raw = params["raw"]

    def bn(y, p):
        g, b, m, v = (t[None, :, None, None] for t in p)
        return (y - m) / jnp.sqrt(v + BN_EPS) * g + b

    def conv(y, w, s, pad):
        return lax.conv_general_dilated(
            y, w, (s, s), pad, dimension_numbers=("NCHW", "OIHW", "NCHW"))

    out = jax.nn.relu(bn(x, raw["bn1"]))
    shortcut = conv(out, raw["wsc"], stride, "VALID") if params["has_shortcut"] else x
    out = conv(out, raw["w1"], 1, "VALID")
    out = conv(jax.nn.relu(bn(out, raw["bn2"])), raw["w2"], stride, ((1, 1), (1, 1)))
    out = conv(jax.nn.relu(bn(out, raw["bn3"])), raw["w3"], 1, "VALID")
    return out + shortcut


# --------------------------------------------------------------------------
if __name__ == "__main__":
    key = jax.random.PRNGKey(0)
    k_x, k_p, k_x2, k_p2 = jax.random.split(key, 4)

    # --- projection-shortcut configuration (in_planes != expansion*planes) ---
    N, in_planes, H, W = 2, 4, 16, 16
    planes, stride = 4, 1
    x = jax.random.normal(k_x, (N, in_planes, H, W), jnp.float32)
    # Round the input through bf16 so kernel (bf16 storage) and f32 reference
    # see identical input values.
    x = x.astype(COMPUTE_DTYPE).astype(jnp.float32)
    params = init_params(k_p, in_planes, planes, stride)

    out = jax.block_until_ready(preact_bottleneck_forward(x, params, stride))
    ref = jax.block_until_ready(reference_forward(x, params, stride))
    assert out.shape == (N, EXPANSION * planes, H // stride, W // stride), out.shape
    err = float(jnp.max(jnp.abs(out - ref)))
    assert jnp.allclose(out, ref, atol=5e-2, rtol=5e-2), err

    # --- identity-shortcut configuration (in_planes == expansion*planes) ---
    in_planes2 = EXPANSION * planes
    x2 = jax.random.normal(k_x2, (N, in_planes2, H, W), jnp.float32)
    x2 = x2.astype(COMPUTE_DTYPE).astype(jnp.float32)
    params2 = init_params(k_p2, in_planes2, planes, 1)

    out2 = jax.block_until_ready(preact_bottleneck_forward(x2, params2, 1))
    ref2 = jax.block_until_ready(reference_forward(x2, params2, 1))
    assert out2.shape == (N, EXPANSION * planes, H, W), out2.shape
    err2 = float(jnp.max(jnp.abs(out2 - ref2)))
    assert jnp.allclose(out2, ref2, atol=5e-2, rtol=5e-2), err2

    print("KERNEL_OK")
</pallas_src>

<mosaic_0001>
module attributes {stable_mosaic.version = 11 : i64} {
  func.func @kernel(%arg0: i32, %arg1: memref<1x16x16x128xbf16, #tpu.memory_space<vmem>>, %arg2: memref<1x128xf32, #tpu.memory_space<vmem>>, %arg3: memref<1x128xf32, #tpu.memory_space<vmem>>, %arg4: memref<128x128xbf16, #tpu.memory_space<vmem>>, %arg5: memref<1x128xf32, #tpu.memory_space<vmem>>, %arg6: memref<9x128x128xbf16, #tpu.memory_space<vmem>>, %arg7: memref<1x128xf32, #tpu.memory_space<vmem>>, %arg8: memref<128x128xbf16, #tpu.memory_space<vmem>>, %arg9: memref<128x128xbf16, #tpu.memory_space<vmem>>, %arg10: memref<1x16x16x128xf32, #tpu.memory_space<vmem>>, %arg11: memref<18x18x128xbf16, #tpu.memory_space<vmem>>) attributes {dimension_semantics = [#tpu.dimension_semantics<parallel>], iteration_bounds = array<i64: 2>, scalar_prefetch = 0 : i64, scratch_operands = 1 : i64, tpu.core_type = #tpu.core_type<tc>, window_params = [{transform_indices = @transform_0, window_bounds = array<i64: 1, 16, 16, 128>}, {pipeline_mode = #tpu.pipeline_mode<synchronous>, transform_indices = @transform_1, window_bounds = array<i64: 1, 128>}, {pipeline_mode = #tpu.pipeline_mode<synchronous>, transform_indices = @transform_2, window_bounds = array<i64: 1, 128>}, {pipeline_mode = #tpu.pipeline_mode<synchronous>, transform_indices = @transform_3, window_bounds = array<i64: 128, 128>}, {pipeline_mode = #tpu.pipeline_mode<synchronous>, transform_indices = @transform_4, window_bounds = array<i64: 1, 128>}, {pipeline_mode = #tpu.pipeline_mode<synchronous>, transform_indices = @transform_5, window_bounds = array<i64: 9, 128, 128>}, {pipeline_mode = #tpu.pipeline_mode<synchronous>, transform_indices = @transform_6, window_bounds = array<i64: 1, 128>}, {pipeline_mode = #tpu.pipeline_mode<synchronous>, transform_indices = @transform_7, window_bounds = array<i64: 128, 128>}, {pipeline_mode = #tpu.pipeline_mode<synchronous>, transform_indices = @transform_8, window_bounds = array<i64: 128, 128>}, {transform_indices = @transform_9, window_bounds = array<i64: 1, 16, 16, 128>}]} {
    %c0 = arith.constant 0 : index
    %c0_0 = arith.constant 0 : index
    %0 = vector.load %arg2[%c0, %c0_0] : memref<1x128xf32, #tpu.memory_space<vmem>>, vector<1x128xf32>
    %c0_1 = arith.constant 0 : index
    %c0_2 = arith.constant 0 : index
    %1 = vector.load %arg3[%c0_1, %c0_2] : memref<1x128xf32, #tpu.memory_space<vmem>>, vector<1x128xf32>
    %c0_3 = arith.constant 0 : index
    %c0_4 = arith.constant 0 : index
    %c0_5 = arith.constant 0 : index
    %c0_6 = arith.constant 0 : index
    %2 = vector.load %arg1[%c0_3, %c0_4, %c0_5, %c0_6] : memref<1x16x16x128xbf16, #tpu.memory_space<vmem>>, vector<1x16x16x128xbf16>
    %3 = vector.shape_cast %2 : vector<1x16x16x128xbf16> to vector<16x16x128xbf16>
    %4 = arith.extf %3 : vector<16x16x128xbf16> to vector<16x16x128xf32>
    %5 = vector.shape_cast %0 : vector<1x128xf32> to vector<1x1x128xf32>
    %6 = vector.broadcast %5 : vector<1x1x128xf32> to vector<16x16x128xf32>
    %7 = arith.mulf %4, %6 : vector<16x16x128xf32>
    %8 = vector.shape_cast %1 : vector<1x128xf32> to vector<1x1x128xf32>
    %9 = vector.broadcast %8 : vector<1x1x128xf32> to vector<16x16x128xf32>
    %10 = arith.addf %7, %9 : vector<16x16x128xf32>
    %cst = arith.constant 0.000000e+00 : f32
    %11 = vector.broadcast %cst : f32 to vector<16x16x128xf32>
    %12 = arith.maximumf %10, %11 : vector<16x16x128xf32>
    %13 = arith.truncf %12 : vector<16x16x128xf32> to vector<16x16x128xbf16>
    %14 = vector.shape_cast %13 : vector<16x16x128xbf16> to vector<256x128xbf16>
    %c0_7 = arith.constant 0 : index
    %c0_8 = arith.constant 0 : index
    %15 = vector.load %arg4[%c0_7, %c0_8] : memref<128x128xbf16, #tpu.memory_space<vmem>>, vector<128x128xbf16>
    %cst_9 = arith.constant dense<0.000000e+00> : vector<256x128xf32>
    %16 = tpu.matmul %14, %15, %cst_9 {dimension_numbers = #tpu.dot_dimension_numbers<[1], [0], [0], [1], [0, 0, 1, 1], [], []>} : vector<256x128xbf16>, vector<128x128xbf16>, vector<256x128xf32> -> vector<256x128xf32>
    %c0_10 = arith.constant 0 : index
    %c0_11 = arith.constant 0 : index
    %17 = vector.load %arg5[%c0_10, %c0_11] : memref<1x128xf32, #tpu.memory_space<vmem>>, vector<1x128xf32>
    %18 = vector.broadcast %17 : vector<1x128xf32> to vector<256x128xf32>
    %19 = arith.addf %16, %18 : vector<256x128xf32>
    %cst_12 = arith.constant 0.000000e+00 : f32
    %20 = vector.broadcast %cst_12 : f32 to vector<256x128xf32>
    %21 = arith.maximumf %19, %20 : vector<256x128xf32>
    %cst_13 = arith.constant 0.000000e+00 : bf16
    %22 = vector.broadcast %cst_13 : bf16 to vector<18x18x128xbf16>
    %c0_14 = arith.constant 0 : index
    %c0_15 = arith.constant 0 : index
    %c0_16 = arith.constant 0 : index
    %23 = vector.load %arg11[%c0_14, %c0_15, %c0_16] : memref<18x18x128xbf16, #tpu.memory_space<vmem>>, vector<18x18x128xbf16>
    tpu.vector_store %arg11[%c0_14, %c0_15, %c0_16], %22 {strides = array<i32>} : memref<18x18x128xbf16, #tpu.memory_space<vmem>>, vector<18x18x128xbf16>,
    %24 = vector.shape_cast %21 : vector<256x128xf32> to vector<16x16x128xf32>
    %25 = arith.truncf %24 : vector<16x16x128xf32> to vector<16x16x128xbf16>
    %c1 = arith.constant 1 : index
    %c1_17 = arith.constant 1 : index
    %c0_18 = arith.constant 0 : index
    %26 = vector.load %arg11[%c1, %c1_17, %c0_18] : memref<18x18x128xbf16, #tpu.memory_space<vmem>>, vector<16x16x128xbf16>
    tpu.vector_store %arg11[%c1, %c1_17, %c0_18], %25 {strides = array<i32>} : memref<18x18x128xbf16, #tpu.memory_space<vmem>>, vector<16x16x128xbf16>,
    %c0_19 = arith.constant 0 : index
    %c0_20 = arith.constant 0 : index
    %27 = vector.load %arg7[%c0_19, %c0_20] : memref<1x128xf32, #tpu.memory_space<vmem>>, vector<1x128xf32>
    %28 = vector.shape_cast %27 : vector<1x128xf32> to vector<1x128xf32>
    %29 = vector.broadcast %28 : vector<1x128xf32> to vector<256x128xf32>
    %c0_21 = arith.constant 0 : index
    %c0_22 = arith.constant 0 : index
    %c0_23 = arith.constant 0 : index
    %30 = vector.load %arg11[%c0_21, %c0_22, %c0_23] : memref<18x18x128xbf16, #tpu.memory_space<vmem>>, vector<16x16x128xbf16>
    %31 = vector.shape_cast %30 : vector<16x16x128xbf16> to vector<256x128xbf16>
    %c0_24 = arith.constant 0 : index
    %c0_25 = arith.constant 0 : index
    %c0_26 = arith.constant 0 : index
    %32 = vector.load %arg6[%c0_24, %c0_25, %c0_26] : memref<9x128x128xbf16, #tpu.memory_space<vmem>>, vector<1x128x128xbf16>
    %33 = vector.shape_cast %32 : vector<1x128x128xbf16> to vector<128x128xbf16>
    %cst_27 = arith.constant dense<0.000000e+00> : vector<256x128xf32>
    %34 = tpu.matmul %31, %33, %cst_27 {dimension_numbers = #tpu.dot_dimension_numbers<[1], [0], [0], [1], [0, 0, 1, 1], [], []>} : vector<256x128xbf16>, vector<128x128xbf16>, vector<256x128xf32> -> vector<256x128xf32>
    %35 = arith.addf %29, %34 : vector<256x128xf32>
    %c0_28 = arith.constant 0 : index
    %c1_29 = arith.constant 1 : index
    %c0_30 = arith.constant 0 : index
    %36 = vector.load %arg11[%c0_28, %c1_29, %c0_30] : memref<18x18x128xbf16, #tpu.memory_space<vmem>>, vector<16x16x128xbf16>
    %37 = vector.shape_cast %36 : vector<16x16x128xbf16> to vector<256x128xbf16>
    %c1_31 = arith.constant 1 : index
    %c0_32 = arith.constant 0 : index
    %c0_33 = arith.constant 0 : index
    %38 = vector.load %arg6[%c1_31, %c0_32, %c0_33] : memref<9x128x128xbf16, #tpu.memory_space<vmem>>, vector<1x128x128xbf16>
    %39 = vector.shape_cast %38 : vector<1x128x128xbf16> to vector<128x128xbf16>
    %cst_34 = arith.constant dense<0.000000e+00> : vector<256x128xf32>
    %40 = tpu.matmul %37, %39, %cst_34 {dimension_numbers = #tpu.dot_dimension_numbers<[1], [0], [0], [1], [0, 0, 1, 1], [], []>} : vector<256x128xbf16>, vector<128x128xbf16>, vector<256x128xf32> -> vector<256x128xf32>
    %41 = arith.addf %35, %40 : vector<256x128xf32>
    %c0_35 = arith.constant 0 : index
    %c2 = arith.constant 2 : index
    %c0_36 = arith.constant 0 : index
    %42 = vector.load %arg11[%c0_35, %c2, %c0_36] : memref<18x18x128xbf16, #tpu.memory_space<vmem>>, vector<16x16x128xbf16>
    %43 = vector.shape_cast %42 : vector<16x16x128xbf16> to vector<256x128xbf16>
    %c2_37 = arith.constant 2 : index
    %c0_38 = arith.constant 0 : index
    %c0_39 = arith.constant 0 : index
    %44 = vector.load %arg6[%c2_37, %c0_38, %c0_39] : memref<9x128x128xbf16, #tpu.memory_space<vmem>>, vector<1x128x128xbf16>
    %45 = vector.shape_cast %44 : vector<1x128x128xbf16> to vector<128x128xbf16>
    %cst_40 = arith.constant dense<0.000000e+00> : vector<256x128xf32>
    %46 = tpu.matmul %43, %45, %cst_40 {dimension_numbers = #tpu.dot_dimension_numbers<[1], [0], [0], [1], [0, 0, 1, 1], [], []>} : vector<256x128xbf16>, vector<128x128xbf16>, vector<256x128xf32> -> vector<256x128xf32>
    %47 = arith.addf %41, %46 : vector<256x128xf32>
    %c1_41 = arith.constant 1 : index
    %c0_42 = arith.constant 0 : index
    %c0_43 = arith.constant 0 : index
    %48 = vector.load %arg11[%c1_41, %c0_42, %c0_43] : memref<18x18x128xbf16, #tpu.memory_space<vmem>>, vector<16x16x128xbf16>
    %49 = vector.shape_cast %48 : vector<16x16x128xbf16> to vector<256x128xbf16>
    %c3 = arith.constant 3 : index
    %c0_44 = arith.constant 0 : index
    %c0_45 = arith.constant 0 : index
    %50 = vector.load %arg6[%c3, %c0_44, %c0_45] : memref<9x128x128xbf16, #tpu.memory_space<vmem>>, vector<1x128x128xbf16>
    %51 = vector.shape_cast %50 : vector<1x128x128xbf16> to vector<128x128xbf16>
    %cst_46 = arith.constant dense<0.000000e+00> : vector<256x128xf32>
    %52 = tpu.matmul %49, %51, %cst_46 {dimension_numbers = #tpu.dot_dimension_numbers<[1], [0], [0], [1], [0, 0, 1, 1], [], []>} : vector<256x128xbf16>, vector<128x128xbf16>, vector<256x128xf32> -> vector<256x128xf32>
    %53 = arith.addf %47, %52 : vector<256x128xf32>
    %c1_47 = arith.constant 1 : index
    %c1_48 = arith.constant 1 : index
    %c0_49 = arith.constant 0 : index
    %54 = vector.load %arg11[%c1_47, %c1_48, %c0_49] : memref<18x18x128xbf16, #tpu.memory_space<vmem>>, vector<16x16x128xbf16>
    %55 = vector.shape_cast %54 : vector<16x16x128xbf16> to vector<256x128xbf16>
    %c4 = arith.constant 4 : index
    %c0_50 = arith.constant 0 : index
    %c0_51 = arith.constant 0 : index
    %56 = vector.load %arg6[%c4, %c0_50, %c0_51] : memref<9x128x128xbf16, #tpu.memory_space<vmem>>, vector<1x128x128xbf16>
    %57 = vector.shape_cast %56 : vector<1x128x128xbf16> to vector<128x128xbf16>
    %cst_52 = arith.constant dense<0.000000e+00> : vector<256x128xf32>
    %58 = tpu.matmul %55, %57, %cst_52 {dimension_numbers = #tpu.dot_dimension_numbers<[1], [0], [0], [1], [0, 0, 1, 1], [], []>} : vector<256x128xbf16>, vector<128x128xbf16>, vector<256x128xf32> -> vector<256x128xf32>
    %59 = arith.addf %53, %58 : vector<256x128xf32>
    %c1_53 = arith.constant 1 : index
    %c2_54 = arith.constant 2 : index
    %c0_55 = arith.constant 0 : index
    %60 = vector.load %arg11[%c1_53, %c2_54, %c0_55] : memref<18x18x128xbf16, #tpu.memory_space<vmem>>, vector<16x16x128xbf16>
    %61 = vector.shape_cast %60 : vector<16x16x128xbf16> to vector<256x128xbf16>
    %c5 = arith.constant 5 : index
    %c0_56 = arith.constant 0 : index
    %c0_57 = arith.constant 0 : index
    %62 = vector.load %arg6[%c5, %c0_56, %c0_57] : memref<9x128x128xbf16, #tpu.memory_space<vmem>>, vector<1x128x128xbf16>
    %63 = vector.shape_cast %62 : vector<1x128x128xbf16> to vector<128x128xbf16>
    %cst_58 = arith.constant dense<0.000000e+00> : vector<256x128xf32>
    %64 = tpu.matmul %61, %63, %cst_58 {dimension_numbers = #tpu.dot_dimension_numbers<[1], [0], [0], [1], [0, 0, 1, 1], [], []>} : vector<256x128xbf16>, vector<128x128xbf16>, vector<256x128xf32> -> vector<256x128xf32>
    %65 = arith.addf %59, %64 : vector<256x128xf32>
    %c2_59 = arith.constant 2 : index
    %c0_60 = arith.constant 0 : index
    %c0_61 = arith.constant 0 : index
    %66 = vector.load %arg11[%c2_59, %c0_60, %c0_61] : memref<18x18x128xbf16, #tpu.memory_space<vmem>>, vector<16x16x128xbf16>
    %67 = vector.shape_cast %66 : vector<16x16x128xbf16> to vector<256x128xbf16>
    %c6 = arith.constant 6 : index
    %c0_62 = arith.constant 0 : index
    %c0_63 = arith.constant 0 : index
    %68 = vector.load %arg6[%c6, %c0_62, %c0_63] : memref<9x128x128xbf16, #tpu.memory_space<vmem>>, vector<1x128x128xbf16>
    %69 = vector.shape_cast %68 : vector<1x128x128xbf16> to vector<128x128xbf16>
    %cst_64 = arith.constant dense<0.000000e+00> : vector<256x128xf32>
    %70 = tpu.matmul %67, %69, %cst_64 {dimension_numbers = #tpu.dot_dimension_numbers<[1], [0], [0], [1], [0, 0, 1, 1], [], []>} : vector<256x128xbf16>, vector<128x128xbf16>, vector<256x128xf32> -> vector<256x128xf32>
    %71 = arith.addf %65, %70 : vector<256x128xf32>
    %c2_65 = arith.constant 2 : index
    %c1_66 = arith.constant 1 : index
    %c0_67 = arith.constant 0 : index
    %72 = vector.load %arg11[%c2_65, %c1_66, %c0_67] : memref<18x18x128xbf16, #tpu.memory_space<vmem>>, vector<16x16x128xbf16>
    %73 = vector.shape_cast %72 : vector<16x16x128xbf16> to vector<256x128xbf16>
    %c7 = arith.constant 7 : index
    %c0_68 = arith.constant 0 : index
    %c0_69 = arith.constant 0 : index
    %74 = vector.load %arg6[%c7, %c0_68, %c0_69] : memref<9x128x128xbf16, #tpu.memory_space<vmem>>, vector<1x128x128xbf16>
    %75 = vector.shape_cast %74 : vector<1x128x128xbf16> to vector<128x128xbf16>
    %cst_70 = arith.constant dense<0.000000e+00> : vector<256x128xf32>
    %76 = tpu.matmul %73, %75, %cst_70 {dimension_numbers = #tpu.dot_dimension_numbers<[1], [0], [0], [1], [0, 0, 1, 1], [], []>} : vector<256x128xbf16>, vector<128x128xbf16>, vector<256x128xf32> -> vector<256x128xf32>
    %77 = arith.addf %71, %76 : vector<256x128xf32>
    %c2_71 = arith.constant 2 : index
    %c2_72 = arith.constant 2 : index
    %c0_73 = arith.constant 0 : index
    %78 = vector.load %arg11[%c2_71, %c2_72, %c0_73] : memref<18x18x128xbf16, #tpu.memory_space<vmem>>, vector<16x16x128xbf16>
    %79 = vector.shape_cast %78 : vector<16x16x128xbf16> to vector<256x128xbf16>
    %c8 = arith.constant 8 : index
    %c0_74 = arith.constant 0 : index
    %c0_75 = arith.constant 0 : index
    %80 = vector.load %arg6[%c8, %c0_74, %c0_75] : memref<9x128x128xbf16, #tpu.memory_space<vmem>>, vector<1x128x128xbf16>
    %81 = vector.shape_cast %80 : vector<1x128x128xbf16> to vector<128x128xbf16>
    %cst_76 = arith.constant dense<0.000000e+00> : vector<256x128xf32>
    %82 = tpu.matmul %79, %81, %cst_76 {dimension_numbers = #tpu.dot_dimension_numbers<[1], [0], [0], [1], [0, 0, 1, 1], [], []>} : vector<256x128xbf16>, vector<128x128xbf16>, vector<256x128xf32> -> vector<256x128xf32>
    %83 = arith.addf %77, %82 : vector<256x128xf32>
    %cst_77 = arith.constant 0.000000e+00 : f32
    %84 = vector.broadcast %cst_77 : f32 to vector<256x128xf32>
    %85 = arith.maximumf %83, %84 : vector<256x128xf32>
    %86 = arith.truncf %85 : vector<256x128xf32> to vector<256x128xbf16>
    %c0_78 = arith.constant 0 : index
    %c0_79 = arith.constant 0 : index
    %87 = vector.load %arg8[%c0_78, %c0_79] : memref<128x128xbf16, #tpu.memory_space<vmem>>, vector<128x128xbf16>
    %cst_80 = arith.constant dense<0.000000e+00> : vector<256x128xf32>
    %88 = tpu.matmul %86, %87, %cst_80 {dimension_numbers = #tpu.dot_dimension_numbers<[1], [0], [0], [1], [0, 0, 1, 1], [], []>} : vector<256x128xbf16>, vector<128x128xbf16>, vector<256x128xf32> -> vector<256x128xf32>
    %89 = vector.shape_cast %13 : vector<16x16x128xbf16> to vector<256x128xbf16>
    %c0_81 = arith.constant 0 : index
    %c0_82 = arith.constant 0 : index
    %90 = vector.load %arg9[%c0_81, %c0_82] : memref<128x128xbf16, #tpu.memory_space<vmem>>, vector<128x128xbf16>
    %cst_83 = arith.constant dense<0.000000e+00> : vector<256x128xf32>
    %91 = tpu.matmul %89, %90, %cst_83 {dimension_numbers = #tpu.dot_dimension_numbers<[1], [0], [0], [1], [0, 0, 1, 1], [], []>} : vector<256x128xbf16>, vector<128x128xbf16>, vector<256x128xf32> -> vector<256x128xf32>
    %92 = arith.addf %88, %91 : vector<256x128xf32>
    %93 = vector.shape_cast %92 : vector<256x128xf32> to vector<1x16x16x128xf32>
    %c0_84 = arith.constant 0 : index
    %c0_85 = arith.constant 0 : index
    %c0_86 = arith.constant 0 : index
    %c0_87 = arith.constant 0 : index
    %94 = vector.load %arg10[%c0_84, %c0_85, %c0_86, %c0_87] : memref<1x16x16x128xf32, #tpu.memory_space<vmem>>, vector<1x16x16x128xf32>
    tpu.vector_store %arg10[%c0_84, %c0_85, %c0_86, %c0_87], %93 {strides = array<i32>} : memref<1x16x16x128xf32, #tpu.memory_space<vmem>>, vector<1x16x16x128xf32>,
    return
  }
  func.func @transform_0(%arg0: i32) -> (i32, i32, i32, i32) {
    %c0_i32 = arith.constant 0 : i32
    %c0_i32_0 = arith.constant 0 : i32
    %c0_i32_1 = arith.constant 0 : i32
    %c0_i32_2 = arith.constant 0 : i32
    return %arg0, %c0_i32, %c0_i32_0, %c0_i32_1 : i32, i32, i32, i32
  }
  func.func @transform_1(%arg0: i32) -> (i32, i32) {
    %c0_i32 = arith.constant 0 : i32
    %c0_i32_0 = arith.constant 0 : i32
    %c0_i32_1 = arith.constant 0 : i32
    return %c0_i32, %c0_i32_0 : i32, i32
  }
  func.func @transform_2(%arg0: i32) -> (i32, i32) {
    %c0_i32 = arith.constant 0 : i32
    %c0_i32_0 = arith.constant 0 : i32
    %c0_i32_1 = arith.constant 0 : i32
    return %c0_i32, %c0_i32_0 : i32, i32
  }
  func.func @transform_3(%arg0: i32) -> (i32, i32) {
    %c0_i32 = arith.constant 0 : i32
    %c0_i32_0 = arith.constant 0 : i32
    %c0_i32_1 = arith.constant 0 : i32
    return %c0_i32, %c0_i32_0 : i32, i32
  }
  func.func @transform_4(%arg0: i32) -> (i32, i32) {
    %c0_i32 = arith.constant 0 : i32
    %c0_i32_0 = arith.constant 0 : i32
    %c0_i32_1 = arith.constant 0 : i32
    return %c0_i32, %c0_i32_0 : i32, i32
  }
  func.func @transform_5(%arg0: i32) -> (i32, i32, i32) {
    %c0_i32 = arith.constant 0 : i32
    %c0_i32_0 = arith.constant 0 : i32
    %c0_i32_1 = arith.constant 0 : i32
    %c0_i32_2 = arith.constant 0 : i32
    return %c0_i32, %c0_i32_0, %c0_i32_1 : i32, i32, i32
  }
  func.func @transform_6(%arg0: i32) -> (i32, i32) {
    %c0_i32 = arith.constant 0 : i32
    %c0_i32_0 = arith.constant 0 : i32
    %c0_i32_1 = arith.constant 0 : i32
    return %c0_i32, %c0_i32_0 : i32, i32
  }
  func.func @transform_7(%arg0: i32) -> (i32, i32) {
    %c0_i32 = arith.constant 0 : i32
    %c0_i32_0 = arith.constant 0 : i32
    %c0_i32_1 = arith.constant 0 : i32
    return %c0_i32, %c0_i32_0 : i32, i32
  }
  func.func @transform_8(%arg0: i32) -> (i32, i32) {
    %c0_i32 = arith.constant 0 : i32
    %c0_i32_0 = arith.constant 0 : i32
    %c0_i32_1 = arith.constant 0 : i32
    return %c0_i32, %c0_i32_0 : i32, i32
  }
  func.func @transform_9(%arg0: i32) -> (i32, i32, i32, i32) {
    %c0_i32 = arith.constant 0 : i32
    %c0_i32_0 = arith.constant 0 : i32
    %c0_i32_1 = arith.constant 0 : i32
    %c0_i32_2 = arith.constant 0 : i32
    return %arg0, %c0_i32, %c0_i32_0, %c0_i32_1 : i32, i32, i32, i32
  }
}

</mosaic_0001>

<bundles_post_ra>
// kernel: tpu_custom_call.1
= control target key start
LH: loop header
LB: loop body
LE: loop exit
PB: predicated region body
PF: predicated region fallthrough
CT: control target
= control target key end

     0   :  { %s11123_s0 = inlined_call_operand.hbm [shape: bf16[2,16,16,128], index: 0, kind: input, shape index: {}]   ;;  %s11124_s1 = inlined_call_operand.vmem [shape: f32[1,128], index: 1, kind: input, shape index: {}]   ;;  %s11125_s2 = inlined_call_operand.vmem [shape: f32[1,128], index: 2, kind: input, shape index: {}]   ;;  %s11126_s3 = inlined_call_operand.hbm [shape: bf16[128,128], index: 3, kind: input, shape index: {}]   ;;  %s11127_s4 = inlined_call_operand.vmem [shape: f32[1,128], index: 4, kind: input, shape index: {}]   ;;  %s11128_s5 = inlined_call_operand.hbm [shape: bf16[9,128,128], index: 5, kind: input, shape index: {}]   ;;  %s11129_s6 = inlined_call_operand.vmem [shape: f32[1,128], index: 6, kind: input, shape index: {}]   ;;  %s11130_s7 = inlined_call_operand.hbm [shape: bf16[128,128], index: 7, kind: input, shape index: {}]   ;;  %s11131_s8 = inlined_call_operand.hbm [shape: bf16[128,128], index: 8, kind: input, shape index: {}]   ;;  %s11132_s9 = inlined_call_operand.hbm [shape: f32[2,16,16,128], index: 9, kind: output, shape index: {}]  }
   0x1   :  { %11167 = sst [smem:[#allocation47_spill]] %s11132_s9 }
   0x2   :  { %14 = vsyncpa [#allocation4], 0 }
   0x3   :  { %16 = vsyncpa [#allocation4 + $0x1], 0 }
   0x4   :  { %17 = vsyncpa [#allocation7], 0 }
   0x5   :  { %18 = vsyncpa [#allocation10], 0 }
   0x6   :  { %19 = vsyncpa [#allocation5], 0 }
   0x7   :  { %21 = vsyncpa [#allocation5 + $0x1], 0  ;;  %s9236_s30 = smov 0   ;;  %s9238_s10 = smov 0  }
   0x8   :  { %s9240_s11 = smov 0   ;;  %s9242_s12 = smov 0  }
   0x9 LB: > { %11168 = sst [smem:[#allocation17_spill]] %s9161_s30  ;;  %s9257_s13 = sadd.s32 4294967295, %s9173_s12   ;;  %s9173_s12 = sphi %s9242_s12, %s11280_s12   ;;  %s9169_s11 = sphi %s9240_s11, %s11279_s11   ;;  %s9165_s10 = sphi %s9238_s10, %s11278_s10   ;;  %s9161_s30 = sphi %s9236_s30, %s11277_s30  }
   0xa   : > { %s7037_s14 = sadd.s32 4294967294, %s9173_s12   ;;  %p47_p0 = scmp.ne.s32.totalorder %s9165_s10, %s9161_s30 }
   0xb   : > { %p11133_p1 = scmp.eq.s32.totalorder %s9257_s13, 0  ;;  %p245_p3 = scmp.eq.s32.totalorder %s7037_s14, 1 }
   0xc   : > { %p7038_p5 = scmp.ge.s32.totalorder %s9173_s12, 1  ;;  %p252_p7 = scmp.lt.s32.totalorder %s9173_s12, 3 }
   0xd   : > { %p9266_p4 = por %p11133_p1, %p47_p0  ;;  %p9271_p6 = por %p245_p3, %p47_p0 }
   0xe   : > { %p9276_p8 = pnand %p7038_p5, %p252_p7  ;;  %s9175_s18 = smov [#allocation6]  }
   0xf   : > { %s11169_s15 = scalar_select %p9266_p4, 1, 0 }
  0x10   : > { %s11170_s16 = scalar_select %p9271_p6, 1, 0 }
  0x11   : > { %s11172_s17 = scalar_select %p9276_p8, 1, 0 }
  0x12   : > { %11171 = sst [smem:[#allocation18_spill]] %s11170_s16  ;;  %s270_s19 = sshll.u32 %s9175_s18, 4  ;;  %s9280_s19 = int_to_ptr.vmem [resolvable:$true] %s270_s19 }
  0x13   : > { %p8700_p9 = pneg %p9276_p8  ;;  %s9176_s21 = smov [#allocation9]  }
  0x14   : > { %s302_s22 = sshll.u32 %s9176_s21, 4  ;;  %s9177_s23 = smov [#allocation8]   ;;  %s9291_s22 = int_to_ptr.vmem [resolvable:$true] %s302_s22 }
  0x15   : > { %p9287_p11 = pnand %p8700_p9, %p11133_p1  ;;  %s9293_s24 = sshll.u32 %s9177_s23, 4  ;;  %s287_s24 = int_to_ptr.vmem [resolvable:$true] %s9293_s24 }
  0x16   : > { %s8957_s27 = scalar_lea.hbm %s11126_s3, 1024 }
  0x17   : > { %p8958_p12 = scmp.ne.s32.totalorder %s11126_s3, %s8957_s27  ;;  %p9303_p13 = pneg %p9287_p11 }
  0x18   : > { %p8964_p5 = scmp.lt.u32.totalorder %s8957_s27, %s11126_s3 }
  0x19   : > { %p8960_p0 = pnand %p9303_p13, %p8958_p12 }
  0x1b   : > { %p8961_p3 = pneg %p8960_p0 }
  0x1d   : > { %p8966_p7 = pnand %p8964_p5, %p8961_p3 }
  0x1f   : > { %8969 = shalt.err (!%p8966_p7)
}
  0x20   : > { %s8970_s23 = scalar_lea.vmem %s9280_s19, 1024  ;;  %p8978_p2 = scmp.lt.s32.totalorder %s9280_s19, %s9280_s19 }
  0x21   : > { %p8971_p9 = scmp.ne.s32.totalorder %s9280_s19, %s8970_s23  ;;  %p8979_p6 = scmp.lt.s32.totalorder %s8970_s23, %s8970_s23 }
  0x23   : > { %p8973_p10 = pnand %p8971_p9, %p9303_p13  ;;  %p8980_p12 = por %p8979_p6, %p8978_p2 }
  0x25   : > { %p8974_p1 = pneg %p8973_p10 }
  0x27   : > { %p8981_p0 = pnand %p8980_p12, %p8974_p1 }
  0x29   : > { %8984 = shalt.err (!%p8981_p0)
}
  0x2a   : > { %s9178_s25 = smov 64   ;;  %s9179_s26 = smov 4  }
  0x2b   : > { %8703 = dma.hbm_to_vmem [thread:$0]  (!%p9287_p11), %s11126_s3, 1024, %s9280_s19, [#allocation7], %s9178_s25, %s9178_s25, %s9179_s26  }
  0x2c   : > { %s8985_s21 = scalar_lea.hbm %s11130_s7, 1024 }
  0x2d   : > { %p8986_p1 = scmp.ne.s32.totalorder %s11130_s7, %s8985_s21  ;;  %p8992_p10 = scmp.lt.u32.totalorder %s8985_s21, %s11130_s7 }
  0x2f   : > { %p8988_p2 = pnand %p8986_p1, %p9303_p13 }
  0x31   : > { %p8989_p6 = pneg %p8988_p2 }
  0x33   : > { %p8994_p3 = pnand %p8992_p10, %p8989_p6 }
  0x35   : > { %8997 = shalt.err (!%p8994_p3)
}
  0x36   : > { %s8998_s19 = scalar_lea.vmem %s9291_s22, 1024  ;;  %p9006_p12 = scmp.lt.s32.totalorder %s9291_s22, %s9291_s22 }
  0x37   : > { %p8999_p5 = scmp.ne.s32.totalorder %s9291_s22, %s8998_s19  ;;  %p9007_p0 = scmp.lt.s32.totalorder %s8998_s19, %s8998_s19 }
  0x39   : > { %p9001_p7 = pnand %p8999_p5, %p9303_p13  ;;  %p9008_p1 = por %p9007_p0, %p9006_p12 }
  0x3b   : > { %p9002_p9 = pneg %p9001_p7 }
  0x3d   : > { %p9009_p2 = pnand %p9008_p1, %p9002_p9 }
  0x3f   : > { %9012 = shalt.err (!%p9009_p2)
}
  0x40   : > { %8709 = dma.hbm_to_vmem [thread:$0]  (!%p9287_p11), %s11130_s7, 1024, %s9291_s22, [#allocation10], %s9178_s25, %s9178_s25, %s9179_s26  }
  0x41   : > { %s9013_s28 = scalar_lea.hbm %s11128_s5, 9216 }
  0x42   : > { %p9014_p6 = scmp.ne.s32.totalorder %s11128_s5, %s9013_s28  ;;  %p9020_p5 = scmp.lt.u32.totalorder %s9013_s28, %s11128_s5 }
  0x44   : > { %p9016_p10 = pnand %p9014_p6, %p9303_p13 }
  0x46   : > { %p9017_p3 = pneg %p9016_p10 }
  0x48   : > { %p9022_p7 = pnand %p9020_p5, %p9017_p3 }
  0x4a   : > { %9025 = shalt.err (!%p9022_p7)
}
  0x4b   : > { %s9026_s19 = scalar_lea.vmem %s287_s24, 9216  ;;  %p9034_p1 = scmp.lt.s32.totalorder %s287_s24, %s287_s24 }
  0x4c   : > { %p9027_p9 = scmp.ne.s32.totalorder %s287_s24, %s9026_s19  ;;  %p9035_p2 = scmp.lt.s32.totalorder %s9026_s19, %s9026_s19 }
  0x4e   : > { %p9029_p12 = pnand %p9027_p9, %p9303_p13  ;;  %p9036_p4 = por %p9035_p2, %p9034_p1 }
  0x50   : > { %p9030_p0 = pneg %p9029_p12 }
  0x52   : > { %p9037_p8 = pnand %p9036_p4, %p9030_p0 }
  0x54   : > { %9040 = shalt.err (!%p9037_p8)
}
  0x55   : > { %8706 = dma.hbm_to_vmem [thread:$0]  (!%p9287_p11), %s11128_s5, 9216, %s287_s24, [#allocation7], %s9178_s25, %s9178_s25, %s9179_s26  }
  0x56   : > { %s9180_s30 = smov [#allocation11]   ;;  %s9041_s29 = scalar_lea.hbm %s11131_s8, 1024 }
  0x57   : > { %s315_s16 = sshll.u32 %s9180_s30, 4  ;;  %p9042_p4 = scmp.ne.s32.totalorder %s11131_s8, %s9041_s29  ;;  %s316_s16 = int_to_ptr.vmem [resolvable:$true] %s315_s16 }
  0x58   : > { %p9048_p10 = scmp.lt.u32.totalorder %s9041_s29, %s11131_s8 }
  0x59   : > { %p9044_p8 = pnand %p9042_p4, %p9303_p13 }
  0x5b   : > { %p9045_p6 = pneg %p9044_p8 }
  0x5d   : > { %p9050_p3 = pnand %p9048_p10, %p9045_p6 }
  0x5f   : > { %9053 = shalt.err (!%p9050_p3)
}
  0x60   : > { %s9054_s24 = scalar_lea.vmem %s316_s16, 1024  ;;  %p9062_p12 = scmp.lt.s32.totalorder %s316_s16, %s316_s16 }
  0x61   : > { %p9055_p5 = scmp.ne.s32.totalorder %s316_s16, %s9054_s24  ;;  %p9063_p0 = scmp.lt.s32.totalorder %s9054_s24, %s9054_s24 }
  0x63   : > { %p9057_p7 = pnand %p9055_p5, %p9303_p13  ;;  %p9064_p1 = por %p9063_p0, %p9062_p12 }
  0x65   : > { %p9058_p9 = pneg %p9057_p7 }
  0x67   : > { %p9065_p2 = pnand %p9064_p1, %p9058_p9 }
  0x69   : > { %9068 = shalt.err (!%p9065_p2)
}
  0x6a   : > { %8712 = dma.hbm_to_vmem [thread:$0]  (!%p9287_p11), %s11131_s8, 1024, %s316_s16, [#allocation10], %s9178_s25, %s9178_s25, %s9179_s26  }
  0x6b   : > { %s9397_s14 = sadd.s32 1, %s9173_s12   ;;  %s34_s20 = sadd.s32 1, %s9169_s11 }
  0x6c   : > { %s31_s30 = ssub.s32 %s9173_s12, %s9397_s14  ;;  %p41_p13 = scmp.ne.s32.totalorder %s9169_s11, %s9165_s10 }
  0x6d   : > { %p32_p4 = scmp.eq.s32.totalorder %s31_s30, 0  ;;  %p42_p8 = scmp.eq.s32.totalorder %s9173_s12, 0 }
  0x6e   : > { %p11175_p6 = scmp.eq.s32.totalorder %s9257_s13, 1  ;;  %p8725_p3 = scmp.lt.s32.totalorder %s9173_s12, 2 }
  0x6f   : > { %s9413_s28 = scalar_select %p32_p4, %s9169_s11, %s34_s20  }
  0x70   : > { %p9407_p10 = por %p11175_p6, %p41_p13  ;;  %p43_p5 = por %p42_p8, %p41_p13 }
  0x71   : > { %s329_s29 = sand.u32 1, %s9169_s11   ;;  %s7383_s16 = sshll.u32 %s9173_s12, 11 }
  0x72   : > { %s7044_s18 = sshll.u32 %s329_s29, 7  ;;  %s9420_s19 = scalar_lea.hbm %s11123_s0, %s7383_s16 }
  0x73   : > { %s333_s24 = scalar_lea.vmem [#allocation3], %s7044_s18  ;;  %p9424_p11 = pnand %p8725_p3, %p43_p5 }
  0x74   : > { %s340_s22 = sshll.u32 %s333_s24, 4  ;;  %s9428_s20 = scalar_lea.sflag [#allocation4], %s329_s29  ;;  %s9422_s22 = int_to_ptr.vmem [resolvable:$true] %s340_s22 }
  0x75   : > { %s9069_s30 = scalar_lea.hbm %s9420_s19, 2048  ;;  %p9071_p9 = pneg %p9424_p11 }
  0x76   : > { %p9070_p7 = scmp.ne.s32.totalorder %s9420_s19, %s9069_s30  ;;  %s9074_s21 = scalar_lea.hbm %s11123_s0, 4096 }
  0x77   : > { %p9075_p1 = scmp.lt.u32.totalorder %s9420_s19, %s11123_s0  ;;  %p9076_p2 = scmp.lt.u32.totalorder %s9074_s21, %s9069_s30 }
  0x78   : > { %p9072_p12 = pnand %p9071_p9, %p9070_p7  ;;  %p9078_p4 = scmp.lt.u32.totalorder %s9069_s30, %s9420_s19 }
  0x79   : > { %p9077_p13 = por %p9076_p2, %p9075_p1 }
  0x7a   : > { %p9073_p0 = pneg %p9072_p12 }
  0x7b   : > { %p9079_p8 = por %p9078_p4, %p9077_p13 }
  0x7d   : > { %p9080_p6 = pnand %p9079_p8, %p9073_p0 }
  0x7f   : > { %9083 = shalt.err (!%p9080_p6)
}
  0x80   : > { %s9084_s29 = scalar_lea.vmem %s9422_s22, 2048  ;;  %s9181_s18 = smov [#allocation3]  }
  0x81   : > { %p9085_p3 = scmp.ne.s32.totalorder %s9422_s22, %s9084_s29  ;;  %s9089_s16 = sshll.u32 %s9181_s18, 4  ;;  %s9090_s16 = int_to_ptr.vmem [resolvable:$false] %s9089_s16 }
  0x82   : > { %s9091_s23 = scalar_lea.vmem %s9090_s16, 4096  ;;  %p9092_p12 = scmp.lt.s32.totalorder %s9422_s22, %s9090_s16 }
  0x83   : > { %p9087_p5 = pnand %p9085_p3, %p9071_p9  ;;  %p9093_p1 = scmp.lt.s32.totalorder %s9091_s23, %s9084_s29 }
  0x85   : > { %p9088_p7 = pneg %p9087_p5  ;;  %p9094_p2 = por %p9093_p1, %p9092_p12 }
  0x87   : > { %p9095_p13 = pnand %p9094_p2, %p9088_p7 }
  0x89   : > { %9098 = shalt.err (!%p9095_p13)
}
  0x8a   : > { %8716 = dma.hbm_to_vmem [thread:$0]  (!%p9424_p11), %s9420_s19, 2048, %s9422_s22, %s9428_s20, %s9178_s25, %s9178_s25, %s9179_s26  }
  0x8b   : > { %p11178_p9 = scmp.ne.s32.totalorder %s11172_s17, 0 }
  0x8d   : > { %352 = sbr.rel (%p11178_p9) target bundleno = 1333 (0x535), region = 56 }
  0x94   : > { %s9462_s30 = sand.u32 1, %s9165_s10   ;;  %p11179_p0 = scmp.ne.s32.totalorder %s11169_s15, 0 }
  0x95   : > { %s7048_s21 = sshll.u32 %s9462_s30, 7  ;;  %s355_s24 = scalar_lea.sflag [#allocation4], %s9462_s30 }
  0x96   : > { %s9466_s29 = scalar_lea.vmem [#allocation3], %s7048_s21 }
  0x97   : > { %9144 = dma.done.wait (%p11179_p0), %s355_s24, 2048  }
  0x98   : > { %9146 = vsyncadd (%p11179_p0), %s355_s24, 4294965248  ;;  %p11180_p11 = scmp.eq.s32.totalorder %s9257_s13, 0 }
  0x9a   : > { %9148 = dma.done.wait (%p11180_p11), [#allocation7], 10240   ;;  %p11181_p4 = pmov %p11180_p11 }
  0x9c   : > { %9150 = vsyncadd (%p11181_p4), [#allocation7], 4294957056  ;;  %p11182_p8 = pmov %p11181_p4 }
  0x9d   : > { %p11183_p6 = pmov %p11181_p4 }
  0x9e   : > { %9152 = dma.done.wait (%p11182_p8), [#allocation10], 2048  }
  0x9f   : > { %9154 = vsyncadd (%p11183_p6), [#allocation10], 4294965248  ;;  %v8772_v0 = vld [vmem:[#allocation6] sm:$0xff]   ;;  %v8773_v1 = vld [vmem:[#allocation6 + $0x8] sm:$0xff]   ;;  %vm1338_vm0 = vcmask 1043456   ;;  %vm1345_vm4 = vcmask 1040384  }
  0xa0   : > { %7784 = vmatprep.subr.bf16.mxu0 %v8772_v0  ;;  %v8774_v2 = vld [vmem:[#allocation6 + $0x10] sm:$0xff]   ;;  %v8775_v3 = vld [vmem:[#allocation6 + $0x18] sm:$0xff]   ;;  %v9483_v4 = vld [vmem:[%s11124_s1] ss:$0 sm:$0xff]  ;;  %vm1339_vm1 = vsmask.f32 7938 }
  0xa1   : > { %7785 = vmatpush3.bf16.msra.mxu0 %v8772_v0  ;;  %v7418_v5 = vld [vmem:[%s9466_s29] sm:$0xff]   ;;  %v7481_v8 = vld [vmem:[%s9466_s29 + $0x8] sm:$0xff]   ;;  %v7482_v9 = vld [vmem:[%s9466_s29 + $0x10] sm:$0xff]   ;;  %vm1014_vm2 = vsmask.f32 256  ;;  %vm2668_vm11 = vcmask 1042432  }
  0xa2   : > { %7786 = vmatprep.subr.bf16.mxu0 %v8773_v1  ;;  %v7419_v6 = vunpack.c.l.bf16 %v7418_v5  ;;  %v7420_v7 = vunpack.c.h.bf16 %v7418_v5  ;;  %v7483_v10 = vld [vmem:[%s9466_s29 + $0x18] sm:$0xff]   ;;  %v9492_v11 = vld [vmem:[%s11125_s2] ss:$0 sm:$0xff]  ;;  %v7423_v12 = vunpack.c.l.bf16 %v7481_v8  ;;  %v7424_v13 = vunpack.c.h.bf16 %v7481_v8  ;;  %v8776_v20 = vld [vmem:[#allocation6 + $0x20] sm:$0xff]   ;;  %s7053_s23 = sshll.u32 %s9462_s30, 8  ;;  %s7416_s24 = sshll.u32 %s9257_s13, 12 }
  0xa3   : > { %v7427_v14 = vunpack.c.l.bf16 %v7482_v9  ;;  %v7428_v15 = vunpack.c.h.bf16 %v7482_v9  ;;  %v7431_v18 = vunpack.c.l.bf16 %v7483_v10  ;;  %v7432_v19 = vunpack.c.h.bf16 %v7483_v10  ;;  %v7484_v27 = vld [vmem:[%s9466_s29 + $0x20] sm:$0xff]   ;;  %v7485_v31 = vld [vmem:[%s9466_s29 + $0x28] sm:$0xff]   ;;  %v7486_v37 = vld [vmem:[%s9466_s29 + $0x30] sm:$0xff]   ;;  %s11038_s21 = scalar_lea.vmem [#allocation12], %s7053_s23  ;;  %s11272_s25 = sld [smem:[#allocation47_spill]] }
  0xa4   : > { %v482_v16 = vmul.f32 %v7419_v6, %v9483_v4  ;;  %v483_v17 = vmul.f32 %v7420_v7, %v9483_v4  ;;  %v484_v21 = vmul.f32 %v7423_v12, %v9483_v4  ;;  %v485_v22 = vmul.f32 %v7424_v13, %v9483_v4  ;;  %v8777_v35 = vld [vmem:[#allocation6 + $0x28] sm:$0xff]   ;;  %v8781_v38 = vld [vmem:[#allocation8 + $0xc0] sm:$0xff]   ;;  %v7487_v43 = vld [vmem:[%s9466_s29 + $0x38] sm:$0xff]   ;;  %s6913_s13 = scalar_lea.sflag [#allocation5], %s9462_s30  ;;  %s9183_s22 = smov [#allocation12]  }
  0xa5   : > { %7787 = vmatpush3.bf16.msra.mxu0 %v8773_v1  ;;  %v486_v23 = vmul.f32 %v7427_v14, %v9483_v4  ;;  %v487_v26 = vmul.f32 %v7428_v15, %v9483_v4  ;;  %v488_v30 = vmul.f32 %v7431_v18, %v9483_v4  ;;  %v489_v34 = vmul.f32 %v7432_v19, %v9483_v4  ;;  %v8778_v44 = vld [vmem:[#allocation6 + $0x30] sm:$0xff]   ;;  %v8783_v49 = vld [vmem:[#allocation8 + $0xc8] sm:$0xff]   ;;  %v7488_v58 = vld [vmem:[%s9466_s29 + $0x40] sm:$0xff]   ;;  %s9103_s9 = sshll.u32 %s9183_s22, 4  ;;  %s9104_s9 = int_to_ptr.vmem [resolvable:$false] %s9103_s9 }
  0xa6   : > { %7788 = vmatprep.subr.bf16.mxu0 %v8774_v2  ;;  %v520_v24 = vadd.f32 %v9492_v11, %v482_v16  ;;  %v521_v25 = vadd.f32 %v9492_v11, %v483_v17  ;;  %v522_v28 = vadd.f32 %v9492_v11, %v484_v21  ;;  %v523_v29 = vadd.f32 %v9492_v11, %v485_v22  ;;  %v8779_v63 = vld [vmem:[#allocation6 + $0x38] sm:$0xff]   ;;  %v7490_v9 = vld [vmem:[%s9466_s29 + $0x50] sm:$0xff]   ;;  %vm9712_vm5 = vmand %vm1338_vm0, %vm1339_vm1  ;;  %s9105_s20 = scalar_lea.vmem %s9104_s9, 8192 }
  0xa7   : > { %v9509_v36 = vadd.f32 %v9492_v11, %v486_v23  ;;  %v9515_v41 = vadd.f32 %v9492_v11, %v487_v26  ;;  %v7435_v42 = vunpack.c.l.bf16 %v7484_v27  ;;  %v9519_v46 = vadd.f32 %v9492_v11, %v488_v30  ;;  %7976 = vmatprep.subr.bf16.mxu1 %v8781_v38  ;;  %v7491_v18 = vld [vmem:[%s9466_s29 + $0x58] sm:$0xff]   ;;  %v8780_v23 = vld [vmem:[#allocation8] sm:$0xff]   ;;  %vm9725_vm7 = vmand %vm1345_vm4, %vm1014_vm2 }
  0xa8   : > { %v552_v32 = vmax.f32 %v520_v24, 0.0  ;;  %v553_v33 = vmax.f32 %v521_v25, 0.0  ;;  %v554_v40 = vmax.f32 %v522_v28, 0.0  ;;  %v555_v45 = vmax.f32 %v523_v29, 0.0  ;;  %7977 = vmatpush3.bf16.msra.mxu1 %v8781_v38 }
  0xa9   : > { %7789 = vmatpush3.bf16.msra.mxu0 %v8774_v2  ;;  %v7436_v47 = vunpack.c.h.bf16 %v7484_v27  ;;  %v7439_v48 = vunpack.c.l.bf16 %v7485_v31  ;;  %v9523_v50 = vadd.f32 %v9492_v11, %v489_v34  ;;  %v490_v51 = vmul.f32 %v7435_v42, %v9483_v4  ;;  %7978 = vmatprep.subr.bf16.mxu1 %v8783_v49  ;;  %s11074_s26 = scalar_lea.hbm %s11272_s25, %s7416_s24 }
  0xaa   : > { %7790 = vmatprep.subr.bf16.mxu0 %v8775_v3  ;;  %v9512_v39 = vpack.c.bf16 %v553_v33, %v552_v32  ;;  %v7440_v52 = vunpack.c.h.bf16 %v7485_v31  ;;  %v7443_v53 = vunpack.c.l.bf16 %v7486_v37  ;;  %v7444_v56 = vunpack.c.h.bf16 %v7486_v37  ;;  %v7492_v32 = vld [vmem:[%s9466_s29 + $0x60] sm:$0xff]  }
  0xab   : > { %v491_v54 = vmul.f32 %v7436_v47, %v9483_v4  ;;  %v492_v55 = vmul.f32 %v7439_v48, %v9483_v4  ;;  %v7447_v57 = vunpack.c.l.bf16 %v7487_v43  ;;  %v9530_v59 = vadd.f32 %v9492_v11, %v490_v51  ;;  %v8782_v51 = vld [vmem:[#allocation8 + $0x8] sm:$0xff]  }
  0xac   : > { %7800 = vmatprep.mubr.bf16.mxu0 %v9512_v39  ;;  %v493_v60 = vmul.f32 %v7440_v52, %v9483_v4  ;;  %v494_v61 = vmul.f32 %v7443_v53, %v9483_v4  ;;  %v7448_v62 = vunpack.c.h.bf16 %v7487_v43  ;;  %v495_v2 = vmul.f32 %v7444_v56, %v9483_v4  ;;  %7979 = vmatpush3.bf16.msra.mxu1 %v8783_v49  ;;  %v7494_v56 = vld [vmem:[%s9466_s29 + $0x70] sm:$0xff]  }
  0xad   : > { %7791 = vmatpush3.bf16.msra.mxu0 %v8775_v3  ;;  %v9535_v0 = vadd.f32 %v9492_v11, %v491_v54  ;;  %v9538_v1 = vadd.f32 %v9492_v11, %v492_v55  ;;  %v7489_v3 = vld [vmem:[%s9466_s29 + $0x48] sm:$0xff]   ;;  %v556_v5 = vmax.f32 %v9509_v36, 0.0  ;;  %v557_v6 = vmax.f32 %v9515_v41, 0.0 }
  0xae   : > { %7792 = vmatprep.subr.bf16.mxu0 %v8776_v20  ;;  %v9545_v7 = vadd.f32 %v9492_v11, %v493_v60  ;;  %v9548_v8 = vadd.f32 %v9492_v11, %v494_v61  ;;  %v558_v10 = vmax.f32 %v9519_v46, 0.0  ;;  %v559_v12 = vmax.f32 %v9523_v50, 0.0  ;;  %v7493_v46 = vld [vmem:[%s9466_s29 + $0x68] sm:$0xff]  }
  0xaf   : > { %v496_v13 = vmul.f32 %v7447_v57, %v9483_v4  ;;  %v9554_v14 = vpack.c.bf16 %v555_v45, %v554_v40  ;;  %v560_v15 = vmax.f32 %v9530_v59, 0.0  ;;  %v497_v16 = vmul.f32 %v7448_v62, %v9483_v4 }
  0xb0   : > { %v7451_v17 = vunpack.c.l.bf16 %v7488_v58  ;;  %v561_v19 = vmax.f32 %v9535_v0, 0.0  ;;  %v9562_v21 = vadd.f32 %v9492_v11, %v495_v2  ;;  %v7452_v22 = vunpack.c.h.bf16 %v7488_v58  ;;  %v7495_v2 = vld [vmem:[%s9466_s29 + $0x78] sm:$0xff]   ;;  %s6926_s29 = sshll.u32 %s11038_s21, 4  ;;  %s11076_s29 = int_to_ptr.vmem [resolvable:$true] %s6926_s29 }
  0xb1   : > { %7793 = vmatpush3.bf16.msra.mxu0 %v8776_v20  ;;  %v562_v20 = vmax.f32 %v9538_v1, 0.0  ;;  %v563_v24 = vmax.f32 %v9545_v7, 0.0  ;;  %v564_v25 = vmax.f32 %v9548_v8, 0.0  ;;  %v7455_v27 = vunpack.c.l.bf16 %v7489_v3  ;;  %s9099_s19 = scalar_lea.vmem %s11076_s29, 4096  ;;  %p9106_p12 = scmp.lt.s32.totalorder %s11076_s29, %s9104_s9 }
  0xb2   : > { %7794 = vmatprep.subr.bf16.mxu0 %v8777_v35  ;;  %v498_v26 = vmul.f32 %v7451_v17, %v9483_v4  ;;  %v9568_v28 = vadd.f32 %v9492_v11, %v496_v13  ;;  %v499_v29 = vmul.f32 %v7452_v22, %v9483_v4  ;;  %v7456_v30 = vunpack.c.h.bf16 %v7489_v3  ;;  %p9100_p3 = scmp.ne.s32.totalorder %s11076_s29, %s9099_s19  ;;  %p9107_p1 = scmp.lt.s32.totalorder %s9105_s20, %s9099_s19 }
  0xb3   : > { %v7459_v31 = vunpack.c.l.bf16 %v7490_v9  ;;  %v9572_v33 = vpack.c.bf16 %v557_v6, %v556_v5  ;;  %v9575_v34 = vadd.f32 %v9492_v11, %v497_v16  ;;  %v7460_v36 = vunpack.c.h.bf16 %v7490_v9 }
  0xb4   : > { %v9579_v37 = vadd.f32 %v9492_v11, %v498_v26  ;;  %v501_v38 = vmul.f32 %v7456_v30, %v9483_v4  ;;  %v7463_v41 = vunpack.c.l.bf16 %v7491_v18  ;;  %v565_v42 = vmax.f32 %v9562_v21, 0.0  ;;  %p9101_p5 = pnand %p9100_p3, %p9407_p10  ;;  %p9108_p2 = por %p9107_p1, %p9106_p12 }
  0xb5   : > { %7795 = vmatpush3.bf16.msra.mxu0 %v8777_v35  ;;  %v500_v35 = vmul.f32 %v7455_v27, %v9483_v4  ;;  %v502_v40 = vmul.f32 %v7459_v31, %v9483_v4  ;;  %v9585_v43 = vadd.f32 %v9492_v11, %v499_v29  ;;  %v7464_v45 = vunpack.c.h.bf16 %v7491_v18 }
  0xb6   : > { %7796 = vmatprep.subr.bf16.mxu0 %v8778_v44  ;;  %v566_v47 = vmax.f32 %v9568_v28, 0.0  ;;  %v9594_v49 = vadd.f32 %v9492_v11, %v501_v38  ;;  %v504_v50 = vmul.f32 %v7463_v41, %v9483_v4  ;;  %v7467_v55 = vunpack.c.l.bf16 %v7492_v32  ;;  %v8785_v28 = vld [vmem:[#allocation8 + $0xd0] sm:$0xff]   ;;  %p9102_p7 = pneg %p9101_p5 }
  0xb7   : > { %v9591_v48 = vadd.f32 %v9492_v11, %v500_v35  ;;  %v9598_v52 = vadd.f32 %v9492_v11, %v502_v40  ;;  %v505_v54 = vmul.f32 %v7464_v45, %v9483_v4  ;;  %v9606_v57 = vpack.c.bf16 %v559_v12, %v558_v10  ;;  %7980 = vmatprep.subr.bf16.mxu1 %v8785_v28 }
  0xb8   : > { %v9608_v58 = vpack.c.bf16 %v561_v19, %v560_v15  ;;  %v567_v59 = vmax.f32 %v9575_v34, 0.0  ;;  %v568_v60 = vmax.f32 %v9579_v37, 0.0  ;;  %v569_v61 = vmax.f32 %v9585_v43, 0.0  ;;  %7981 = vmatpush3.bf16.msra.mxu1 %v8785_v28  ;;  %p9109_p13 = pnand %p9108_p2, %p9102_p7 }
  0xb9   : > { %7797 = vmatpush3.bf16.msra.mxu0 %v8778_v44  ;;  %v503_v44 = vmul.f32 %v7460_v36, %v9483_v4  ;;  %v542_v62 = vadd.f32 %v9492_v11, %v504_v50  ;;  %v506_v0 = vmul.f32 %v7467_v55, %v9483_v4  ;;  %v570_v3 = vmax.f32 %v9591_v48, 0.0 }
  0xba   : > { %7798 = vmatprep.subr.bf16.mxu0 %v8779_v63  ;;  %v571_v5 = vmax.f32 %v9594_v49, 0.0  ;;  %v7471_v6 = vunpack.c.l.bf16 %v7493_v46  ;;  %v7472_v9 = vunpack.c.h.bf16 %v7493_v46  ;;  %v572_v10 = vmax.f32 %v9598_v52, 0.0 }
  0xbb   : > { %v9601_v53 = vadd.f32 %v9492_v11, %v503_v44  ;;  %v543_v13 = vadd.f32 %v9492_v11, %v505_v54  ;;  %v544_v16 = vadd.f32 %v9492_v11, %v506_v0  ;;  %v7475_v18 = vunpack.c.l.bf16 %v7494_v56  ;;  %v8793_v0 = vld [vmem:[#allocation8 + $0xf0] sm:$0xff]  }
  0xbc   : > { %v508_v17 = vmul.f32 %v7471_v6, %v9483_v4  ;;  %v7476_v19 = vunpack.c.h.bf16 %v7494_v56  ;;  %v574_v22 = vmax.f32 %v542_v62, 0.0  ;;  %v509_v26 = vmul.f32 %v7472_v9, %v9483_v4  ;;  %v8787_v56 = vld [vmem:[#allocation8 + $0xd8] sm:$0xff]   ;;  %v8791_v62 = vld [vmem:[#allocation8 + $0xe8] sm:$0xff]   ;;  %v9682_v6 = vld [vmem:[#allocation8 + $0x100] sm:$0xff]  }
  0xbd   : > { %7799 = vmatpush3.bf16.msra.mxu0 %v8779_v63  ;;  %v7468_v63 = vunpack.c.h.bf16 %v7492_v32  ;;  %v573_v12 = vmax.f32 %v9601_v53, 0.0  ;;  %v7479_v27 = vunpack.c.l.bf16 %v7495_v2  ;;  %v510_v29 = vmul.f32 %v7475_v18, %v9483_v4  ;;  %7982 = vmatprep.subr.bf16.mxu1 %v8787_v56  ;;  %v9685_v9 = vld [vmem:[#allocation8 + $0x40] sm:$0xff]  }
  0xbe   : > { %7832 = vmatprep.subr.bf16.mxu0 %v8780_v23  ;;  %v511_v30 = vmul.f32 %v7476_v19, %v9483_v4  ;;  %v575_v31 = vmax.f32 %v543_v13, 0.0  ;;  %v546_v32 = vadd.f32 %v9492_v11, %v508_v17  ;;  %v7480_v34 = vunpack.c.h.bf16 %v7495_v2  ;;  %7983 = vmatpush3.bf16.msra.mxu1 %v8787_v56  ;;  %v8794_v2 = vld [vmem:[#allocation8 + $0x38] sm:$0xff]  }
  0xbf   : > { %v507_v15 = vmul.f32 %v7468_v63, %v9483_v4  ;;  %v512_v35 = vmul.f32 %v7479_v27, %v9483_v4  ;;  %v576_v36 = vmax.f32 %v544_v16, 0.0  ;;  %v548_v38 = vadd.f32 %v9492_v11, %v510_v29  ;;  %v8792_v63 = vld [vmem:[#allocation8 + $0x30] sm:$0xff]  }
  0xc0   : > { %7801 = vmatmul.mubr.bf16.vlgmr.msra.gmra.mrb[0].mxu0 %v9554_v14  ;;  %v549_v40 = vadd.f32 %v9492_v11, %v511_v30  ;;  %v547_v41 = vadd.f32 %v9492_v11, %v509_v26  ;;  %v513_v43 = vmul.f32 %v7480_v34, %v9483_v4  ;;  %v578_v48 = vmax.f32 %v546_v32, 0.0 }
  0xc1   : > { %7804 = vmatprep.mubr.bf16.mxu0 %v9572_v33  ;;  %7833 = vmatpush3.bf16.msra.mxu0 %v8780_v23  ;;  %v545_v23 = vadd.f32 %v9492_v11, %v507_v15  ;;  %v550_v44 = vadd.f32 %v9492_v11, %v512_v35  ;;  %v580_v45 = vmax.f32 %v548_v38, 0.0  ;;  %v9651_v4 = vpack.c.bf16 %v565_v42, %v564_v25  ;;  %v8784_v25 = vld [vmem:[#allocation8 + $0x10] sm:$0xff]  }
  0xc2   : > { %7834 = vmatprep.subr.bf16.mxu0 %v8782_v51  ;;  %v581_v46 = vmax.f32 %v549_v40, 0.0  ;;  %v551_v49 = vadd.f32 %v9492_v11, %v513_v43  ;;  %v579_v53 = vmax.f32 %v547_v41, 0.0  ;;  %v9659_v11 = vpack.c.bf16 %v567_v59, %v566_v47  ;;  %v8786_v47 = vld [vmem:[#allocation8 + $0x18] sm:$0xff]   ;;  %v8788_v59 = vld [vmem:[#allocation8 + $0x20] sm:$0xff]  }
  0xc3   : > { %v577_v37 = vmax.f32 %v545_v23, 0.0  ;;  %v582_v50 = vmax.f32 %v550_v44, 0.0  ;;  %11185 = vst [vmem:[#allocation20_spill] sm:$0xff] %v9651_v4  ;;  %v9661_v1 = vpack.c.bf16 %v569_v61, %v568_v60  ;;  %v9665_v7 = vpack.c.bf16 %v571_v5, %v570_v3  ;;  %v8789_v60 = vld [vmem:[#allocation8 + $0xe0] sm:$0xff]   ;;  %v8790_v61 = vld [vmem:[#allocation8 + $0x28] sm:$0xff]   ;;  %v8795_v3 = vld [vmem:[#allocation8 + $0xf8] sm:$0xff]  }
  0xc4   : > { %v9645_v52 = vpack.c.bf16 %v581_v46, %v580_v45  ;;  %v583_v54 = vmax.f32 %v551_v49, 0.0  ;;  %11187 = vst [vmem:[#allocation22_spill] sm:$0xff] %v9659_v11  ;;  %v9667_v8 = vpack.c.bf16 %v573_v12, %v572_v10  ;;  %v9182_v42 = vmov 0   ;;  %7984 = vmatprep.subr.bf16.mxu1 %v8789_v60  ;;  %v9691_v12 = vld [vmem:[%s11127_s4] ss:$0 sm:$0xff] }
  0xc5   : > { %7835 = vmatpush3.bf16.msra.mxu0 %v8782_v51  ;;  %v9643_v51 = vpack.c.bf16 %v563_v24, %v562_v20  ;;  %11188 = vst [vmem:[#allocation23_spill] sm:$0xff] %v9661_v1  ;;  %11189 = vst [vmem:[#allocation24_spill] sm:$0xff] %v9665_v7  ;;  %v9671_v20 = vpack.c.bf16 %v575_v31, %v574_v22  ;;  %v9673_v21 = vpack.c.bf16 %v577_v37, %v576_v36  ;;  %vm1015_vm3 = vsmask.f32 4368 }
  0xc6   : > { %11184 = vst [vmem:[#allocation19_spill] sm:$0xff] %v9645_v52  ;;  %v9653_v55 = vpack.c.bf16 %v583_v54, %v582_v50  ;;  %11190 = vst [vmem:[#allocation25_spill] sm:$0xff] %v9667_v8  ;;  %v9677_v24 = vpack.c.bf16 %v579_v53, %v578_v48  ;;  %7836 = vmatprep.subr.bf16.mxu0 %v8784_v25  ;;  %7985 = vmatpush3.bf16.msra.mxu1 %v8789_v60  ;;  %vm1895_vm8 = vsmask.f32 3328  ;;  %vm1896_vm9 = vsmask.f32 7440 }
  0xc7   : > { %11191 = vst [vmem:[#allocation26_spill] sm:$0xff] %v9671_v20  ;;  %11192 = vst [vmem:[#allocation27_spill] sm:$0xff] %v9673_v21  ;;  %7986 = vmatprep.subr.bf16.mxu1 %v8791_v62  ;;  %vm2669_vm12 = vcmask 1046532  }
  0xc8   : > { %7805 = vmatmul.mubr.bf16.gmra.mrb[4].mxu0 %v9606_v57  ;;  %11186 = vst [vmem:[#allocation21_spill] sm:$0xff] %v9653_v55  ;;  %11193 = vst [vmem:[#allocation28_spill] sm:$0xff] %v9677_v24 }
  0xc9   : > { %7808 = vmatprep.mubr.bf16.mxu0 %v9608_v58  ;;  %7837 = vmatpush3.bf16.msra.mxu0 %v8784_v25  ;;  %870 = vst [vmem:[#allocation2 + $0x18] sm:$0xf] %v9182_v42  ;;  %864 = vst [vmem:[#allocation2] sm:$0xf] %v9182_v42 }
  0xca   : > { %865 = vst [vmem:[#allocation2 + $0x4] sm:$0xf] %v9182_v42  ;;  %866 = vst [vmem:[#allocation2 + $0x8] sm:$0x1] %v9182_v42  ;;  %7838 = vmatprep.subr.bf16.mxu0 %v8786_v47  ;;  %7987 = vmatpush3.bf16.msra.mxu1 %v8791_v62 }
  0xcb   : > { %867 = vst [vmem:[#allocation2 + $0xc] sm:$0xf] %v9182_v42  ;;  %868 = vst [vmem:[#allocation2 + $0x10] sm:$0xf] %v9182_v42  ;;  %7988 = vmatprep.subr.bf16.mxu1 %v8793_v0 }
  0xcc   : > { %869 = vst [vmem:[#allocation2 + $0x14] sm:$0x1] %v9182_v42  ;;  %871 = vst [vmem:[#allocation2 + $0x1c] sm:$0xf] %v9182_v42 }
  0xcd   : > { %872 = vst [vmem:[#allocation2 + $0x20] sm:$0x1] %v9182_v42  ;;  %873 = vst [vmem:[#allocation2 + $0x24] sm:$0xf] %v9182_v42  ;;  %7839 = vmatpush3.bf16.msra.mxu0 %v8786_v47 }
  0xce   : > { %874 = vst [vmem:[#allocation2 + $0x28] sm:$0xf] %v9182_v42  ;;  %875 = vst [vmem:[#allocation2 + $0x2c] sm:$0x1] %v9182_v42  ;;  %7840 = vmatprep.subr.bf16.mxu0 %v8788_v59  ;;  %7989 = vmatpush3.bf16.msra.mxu1 %v8793_v0 }
  0xcf   : > { %876 = vst [vmem:[#allocation2 + $0x30] sm:$0xf] %v9182_v42  ;;  %877 = vst [vmem:[#allocation2 + $0x34] sm:$0xf] %v9182_v42  ;;  %7990 = vmatprep.subr.bf16.mxu1 %v8795_v3 }
  0xd0   : > { %7809 = vmatmul.mubr.bf16.gmra.mrb[8].mxu0 %v9643_v51  ;;  %878 = vst [vmem:[#allocation2 + $0x38] sm:$0x1] %v9182_v42  ;;  %879 = vst [vmem:[#allocation2 + $0x3c] sm:$0xf] %v9182_v42  ;;  %v1847_v10 = vld [vmem:[#allocation2] sm:$0xf] }
  0xd1   : > { %7812 = vmatprep.mubr.bf16.mxu0 %v9651_v4  ;;  %880 = vst [vmem:[#allocation2 + $0x40] sm:$0xf] %v9182_v42  ;;  %881 = vst [vmem:[#allocation2 + $0x44] sm:$0x1] %v9182_v42  ;;  %7841 = vmatpush3.bf16.msra.mxu0 %v8788_v59  ;;  %v8796_v5 = vld [vmem:[#allocation2] sm:$0xff]   ;;  %v1899_v16 = vshrl.u32 %v1847_v10, 16 }
  0xd2   : > { %882 = vst [vmem:[#allocation2 + $0x48] sm:$0xf] %v9182_v42  ;;  %883 = vst [vmem:[#allocation2 + $0x4c] sm:$0xf] %v9182_v42  ;;  %7842 = vmatprep.subr.bf16.mxu0 %v8790_v61  ;;  %7991 = vmatpush3.bf16.msra.mxu1 %v8795_v3  ;;  %v1848_v13 = vld [vmem:[#allocation2 + $0x4] sm:$0xf] }
  0xd3   : > { %884 = vst [vmem:[#allocation2 + $0x50] sm:$0x1] %v9182_v42  ;;  %885 = vst [vmem:[#allocation2 + $0x54] sm:$0xf] %v9182_v42  ;;  %8024 = vmatprep.subr.bf16.mxu1 %v9682_v6  ;;  %v1849_v15 = vld [vmem:[#allocation2 + $0x8] sm:$0x1] }
  0xd4   : > { %886 = vst [vmem:[#allocation2 + $0x58] sm:$0xf] %v9182_v42  ;;  %887 = vst [vmem:[#allocation2 + $0x5c] sm:$0x1] %v9182_v42  ;;  %v1902_v17 = vshll.u32 %v1847_v10, 16  ;;  %v1908_v27 = vshll.u32 %v1848_v13, 16 }
  0xd5   : > { %888 = vst [vmem:[#allocation2 + $0x60] sm:$0xf] %v9182_v42  ;;  %889 = vst [vmem:[#allocation2 + $0x64] sm:$0xf] %v9182_v42  ;;  %7843 = vmatpush3.bf16.msra.mxu0 %v8790_v61  ;;  %v1912_v29 = vshrl.u32 %v1848_v13, 16  ;;  %v1918_v30 = vshll.u32 %v1849_v15, 16 }
  0xd6   : > { %890 = vst [vmem:[#allocation2 + $0x68] sm:$0x1] %v9182_v42  ;;  %891 = vst [vmem:[#allocation2 + $0x6c] sm:$0xf] %v9182_v42  ;;  %7844 = vmatprep.subr.bf16.mxu0 %v8792_v63  ;;  %v9696_v35 = vrot.slane %v1899_v16, 4  ;;  %v9698_v36 = vrot.slane %v1902_v17, 5 }
  0xd7   : > { %892 = vst [vmem:[#allocation2 + $0x70] sm:$0xf] %v9182_v42  ;;  %893 = vst [vmem:[#allocation2 + $0x74] sm:$0x1] %v9182_v42  ;;  %v9701_v45 = vrot.slane %v1908_v27, 5  ;;  %v9703_v46 = vrot.slane %v1912_v29, 4 }
  0xd8   : > { %7813 = vmatmul.mubr.bf16.gmra.mrb[12].mxu0 %v9659_v11  ;;  %894 = vst [vmem:[#allocation2 + $0x78] sm:$0xf] %v9182_v42  ;;  %895 = vst [vmem:[#allocation2 + $0x7c] sm:$0xf] %v9182_v42  ;;  %v1905_v50 = vor.u32 %v9698_v36, %v9696_v35  ;;  %v9707_v53 = vrot.slane %v1918_v30, 5  ;;  %v8864_v4 = vld [vmem:[#allocation8 + $0x1a0] sm:$0xff]  }
  0xd9   : > { %7816 = vmatprep.mubr.bf16.mxu0 %v9661_v1  ;;  %896 = vst [vmem:[#allocation2 + $0x80] sm:$0x1] %v9182_v42  ;;  %897 = vst [vmem:[#allocation2 + $0x84] sm:$0xf] %v9182_v42  ;;  %7845 = vmatpush3.bf16.msra.mxu0 %v8792_v63  ;;  %v1350_v0 = vld [vmem:[#allocation2 + $0x18] sm:$0xf] }
  0xda   : > { %898 = vst [vmem:[#allocation2 + $0x88] sm:$0xf] %v9182_v42  ;;  %899 = vst [vmem:[#allocation2 + $0x8c] sm:$0x1] %v9182_v42  ;;  %7846 = vmatprep.subr.bf16.mxu0 %v8794_v2  ;;  %v1341_v17 = vld [vmem:[#allocation2 + $0xc] sm:$0xf] }
  0xdb   : > { %900 = vst [vmem:[#allocation2 + $0x90] sm:$0xf] %v9182_v42  ;;  %901 = vst [vmem:[#allocation2 + $0x94] sm:$0xf] %v9182_v42  ;;  %v1354_v30 = vld [vmem:[#allocation2 + $0x20] sm:$0x1] }
  0xdc   : > { %902 = vst [vmem:[#allocation2 + $0x98] sm:$0x1] %v9182_v42  ;;  %903 = vst [vmem:[#allocation2 + $0x9c] sm:$0xf] %v9182_v42 }
  0xdd   : > { %904 = vst [vmem:[#allocation2 + $0xa0] sm:$0xf] %v9182_v42  ;;  %905 = vst [vmem:[#allocation2 + $0xa4] sm:$0x1] %v9182_v42  ;;  %7847 = vmatpush3.bf16.msra.mxu0 %v8794_v2 }
  0xde   : > { %906 = vst [vmem:[#allocation2 + $0xa8] sm:$0xf] %v9182_v42  ;;  %907 = vst [vmem:[#allocation2 + $0xac] sm:$0xf] %v9182_v42  ;;  %7880 = vmatprep.subr.bf16.mxu0 %v9685_v9 }
  0xdf   : > { %908 = vst [vmem:[#allocation2 + $0xb0] sm:$0x1] %v9182_v42  ;;  %909 = vst [vmem:[#allocation2 + $0xb4] sm:$0xf] %v9182_v42 }
  0xe0   : > { %7817 = vmatmul.mubr.bf16.gmra.mrb[16].mxu0 %v9665_v7  ;;  %910 = vst [vmem:[#allocation2 + $0xb8] sm:$0xf] %v9182_v42  ;;  %911 = vst [vmem:[#allocation2 + $0xbc] sm:$0x1] %v9182_v42 }
  0xe1   : > { %7820 = vmatprep.mubr.bf16.mxu0 %v9667_v8  ;;  %912 = vst [vmem:[#allocation2 + $0xc0] sm:$0xf] %v9182_v42  ;;  %913 = vst [vmem:[#allocation2 + $0xc4] sm:$0xf] %v9182_v42  ;;  %v8919_v8 = vld [vmem:[#allocation2 + $0x4] sm:$0xf] }
  0xe2   : > { %914 = vst [vmem:[#allocation2 + $0xc8] sm:$0x1] %v9182_v42  ;;  %915 = vst [vmem:[#allocation2 + $0xcc] sm:$0xf] %v9182_v42  ;;  %v2673_v7 = vrot.slane %v8919_v8, 5 }
  0xe3   : > { %916 = vst [vmem:[#allocation2 + $0xd0] sm:$0xf] %v9182_v42  ;;  %917 = vst [vmem:[#allocation2 + $0xd4] sm:$0x1] %v9182_v42 }
  0xe4   : > { %vm9719_vm6 = vmor %vm1014_vm2, %vm1015_vm3 }
  0xe5   : > { %vm9977_vm10 = vmor %vm1895_vm8, %vm1896_vm9 }
  0xe6   : > { %vm10221_vm13 = vmor %vm2668_vm11, %vm2669_vm12 }
  0xe8   : > { %7821 = vmatmul.mubr.bf16.gmra.mrb[20].mxu0 %v9671_v20 }
  0xe9   : > { %7824 = vmatprep.mubr.bf16.mxu0 %v9673_v21 }
  0xf0   : > { %7825 = vmatmul.mubr.bf16.gmra.mrb[24].mxu0 %v9677_v24 }
  0xf1   : > { %7828 = vmatprep.mubr.bf16.mxu0 %v9645_v52 }
  0xf8   : > { %7829 = vmatmul.mubr.bf16.gmra.mrb[28].mxu0 %v9653_v55 }
  0xf9   : > { %7848 = vmatprep.mubr.bf16.mxu0 %v8796_v5 }
 0x193   : > { %v7802_v18 = vpop.f32.mrb[0].mxu0 }
 0x194   : > { %v714_v19 = vadd.f32 %v7802_v18, %v9691_v12  ;;  %v705_v22 = vpop.f32.mrb[1].mxu0 }
 0x195   : > { %v706_v23 = vadd.f32 %v9691_v12, %v705_v22  ;;  %v7803_v26 = vpop.f32.mrb[2].mxu0 }
 0x196   : > { %v834_v31 = vmax.f32 %v714_v19, 0.0  ;;  %v717_v32 = vadd.f32 %v7803_v26, %v9691_v12  ;;  %v708_v34 = vpop.f32.mrb[3].mxu0 }
 0x197   : > { %v832_v37 = vmax.f32 %v706_v23, 0.0  ;;  %v709_v38 = vadd.f32 %v9691_v12, %v708_v34 }
 0x198   : > { %v7386_v40 = vpack.c.bf16 %v834_v31, %v834_v31  ;;  %v835_v41 = vmax.f32 %v717_v32, 0.0 }
 0x199   : > { %v7384_v43 = vpack.c.bf16 %v832_v37, %v832_v37  ;;  %v833_v44 = vmax.f32 %v709_v38, 0.0 }
 0x19a   : > { %v1035_v48 = vshrl.u32 %v7386_v40, 16  ;;  %v7387_v49 = vpack.c.bf16 %v835_v41, %v835_v41  ;;  %v1038_v54 = vshll.u32 %v7386_v40, 16  ;;  %v1347_v40 = vld [vmem:[#allocation2 + $0x14] sm:$0x1] }
 0x19b   : > { %v1018_v25 = vshrl.u32 %v7384_v43, 16  ;;  %v1021_v28 = vshll.u32 %v7384_v43, 16  ;;  %v7385_v42 = vpack.c.bf16 %v833_v44, %v833_v44  ;;  %v7806_v47 = vpop.f32.mrb[4].mxu0 }
 0x19c   : > { %v1037_v56 = vrot.slane %v1035_v48, 7  ;;  %v1043_v59 = vshrl.u32 %v7387_v49, 16  ;;  %v1046_v60 = vshll.u32 %v7387_v49, 16  ;;  %v730_v61 = vadd.f32 %v7806_v47, %v9691_v12  ;;  %v721_v62 = vpop.f32.mrb[5].mxu0 }
 0x19d   : > { %v1020_v2 = vrot.slane %v1018_v25, 7  ;;  %v1026_v3 = vshrl.u32 %v7385_v42, 16  ;;  %v1029_v5 = vshll.u32 %v7385_v42, 16  ;;  %v722_v10 = vadd.f32 %v9691_v12, %v721_v62  ;;  %v7807_v13 = vpop.f32.mrb[6].mxu0 }
 0x19e   : > { %v1040_v15 = vor.u32 %v1038_v54, %v1037_v56  ;;  %v1041_v16 = vrot.slane %v1037_v56, 4  ;;  %v1045_v19 = vrot.slane %v1043_v59, 7  ;;  %v838_v22 = vmax.f32 %v730_v61, 0.0  ;;  %v724_v23 = vpop.f32.mrb[7].mxu0 }
 0x19f   : > { %v1023_v26 = vor.u32 %v1021_v28, %v1020_v2  ;;  %v1024_v27 = vrot.slane %v1020_v2, 4  ;;  %v1028_v31 = vrot.slane %v1026_v3, 7  ;;  %v836_v32 = vmax.f32 %v722_v10, 0.0  ;;  %v1364_v10 = vld [vmem:[#allocation2 + $0x30] sm:$0xf] }
 0x1a0   : > { %v1351_v34 = vsel %vm9712_vm5, %v1040_v15, %v1350_v0  ;;  %v1048_v37 = vor.u32 %v1046_v60, %v1045_v19  ;;  %v1050_v38 = vrot.slane %v1045_v19, 4  ;;  %v7390_v41 = vpack.c.bf16 %v838_v22, %v838_v22 }
 0x1a1   : > { %1352 = vst [vmem:[#allocation2 + $0x18] sm:$0xf] %v1351_v34  ;;  %v1342_v43 = vsel %vm9712_vm5, %v1023_v26, %v1341_v17  ;;  %v1031_v44 = vor.u32 %v1029_v5, %v1028_v31  ;;  %v1033_v48 = vrot.slane %v1028_v31, 4  ;;  %v7388_v49 = vpack.c.bf16 %v836_v32, %v836_v32 }
 0x1a2   : > { %1343 = vst [vmem:[#allocation2 + $0xc] sm:$0xf] %v1342_v43  ;;  %v1049_v54 = vsel %vm9719_vm6, %v1041_v16, %v1048_v37  ;;  %v1355_v25 = vsel %vm9725_vm7, %v1050_v38, %v1354_v30  ;;  %v1069_v28 = vshrl.u32 %v7390_v41, 16  ;;  %v1915_v42 = vor.u32 %v9703_v46, %v9701_v45  ;;  %v1452_v46 = vld [vmem:[#allocation2 + $0xc8] sm:$0x1] }
 0x1a3   : > { %1353 = vst [vmem:[#allocation2 + $0x1c] sm:$0xf] %v1049_v54  ;;  %1356 = vst [vmem:[#allocation2 + $0x20] sm:$0x1] %v1355_v25  ;;  %v1032_v47 = vsel %vm9719_vm6, %v1024_v27, %v1031_v44  ;;  %v1348_v56 = vsel %vm9725_vm7, %v1033_v48, %v1347_v40  ;;  %v1072_v59 = vshll.u32 %v7390_v41, 16  ;;  %v1052_v60 = vshrl.u32 %v7388_v49, 16 }
 0x1a4   : > { %v7810_v61 = vpop.f32.mrb[8].mxu0  ;;  %1344 = vst [vmem:[#allocation2 + $0x10] sm:$0xf] %v1032_v47  ;;  %1349 = vst [vmem:[#allocation2 + $0x14] sm:$0x1] %v1348_v56  ;;  %v9743_v62 = vrot.slane %v1069_v28, 7  ;;  %v733_v0 = vadd.f32 %v7807_v13, %v9691_v12  ;;  %v725_v2 = vadd.f32 %v9691_v12, %v724_v23 }
 0x1a5   : > { %v746_v3 = vadd.f32 %v7810_v61, %v9691_v12  ;;  %v737_v5 = vpop.f32.mrb[9].mxu0  ;;  %v9748_v15 = vrot.slane %v1052_v60, 7  ;;  %v1055_v16 = vshll.u32 %v7388_v49, 16  ;;  %v9754_v22 = vrot.slane %v1905_v50, 4  ;;  %v1357_v23 = vld [vmem:[#allocation2 + $0x24] sm:$0xf] }
 0x1a6   : > { %v738_v17 = vadd.f32 %v9691_v12, %v737_v5  ;;  %v7811_v19 = vpop.f32.mrb[10].mxu0  ;;  %v1074_v26 = vor.u32 %v1072_v59, %v9743_v62  ;;  %v1075_v13 = vrot.slane %v9743_v62, 4  ;;  %v839_v27 = vmax.f32 %v733_v0, 0.0  ;;  %v9768_v49 = vld [vmem:[#allocation8 + $0x48] sm:$0xff]   ;;  %v1368_v56 = vld [vmem:[#allocation2 + $0x38] sm:$0x1] }
 0x1a7   : > { %v837_v30 = vmax.f32 %v725_v2, 0.0  ;;  %v740_v31 = vpop.f32.mrb[11].mxu0  ;;  %v1057_v32 = vor.u32 %v1055_v16, %v9748_v15  ;;  %v1058_v34 = vrot.slane %v9748_v15, 4  ;;  %v842_v37 = vmax.f32 %v746_v3, 0.0  ;;  %v1361_v59 = vld [vmem:[#allocation2 + $0x2c] sm:$0x1] }
 0x1a8   : > { %v840_v38 = vmax.f32 %v738_v17, 0.0  ;;  %v1365_v40 = vsel %vm9712_vm5, %v1074_v26, %v1364_v10  ;;  %v7391_v35 = vpack.c.bf16 %v839_v27, %v839_v27  ;;  %v9763_v50 = vadd.f32 %v7811_v19, %v9691_v12  ;;  %v1378_v16 = vld [vmem:[#allocation2 + $0x48] sm:$0xf]  ;;  %v1371_v17 = vld [vmem:[#allocation2 + $0x3c] sm:$0xf] }
 0x1a9   : > { %v7389_v36 = vpack.c.bf16 %v837_v30, %v837_v30  ;;  %1366 = vst [vmem:[#allocation2 + $0x30] sm:$0xf] %v1365_v40  ;;  %v1358_v41 = vsel %vm9712_vm5, %v1057_v32, %v1357_v23  ;;  %v7394_v43 = vpack.c.bf16 %v842_v37, %v842_v37  ;;  %v741_v48 = vadd.f32 %v9691_v12, %v740_v31  ;;  %v9771_v30 = vld [vmem:[#allocation8 + $0x108] sm:$0xff]   ;;  %v4246_v1 = vld [vmem:[#allocation2 + $0x18] sm:$0xe] }
 0x1aa   : > { %v7392_v44 = vpack.c.bf16 %v840_v38, %v840_v38  ;;  %1359 = vst [vmem:[#allocation2 + $0x24] sm:$0xf] %v1358_v41  ;;  %v1077_v54 = vshrl.u32 %v7391_v35, 16  ;;  %v1080_v25 = vshll.u32 %v7391_v35, 16  ;;  %v843_v19 = vmax.f32 %v9763_v50, 0.0  ;;  %v8800_v35 = vld [vmem:[#allocation2 + $0x18] sm:$0xff]  }
 0x1ab   : > { %v1060_v28 = vshrl.u32 %v7389_v36, 16  ;;  %v1063_v47 = vshll.u32 %v7389_v36, 16  ;;  %v1103_v60 = vshrl.u32 %v7394_v43, 16  ;;  %v1106_v61 = vshll.u32 %v7394_v43, 16  ;;  %v7814_v3 = vpop.f32.mrb[12].mxu0  ;;  %v8797_v5 = vld [vmem:[#allocation2 + $0xc] sm:$0xff]  }
 0x1ac   : > { %v1086_v0 = vshrl.u32 %v7392_v44, 16  ;;  %v1089_v2 = vshll.u32 %v7392_v44, 16  ;;  %v1079_v10 = vrot.slane %v1077_v54, 7  ;;  %v841_v26 = vmax.f32 %v741_v48, 0.0  ;;  %v753_v23 = vpop.f32.mrb[13].mxu0  ;;  %v8798_v27 = vld [vmem:[#allocation2 + $0xc] sm:$0xff]   ;;  %7849 = vmatmul.mubr.bf16.vlgmr.msra.gmra.mrb[32].mxu0 %v8797_v5 }
 0x1ad   : > { %v1062_v15 = vrot.slane %v1060_v28, 7  ;;  %v9773_v31 = vrot.slane %v1103_v60, 7  ;;  %v762_v37 = vadd.f32 %v7814_v3, %v9691_v12  ;;  %v754_v38 = vadd.f32 %v9691_v12, %v753_v23  ;;  %v7815_v40 = vpop.f32.mrb[14].mxu0  ;;  %7992 = vmatprep.mubr.bf16.mxu1 %v8798_v27  ;;  %v8801_v48 = vld [vmem:[#allocation2 + $0x18] sm:$0xff]   ;;  %7881 = vmatpush3.bf16.msra.mxu0 %v9685_v9  ;;  %v1382_v27 = vld [vmem:[#allocation2 + $0x50] sm:$0x1] }
 0x1ae   : > { %v9775_v32 = vrot.slane %v1086_v0, 7  ;;  %v1082_v36 = vor.u32 %v1080_v25, %v1079_v10  ;;  %v1084_v41 = vrot.slane %v1079_v10, 4  ;;  %v756_v44 = vpop.f32.mrb[15].mxu0  ;;  %7852 = vmatprep.mubr.bf16.mxu0 %v8800_v35  ;;  %7882 = vmatprep.subr.bf16.mxu0 %v9768_v49  ;;  %v8825_v25 = vld [vmem:[#allocation8 + $0x50] sm:$0xff]   ;;  %v7395_v3 = vpack.c.bf16 %v843_v19, %v843_v19 }
 0x1af   : > { %v1065_v43 = vor.u32 %v1063_v47, %v1062_v15  ;;  %v1067_v50 = vrot.slane %v1062_v15, 4  ;;  %v1108_v54 = vor.u32 %v1106_v61, %v9773_v31  ;;  %v1109_v28 = vrot.slane %v9773_v31, 4  ;;  %7993 = vmatmul.mubr.bf16.vlgmr.msra.gmra.mrb[0].mxu1 %v8801_v48  ;;  %v8809_v15 = vld [vmem:[#allocation8 + $0x110] sm:$0xff]  }
 0x1b0   : > { %v1091_v60 = vor.u32 %v1089_v2, %v9775_v32  ;;  %v1092_v0 = vrot.slane %v9775_v32, 4  ;;  %v1083_v47 = vsel %vm9719_vm6, %v1075_v13, %v1082_v36  ;;  %v1369_v9 = vsel %vm9725_vm7, %v1084_v41, %v1368_v56  ;;  %8025 = vmatpush3.bf16.msra.mxu1 %v9682_v6  ;;  %v9804_v6 = vld [vmem:[#allocation8 + $0x58] sm:$0xff]  }
 0x1b1   : > { %v1066_v61 = vsel %vm9719_vm6, %v1058_v34, %v1065_v43  ;;  %v1362_v2 = vsel %vm9725_vm7, %v1067_v50, %v1361_v59  ;;  %1367 = vst [vmem:[#allocation2 + $0x34] sm:$0xf] %v1083_v47  ;;  %1370 = vst [vmem:[#allocation2 + $0x38] sm:$0x1] %v1369_v9  ;;  %v1379_v62 = vsel %vm9712_vm5, %v1108_v54, %v1378_v16  ;;  %v846_v34 = vmax.f32 %v762_v37, 0.0 }
 0x1b2   : > { %1360 = vst [vmem:[#allocation2 + $0x28] sm:$0xf] %v1066_v61  ;;  %1363 = vst [vmem:[#allocation2 + $0x2c] sm:$0x1] %v1362_v2  ;;  %v1372_v13 = vsel %vm9712_vm5, %v1091_v60, %v1371_v17  ;;  %v7393_v5 = vpack.c.bf16 %v841_v26, %v841_v26  ;;  %v844_v56 = vmax.f32 %v754_v38, 0.0  ;;  %v765_v59 = vadd.f32 %v7815_v40, %v9691_v12 }
 0x1b3   : > { %1380 = vst [vmem:[#allocation2 + $0x48] sm:$0xf] %v1379_v62  ;;  %1373 = vst [vmem:[#allocation2 + $0x3c] sm:$0xf] %v1372_v13  ;;  %v757_v10 = vadd.f32 %v9691_v12, %v756_v44  ;;  %8026 = vmatprep.subr.bf16.mxu1 %v9771_v30  ;;  %7883 = vmatpush3.bf16.msra.mxu0 %v9768_v49  ;;  %v1111_v16 = vshrl.u32 %v7395_v3, 16  ;;  %v1114_v23 = vshll.u32 %v7395_v3, 16 }
 0x1b4   : > { %v1094_v17 = vshrl.u32 %v7393_v5, 16  ;;  %v1097_v19 = vshll.u32 %v7393_v5, 16  ;;  %v7818_v26 = vpop.f32.mrb[16].mxu0  ;;  %7884 = vmatprep.subr.bf16.mxu0 %v8825_v25  ;;  %v7398_v37 = vpack.c.bf16 %v846_v34, %v846_v34  ;;  %v7396_v38 = vpack.c.bf16 %v844_v56, %v844_v56  ;;  %v1375_v50 = vld [vmem:[#allocation2 + $0x44] sm:$0x1]  ;;  %8027 = vmatpush3.bf16.msra.mxu1 %v9771_v30  ;;  %v8814_v56 = vld [vmem:[#allocation8 + $0x118] sm:$0xff]  }
 0x1b5   : > { %v847_v35 = vmax.f32 %v765_v59, 0.0  ;;  %v845_v40 = vmax.f32 %v757_v10, 0.0  ;;  %v769_v36 = vpop.f32.mrb[17].mxu0  ;;  %v1113_v41 = vrot.slane %v1111_v16, 7  ;;  %v9807_v44 = vadd.f32 %v7818_v26, %v9691_v12  ;;  %8028 = vmatprep.subr.bf16.mxu1 %v8809_v15  ;;  %v1392_v5 = vld [vmem:[#allocation2 + $0x60] sm:$0xf] }
 0x1b6   : > { %v1096_v43 = vrot.slane %v1094_v17, 7  ;;  %v9810_v49 = vadd.f32 %v9691_v12, %v769_v36  ;;  %v7819_v48 = vpop.f32.mrb[18].mxu0  ;;  %v1137_v54 = vshrl.u32 %v7398_v37, 16  ;;  %v1140_v60 = vshll.u32 %v7398_v37, 16  ;;  %v1385_v34 = vld [vmem:[#allocation2 + $0x54] sm:$0xf] }
 0x1b7   : > { %v1120_v47 = vshrl.u32 %v7396_v38, 16  ;;  %v1123_v9 = vshll.u32 %v7396_v38, 16  ;;  %v772_v61 = vpop.f32.mrb[19].mxu0  ;;  %7885 = vmatpush3.bf16.msra.mxu0 %v8825_v25  ;;  %v1116_v2 = vor.u32 %v1114_v23, %v1113_v41  ;;  %v1118_v62 = vrot.slane %v1113_v41, 4  ;;  %v9814_v59 = vld [vmem:[#allocation8 + $0x60] sm:$0xff]  }
 0x1b8   : > { %v1099_v13 = vor.u32 %v1097_v19, %v1096_v43  ;;  %v1101_v3 = vrot.slane %v1096_v43, 4  ;;  %7886 = vmatprep.subr.bf16.mxu0 %v9804_v6  ;;  %v9816_v10 = vrot.slane %v1137_v54, 7  ;;  %v7399_v16 = vpack.c.bf16 %v847_v35, %v847_v35  ;;  %v8805_v35 = vld [vmem:[#allocation2 + $0x30] sm:$0xff]   ;;  %8029 = vmatpush3.bf16.msra.mxu1 %v8809_v15 }
 0x1b9   : > { %v9818_v30 = vrot.slane %v1120_v47, 7  ;;  %v7397_v17 = vpack.c.bf16 %v845_v40, %v845_v40  ;;  %v8802_v26 = vld [vmem:[#allocation2 + $0x24] sm:$0xff]   ;;  %v1117_v25 = vsel %vm9719_vm6, %v1109_v28, %v1116_v2  ;;  %v1383_v23 = vsel %vm9725_vm7, %v1118_v62, %v1382_v27  ;;  %v8820_v40 = vld [vmem:[#allocation8 + $0x120] sm:$0xff]   ;;  %8030 = vmatprep.subr.bf16.mxu1 %v8814_v56 }
 0x1ba   : > { %v8803_v37 = vld [vmem:[#allocation2 + $0x24] sm:$0xff]   ;;  %v1100_v19 = vsel %vm9719_vm6, %v1092_v0, %v1099_v13  ;;  %v1376_v38 = vsel %vm9725_vm7, %v1101_v3, %v1375_v50  ;;  %1381 = vst [vmem:[#allocation2 + $0x4c] sm:$0xf] %v1117_v25  ;;  %1384 = vst [vmem:[#allocation2 + $0x50] sm:$0x1] %v1383_v23  ;;  %v1142_v31 = vor.u32 %v1140_v60, %v9816_v10  ;;  %v1143_v28 = vrot.slane %v9816_v10, 4 }
 0x1bb   : > { %1374 = vst [vmem:[#allocation2 + $0x40] sm:$0xf] %v1100_v19  ;;  %1377 = vst [vmem:[#allocation2 + $0x44] sm:$0x1] %v1376_v38  ;;  %v1125_v27 = vor.u32 %v1123_v9, %v9818_v30  ;;  %v1126_v32 = vrot.slane %v9818_v30, 4  ;;  %7853 = vmatmul.mubr.bf16.gmra.mrb[36].mxu0 %v8802_v26  ;;  %7996 = vmatprep.mubr.bf16.mxu1 %v8803_v37  ;;  %v8806_v0 = vld [vmem:[#allocation2 + $0x30] sm:$0xff]   ;;  %v781_v30 = vadd.f32 %v7819_v48, %v9691_v12 }
 0x1bc   : > { %v1145_v36 = vshrl.u32 %v7399_v16, 16  ;;  %v1148_v41 = vshll.u32 %v7399_v16, 16  ;;  %v1128_v43 = vshrl.u32 %v7397_v17, 16  ;;  %v1131_v15 = vshll.u32 %v7397_v17, 16  ;;  %7856 = vmatprep.mubr.bf16.mxu0 %v8805_v35  ;;  %v7822_v50 = vpop.f32.mrb[20].mxu0  ;;  %7997 = vmatmul.mubr.bf16.gmra.mrb[4].mxu1 %v8806_v0  ;;  %v9848_v37 = vld [vmem:[#allocation8 + $0x68] sm:$0xff]  }
 0x1bd   : > { %v1393_v54 = vsel %vm9712_vm5, %v1142_v31, %v1392_v5  ;;  %v1386_v60 = vsel %vm9712_vm5, %v1125_v27, %v1385_v34  ;;  %v1396_v47 = vld [vmem:[#allocation2 + $0x68] sm:$0x1]  ;;  %v1389_v9 = vld [vmem:[#allocation2 + $0x5c] sm:$0x1]  ;;  %v850_v2 = vmax.f32 %v9807_v44, 0.0  ;;  %v848_v62 = vmax.f32 %v9810_v49, 0.0  ;;  %7887 = vmatpush3.bf16.msra.mxu0 %v9804_v6  ;;  %8031 = vmatpush3.bf16.msra.mxu1 %v8814_v56 }
 0x1be   : > { %v785_v13 = vpop.f32.mrb[21].mxu0  ;;  %1394 = vst [vmem:[#allocation2 + $0x60] sm:$0xf] %v1393_v54  ;;  %1387 = vst [vmem:[#allocation2 + $0x54] sm:$0xf] %v1386_v60  ;;  %v1147_v3 = vrot.slane %v1145_v36, 7  ;;  %v773_v5 = vadd.f32 %v9691_v12, %v772_v61  ;;  %7888 = vmatprep.subr.bf16.mxu0 %v9814_v59  ;;  %v794_v49 = vadd.f32 %v7822_v50, %v9691_v12  ;;  %8032 = vmatprep.subr.bf16.mxu1 %v8820_v40 }
 0x1bf   : > { %v1130_v10 = vrot.slane %v1128_v43, 7  ;;  %v7823_v16 = vpop.f32.mrb[22].mxu0  ;;  %v8827_v34 = vld [vmem:[#allocation8 + $0x128] sm:$0xff]   ;;  %v7402_v44 = vpack.c.bf16 %v850_v2, %v850_v2  ;;  %v7400_v17 = vpack.c.bf16 %v848_v62, %v848_v62  ;;  %v786_v26 = vadd.f32 %v9691_v12, %v785_v13  ;;  %v9850_v31 = vld [vmem:[#allocation8 + $0x130] sm:$0xff]   ;;  %v1406_v43 = vld [vmem:[#allocation2 + $0x78] sm:$0xf] }
 0x1c0   : > { %v788_v6 = vpop.f32.mrb[23].mxu0  ;;  %v1150_v25 = vor.u32 %v1148_v41, %v1147_v3  ;;  %v1152_v23 = vrot.slane %v1147_v3, 4  ;;  %v851_v54 = vmax.f32 %v781_v30, 0.0  ;;  %v849_v60 = vmax.f32 %v773_v5, 0.0 }
 0x1c1   : > { %v1133_v48 = vor.u32 %v1131_v15, %v1130_v10  ;;  %v1135_v19 = vrot.slane %v1130_v10, 4  ;;  %v1171_v61 = vshrl.u32 %v7402_v44, 16  ;;  %v1174_v38 = vshll.u32 %v7402_v44, 16  ;;  %7889 = vmatpush3.bf16.msra.mxu0 %v9814_v59  ;;  %v1399_v15 = vld [vmem:[#allocation2 + $0x6c] sm:$0xf]  ;;  %8033 = vmatpush3.bf16.msra.mxu1 %v8820_v40 }
 0x1c2   : > { %v1154_v56 = vshrl.u32 %v7400_v17, 16  ;;  %v1157_v35 = vshll.u32 %v7400_v17, 16  ;;  %v1151_v27 = vsel %vm9719_vm6, %v1143_v28, %v1150_v25  ;;  %v1397_v0 = vsel %vm9725_vm7, %v1152_v23, %v1396_v47  ;;  %v8807_v50 = vld [vmem:[#allocation2 + $0x3c] sm:$0xff]   ;;  %v8810_v2 = vld [vmem:[#allocation2 + $0x48] sm:$0xff]   ;;  %8034 = vmatprep.subr.bf16.mxu1 %v8827_v34  ;;  %7890 = vmatprep.subr.bf16.mxu0 %v9848_v37 }
 0x1c3   : > { %v1134_v36 = vsel %vm9719_vm6, %v1126_v32, %v1133_v48  ;;  %v1390_v41 = vsel %vm9725_vm7, %v1135_v19, %v1389_v9  ;;  %1395 = vst [vmem:[#allocation2 + $0x64] sm:$0xf] %v1151_v27  ;;  %1398 = vst [vmem:[#allocation2 + $0x68] sm:$0x1] %v1397_v0  ;;  %v9861_v59 = vrot.slane %v1171_v61, 7  ;;  %v8808_v47 = vld [vmem:[#allocation2 + $0x3c] sm:$0xff]   ;;  %v797_v40 = vadd.f32 %v7823_v16, %v9691_v12 }
 0x1c4   : > { %1388 = vst [vmem:[#allocation2 + $0x58] sm:$0xf] %v1134_v36  ;;  %1391 = vst [vmem:[#allocation2 + $0x5c] sm:$0x1] %v1390_v41  ;;  %v9863_v28 = vrot.slane %v1154_v56, 7  ;;  %v9866_v32 = vld [vmem:[#allocation8 + $0x70] sm:$0xff]   ;;  %v789_v13 = vadd.f32 %v9691_v12, %v788_v6  ;;  %7857 = vmatmul.mubr.bf16.gmra.mrb[40].mxu0 %v8807_v50  ;;  %8000 = vmatprep.mubr.bf16.mxu1 %v8808_v47  ;;  %v7403_v25 = vpack.c.bf16 %v851_v54, %v851_v54 }
 0x1c5   : > { %v854_v9 = vmax.f32 %v794_v49, 0.0  ;;  %v852_v62 = vmax.f32 %v786_v26, 0.0  ;;  %v1176_v3 = vor.u32 %v1174_v38, %v9861_v59  ;;  %v1177_v10 = vrot.slane %v9861_v59, 4  ;;  %7860 = vmatprep.mubr.bf16.mxu0 %v8810_v2  ;;  %v8811_v44 = vld [vmem:[#allocation2 + $0x48] sm:$0xff]   ;;  %v7826_v17 = vpop.f32.mrb[24].mxu0  ;;  %8035 = vmatpush3.bf16.msra.mxu1 %v8827_v34  ;;  %v9881_v56 = vld [vmem:[#allocation8 + $0x138] sm:$0xff]  }
 0x1c6   : > { %v1159_v30 = vor.u32 %v1157_v35, %v9863_v28  ;;  %v1160_v5 = vrot.slane %v9863_v28, 4  ;;  %v7401_v49 = vpack.c.bf16 %v849_v60, %v849_v60  ;;  %v801_v16 = vpop.f32.mrb[25].mxu0  ;;  %v855_v19 = vmax.f32 %v797_v40, 0.0  ;;  %8001 = vmatmul.mubr.bf16.gmra.mrb[8].mxu1 %v8811_v44  ;;  %8036 = vmatprep.subr.bf16.mxu1 %v9850_v31  ;;  %v1410_v41 = vld [vmem:[#allocation2 + $0x80] sm:$0x1]  ;;  %v8843_v47 = vld [vmem:[#allocation8 + $0x78] sm:$0xff]  }
 0x1c7   : > { %v7406_v26 = vpack.c.bf16 %v854_v9, %v854_v9  ;;  %v7404_v23 = vpack.c.bf16 %v852_v62, %v852_v62  ;;  %v1407_v6 = vsel %vm9712_vm5, %v1176_v3, %v1406_v43  ;;  %v853_v61 = vmax.f32 %v789_v13, 0.0  ;;  %v9878_v38 = vpop.f32.mrb[26].mxu0  ;;  %7891 = vmatpush3.bf16.msra.mxu0 %v9848_v37  ;;  %v1403_v43 = vld [vmem:[#allocation2 + $0x74] sm:$0x1]  ;;  %v1420_v62 = vld [vmem:[#allocation2 + $0x90] sm:$0xf] }
 0x1c8   : > { %v1400_v48 = vsel %vm9712_vm5, %v1159_v30, %v1399_v15  ;;  %1408 = vst [vmem:[#allocation2 + $0x78] sm:$0xf] %v1407_v6  ;;  %v1179_v35 = vshrl.u32 %v7403_v25, 16  ;;  %v1182_v27 = vshll.u32 %v7403_v25, 16  ;;  %v1162_v34 = vshrl.u32 %v7401_v49, 16  ;;  %v9883_v36 = vpop.f32.mrb[27].mxu0  ;;  %7892 = vmatprep.subr.bf16.mxu0 %v9866_v32 }
 0x1c9   : > { %1401 = vst [vmem:[#allocation2 + $0x6c] sm:$0xf] %v1400_v48  ;;  %v1165_v0 = vshll.u32 %v7401_v49, 16  ;;  %v1205_v15 = vshrl.u32 %v7406_v26, 16  ;;  %v1208_v50 = vshll.u32 %v7406_v26, 16  ;;  %v1188_v54 = vshrl.u32 %v7404_v23, 16  ;;  %8037 = vmatpush3.bf16.msra.mxu1 %v9850_v31 }
 0x1ca   : > { %v1191_v60 = vshll.u32 %v7404_v23, 16  ;;  %v1181_v2 = vrot.slane %v1179_v35, 7  ;;  %v1164_v9 = vrot.slane %v1162_v34, 7  ;;  %v1413_v40 = vld [vmem:[#allocation2 + $0x84] sm:$0xf]  ;;  %v9887_v13 = vpack.c.bf16 %v855_v19, %v855_v19  ;;  %8038 = vmatprep.subr.bf16.mxu1 %v9881_v56 }
 0x1cb   : > { %v9889_v3 = vpack.c.bf16 %v853_v61, %v853_v61  ;;  %v8812_v30 = vld [vmem:[#allocation2 + $0x54] sm:$0xff]   ;;  %v9892_v37 = vrot.slane %v1205_v15, 7  ;;  %v9894_v25 = vrot.slane %v1188_v54, 7  ;;  %v810_v49 = vadd.f32 %v7826_v17, %v9691_v12  ;;  %v8815_v61 = vld [vmem:[#allocation2 + $0x60] sm:$0xff]   ;;  %v7830_v54 = vpop.f32.mrb[28].mxu0  ;;  %7893 = vmatpush3.bf16.msra.mxu0 %v9866_v32 }
 0x1cc   : > { %v8813_v44 = vld [vmem:[#allocation2 + $0x54] sm:$0xff]   ;;  %v802_v26 = vadd.f32 %v9691_v12, %v801_v16  ;;  %v1184_v23 = vor.u32 %v1182_v27, %v1181_v2  ;;  %v1186_v6 = vrot.slane %v1181_v2, 4  ;;  %v1167_v48 = vor.u32 %v1165_v0, %v1164_v9  ;;  %7861 = vmatmul.mubr.bf16.gmra.mrb[44].mxu0 %v8812_v30  ;;  %v8816_v17 = vld [vmem:[#allocation2 + $0x60] sm:$0xff]   ;;  %v817_v32 = vpop.f32.mrb[29].mxu0  ;;  %7894 = vmatprep.subr.bf16.mxu0 %v8843_v47 }
 0x1cd   : > { %v1169_v19 = vrot.slane %v1164_v9, 4  ;;  %8004 = vmatprep.mubr.bf16.mxu1 %v8813_v44  ;;  %v1210_v35 = vor.u32 %v1208_v50, %v9892_v37  ;;  %v1211_v31 = vrot.slane %v9892_v37, 4  ;;  %v1193_v34 = vor.u32 %v1191_v60, %v9894_v25  ;;  %v9904_v16 = vld [vmem:[#allocation8 + $0x140] sm:$0xff]   ;;  %7864 = vmatprep.mubr.bf16.mxu0 %v8815_v61 }
 0x1ce   : > { %v1194_v15 = vrot.slane %v9894_v25, 4  ;;  %v1185_v27 = vsel %vm9719_vm6, %v1177_v10, %v1184_v23  ;;  %v1411_v0 = vsel %vm9725_vm7, %v1186_v6, %v1410_v41  ;;  %v1168_v50 = vsel %vm9719_vm6, %v1160_v5, %v1167_v48  ;;  %v9918_v2 = vld [vmem:[#allocation8 + $0x80] sm:$0xff]   ;;  %8005 = vmatmul.mubr.bf16.gmra.mrb[12].mxu1 %v8816_v17  ;;  %v9926_v41 = vpop.f32.mrb[30].mxu0 }
 0x1cf   : > { %v1404_v60 = vsel %vm9725_vm7, %v1169_v19, %v1403_v43  ;;  %1409 = vst [vmem:[#allocation2 + $0x7c] sm:$0xf] %v1185_v27  ;;  %1412 = vst [vmem:[#allocation2 + $0x80] sm:$0x1] %v1411_v0  ;;  %v1421_v59 = vsel %vm9712_vm5, %v1210_v35, %v1420_v62  ;;  %v1414_v28 = vsel %vm9712_vm5, %v1193_v34, %v1413_v40  ;;  %v1213_v10 = vshrl.u32 %v9887_v13, 16  ;;  %v9930_v62 = vpop.f32.mrb[31].mxu0 }
 0x1d0   : > { %1402 = vst [vmem:[#allocation2 + $0x70] sm:$0xf] %v1168_v50  ;;  %1405 = vst [vmem:[#allocation2 + $0x74] sm:$0x1] %v1404_v60  ;;  %v1216_v5 = vshll.u32 %v9887_v13, 16  ;;  %v1196_v43 = vshrl.u32 %v9889_v3, 16  ;;  %8039 = vmatpush3.bf16.msra.mxu1 %v9881_v56  ;;  %v813_v13 = vadd.f32 %v9878_v38, %v9691_v12  ;;  %v805_v37 = vadd.f32 %v9691_v12, %v9883_v36 }
 0x1d1   : > { %1422 = vst [vmem:[#allocation2 + $0x90] sm:$0xf] %v1421_v59  ;;  %1415 = vst [vmem:[#allocation2 + $0x84] sm:$0xf] %v1414_v28  ;;  %v1199_v9 = vshll.u32 %v9889_v3, 16  ;;  %v858_v30 = vmax.f32 %v810_v49, 0.0  ;;  %v826_v25 = vadd.f32 %v7830_v54, %v9691_v12  ;;  %7895 = vmatpush3.bf16.msra.mxu0 %v8843_v47  ;;  %8072 = vmatprep.subr.bf16.mxu1 %v9904_v16 }
 0x1d2   : > { %v856_v44 = vmax.f32 %v802_v26, 0.0  ;;  %v1215_v40 = vrot.slane %v1213_v10, 7  ;;  %v1424_v23 = vld [vmem:[#allocation2 + $0x98] sm:$0x1]  ;;  %v1198_v3 = vrot.slane %v1196_v43, 7  ;;  %v818_v6 = vadd.f32 %v9691_v12, %v817_v32  ;;  %7928 = vmatprep.subr.bf16.mxu0 %v9918_v2 }
 0x1d3   : > { %v7410_v49 = vpack.c.bf16 %v858_v30, %v858_v30  ;;  %v1417_v19 = vld [vmem:[#allocation2 + $0x8c] sm:$0x1]  ;;  %v859_v38 = vmax.f32 %v813_v13, 0.0  ;;  %v857_v61 = vmax.f32 %v805_v37, 0.0  ;;  %v1434_v27 = vld [vmem:[#allocation2 + $0xa8] sm:$0xf] }
 0x1d4   : > { %v7408_v26 = vpack.c.bf16 %v856_v44, %v856_v44  ;;  %v1218_v56 = vor.u32 %v1216_v5, %v1215_v40  ;;  %v1220_v48 = vrot.slane %v1215_v40, 4  ;;  %v1201_v35 = vor.u32 %v1199_v9, %v1198_v3  ;;  %v1427_v59 = vld [vmem:[#allocation2 + $0x9c] sm:$0xf] }
 0x1d5   : > { %v1203_v36 = vrot.slane %v1198_v3, 4  ;;  %v1239_v34 = vshrl.u32 %v7410_v49, 16  ;;  %v1242_v17 = vshll.u32 %v7410_v49, 16  ;;  %v7411_v28 = vpack.c.bf16 %v859_v38, %v859_v38  ;;  %v1438_v49 = vld [vmem:[#allocation2 + $0xb0] sm:$0x1] }
 0x1d6   : > { %v1219_v47 = vsel %vm9719_vm6, %v1211_v31, %v1218_v56  ;;  %v1425_v54 = vsel %vm9725_vm7, %v1220_v48, %v1424_v23  ;;  %v1222_v0 = vshrl.u32 %v7408_v26, 16  ;;  %v1225_v12 = vshll.u32 %v7408_v26, 16  ;;  %v8822_v48 = vld [vmem:[#allocation2 + $0x78] sm:$0xff]  }
 0x1d7   : > { %1423 = vst [vmem:[#allocation2 + $0x94] sm:$0xf] %v1219_v47  ;;  %1426 = vst [vmem:[#allocation2 + $0x98] sm:$0x1] %v1425_v54  ;;  %v1202_v50 = vsel %vm9719_vm6, %v1194_v15, %v1201_v35  ;;  %v1418_v60 = vsel %vm9725_vm7, %v1203_v36, %v1417_v19  ;;  %v1241_v32 = vrot.slane %v1239_v34, 7  ;;  %v8817_v10 = vld [vmem:[#allocation2 + $0x6c] sm:$0xff]   ;;  %v7409_v5 = vpack.c.bf16 %v857_v61, %v857_v61 }
 0x1d8   : > { %1416 = vst [vmem:[#allocation2 + $0x88] sm:$0xf] %v1202_v50  ;;  %1419 = vst [vmem:[#allocation2 + $0x8c] sm:$0x1] %v1418_v60  ;;  %v1224_v31 = vrot.slane %v1222_v0, 7  ;;  %v862_v43 = vmax.f32 %v826_v25, 0.0  ;;  %7865 = vmatmul.mubr.bf16.gmra.mrb[48].mxu0 %v8817_v10 }
 0x1d9   : > { %v860_v9 = vmax.f32 %v818_v6, 0.0  ;;  %v8819_v30 = vld [vmem:[#allocation2 + $0x6c] sm:$0xff]   ;;  %v1244_v44 = vor.u32 %v1242_v17, %v1241_v32  ;;  %v1245_v40 = vrot.slane %v1241_v32, 4  ;;  %v1247_v13 = vshrl.u32 %v7411_v28, 16  ;;  %v8821_v15 = vld [vmem:[#allocation2 + $0x78] sm:$0xff]  }
 0x1da   : > { %v1250_v37 = vshll.u32 %v7411_v28, 16  ;;  %v1227_v23 = vor.u32 %v1225_v12, %v1224_v31  ;;  %v1228_v3 = vrot.slane %v1224_v31, 4  ;;  %v1230_v26 = vshrl.u32 %v7409_v5, 16  ;;  %8008 = vmatprep.mubr.bf16.mxu1 %v8819_v30  ;;  %7868 = vmatprep.mubr.bf16.mxu0 %v8821_v15  ;;  %v1431_v36 = vld [vmem:[#allocation2 + $0xa4] sm:$0x1] }
 0x1db   : > { %v1233_v56 = vshll.u32 %v7409_v5, 16  ;;  %v1435_v19 = vsel %vm9712_vm5, %v1244_v44, %v1434_v27  ;;  %v1249_v38 = vrot.slane %v1247_v13, 7  ;;  %v7414_v25 = vpack.c.bf16 %v862_v43, %v862_v43  ;;  %v8916_v34 = vld [vmem:[%s11127_s4] ss:$0 sm:$0xff]  ;;  %8009 = vmatmul.mubr.bf16.gmra.mrb[16].mxu1 %v8822_v48  ;;  %v3491_v50 = vld [vmem:[#allocation2 + $0xc] sm:$0xf] }
 0x1dc   : > { %v7412_v6 = vpack.c.bf16 %v860_v9, %v860_v9  ;;  %1436 = vst [vmem:[#allocation2 + $0xa8] sm:$0xf] %v1435_v19  ;;  %v1428_v61 = vsel %vm9712_vm5, %v1227_v23, %v1427_v59  ;;  %v1232_v35 = vrot.slane %v1230_v26, 7  ;;  %v829_v17 = vadd.f32 %v8916_v34, %v9926_v41  ;;  %v1448_v59 = vld [vmem:[#allocation2 + $0xc0] sm:$0xf] }
 0x1dd   : > { %v821_v47 = vadd.f32 %v8916_v34, %v9930_v62  ;;  %1429 = vst [vmem:[#allocation2 + $0x9c] sm:$0xf] %v1428_v61  ;;  %v1252_v54 = vor.u32 %v1250_v37, %v1249_v38  ;;  %v1254_v27 = vrot.slane %v1249_v38, 4  ;;  %v1273_v0 = vshrl.u32 %v7414_v25, 16  ;;  %v1441_v43 = vld [vmem:[#allocation2 + $0xb4] sm:$0xf] }
 0x1de   : > { %v1276_v12 = vshll.u32 %v7414_v25, 16  ;;  %v1235_v60 = vor.u32 %v1233_v56, %v1232_v35  ;;  %v1237_v32 = vrot.slane %v1232_v35, 4  ;;  %v1256_v28 = vshrl.u32 %v7412_v6, 16  ;;  %v8828_v31 = vld [vmem:[#allocation2 + $0x90] sm:$0xff]   ;;  %v1850_v35 = vld [vmem:[#allocation2 + $0xc] sm:$0xf] }
 0x1df   : > { %v1259_v10 = vshll.u32 %v7412_v6, 16  ;;  %v1253_v41 = vsel %vm9719_vm6, %v1245_v40, %v1252_v54  ;;  %v1439_v62 = vsel %vm9725_vm7, %v1254_v27, %v1438_v49  ;;  %v1275_v5 = vrot.slane %v1273_v0, 7  ;;  %v8824_v30 = vld [vmem:[#allocation2 + $0x84] sm:$0xff]   ;;  %v3492_v49 = vld [vmem:[#allocation2 + $0x10] sm:$0xf] }
 0x1e0   : > { %v863_v9 = vmax.f32 %v829_v17, 0.0  ;;  %v8826_v44 = vld [vmem:[#allocation2 + $0x84] sm:$0xff]   ;;  %1437 = vst [vmem:[#allocation2 + $0xac] sm:$0xf] %v1253_v41  ;;  %1440 = vst [vmem:[#allocation2 + $0xb0] sm:$0x1] %v1439_v62  ;;  %v1236_v13 = vsel %vm9719_vm6, %v1228_v3, %v1235_v60  ;;  %v1432_v37 = vsel %vm9725_vm7, %v1237_v32, %v1431_v36  ;;  %7869 = vmatmul.mubr.bf16.gmra.mrb[52].mxu0 %v8824_v30 }
 0x1e1   : > { %v1258_v15 = vrot.slane %v1256_v28, 7  ;;  %v861_v23 = vmax.f32 %v821_v47, 0.0  ;;  %1430 = vst [vmem:[#allocation2 + $0xa0] sm:$0xf] %v1236_v13  ;;  %1433 = vst [vmem:[#allocation2 + $0xa4] sm:$0x1] %v1432_v37  ;;  %v1278_v40 = vor.u32 %v1276_v12, %v1275_v5  ;;  %8012 = vmatprep.mubr.bf16.mxu1 %v8826_v44  ;;  %7872 = vmatprep.mubr.bf16.mxu0 %v8828_v31 }
 0x1e2   : > { %v7415_v26 = vpack.c.bf16 %v863_v9, %v863_v9  ;;  %v3493_v56 = vld [vmem:[#allocation2 + $0x14] sm:$0x1]  ;;  %v3540_v48 = vshrl.u32 %v3491_v50, 16  ;;  %v9969_v19 = vrot.slane %v1915_v42, 4  ;;  %v1279_v3 = vrot.slane %v1275_v5, 4 }
 0x1e3   : > { %v1261_v38 = vor.u32 %v1259_v10, %v1258_v15  ;;  %v7413_v25 = vpack.c.bf16 %v861_v23, %v861_v23  ;;  %v8829_v6 = vld [vmem:[#allocation2 + $0x90] sm:$0xff]   ;;  %v3543_v61 = vshll.u32 %v3491_v50, 16  ;;  %v1449_v36 = vsel %vm9712_vm5, %v1278_v40, %v1448_v59  ;;  %v1445_v0 = vld [vmem:[#allocation2 + $0xbc] sm:$0x1]  ;;  %v1853_v37 = vld [vmem:[#allocation2 + $0x18] sm:$0xf] }
 0x1e4   : > { %v1262_v34 = vrot.slane %v1258_v15, 4  ;;  %v1281_v17 = vshrl.u32 %v7415_v26, 16  ;;  %1450 = vst [vmem:[#allocation2 + $0xc0] sm:$0xf] %v1449_v36  ;;  %v1284_v54 = vshll.u32 %v7415_v26, 16  ;;  %8013 = vmatmul.mubr.bf16.gmra.mrb[20].mxu1 %v8829_v6  ;;  %v3542_v12 = vrot.slane %v3540_v48, 4 }
 0x1e5   : > { %v1442_v47 = vsel %vm9712_vm5, %v1261_v38, %v1441_v43  ;;  %v1264_v42 = vshrl.u32 %v7413_v25, 16  ;;  %v3545_v60 = vrot.slane %v3543_v61, 5  ;;  %v3549_v50 = vshll.u32 %v3492_v49, 16  ;;  %v1851_v31 = vld [vmem:[#allocation2 + $0x10] sm:$0xf] }
 0x1e6   : > { %1443 = vst [vmem:[#allocation2 + $0xb4] sm:$0xf] %v1442_v47  ;;  %v1283_v27 = vrot.slane %v1281_v17, 7  ;;  %v1267_v28 = vshll.u32 %v7413_v25, 16  ;;  %v3553_v10 = vshrl.u32 %v3492_v49, 16  ;;  %v3559_v59 = vshll.u32 %v3493_v56, 16 }
 0x1e7   : > { %v1266_v32 = vrot.slane %v1264_v42, 7  ;;  %v3546_v5 = vor.u32 %v3545_v60, %v3542_v12  ;;  %v1923_v43 = vshrl.u32 %v1850_v35, 16  ;;  %v1911_v13 = vsel %vm9977_vm10, %v9754_v22, %v9701_v45  ;;  %v8835_v26 = vld [vmem:[#allocation2 + $0xa8] sm:$0xff]   ;;  %v1852_v48 = vld [vmem:[#allocation2 + $0x14] sm:$0x1] }
 0x1e8   : > { %v1286_v41 = vor.u32 %v1284_v54, %v1283_v27  ;;  %v1288_v62 = vrot.slane %v1283_v27, 4  ;;  %v8831_v44 = vld [vmem:[#allocation2 + $0x9c] sm:$0xff]   ;;  %v3551_v49 = vrot.slane %v3549_v50, 5  ;;  %v1921_v56 = vsel %vm9977_vm10, %v9969_v19, %v9707_v53 }
 0x1e9   : > { %v1269_v9 = vor.u32 %v1267_v28, %v1266_v32  ;;  %v1271_v30 = vrot.slane %v1266_v32, 4  ;;  %v8833_v40 = vld [vmem:[#allocation2 + $0x9c] sm:$0xff]   ;;  %7873 = vmatmul.mubr.bf16.gmra.mrb[56].mxu0 %v8831_v44  ;;  %v3547_v38 = vrot.slane %v3546_v5, 4  ;;  %v3555_v25 = vrot.slane %v3553_v10, 4  ;;  %v3494_v5 = vld [vmem:[#allocation2 + $0x18] sm:$0xf] }
 0x1ea   : > { %v1287_v15 = vsel %vm9719_vm6, %v1279_v3, %v1286_v41  ;;  %v1453_v23 = vsel %vm9725_vm7, %v1288_v62, %v1452_v46  ;;  %v8836_v3 = vld [vmem:[#allocation2 + $0xa8] sm:$0xff]   ;;  %v1854_v6 = vld [vmem:[#allocation2 + $0x1c] sm:$0xf]  ;;  %8016 = vmatprep.mubr.bf16.mxu1 %v8833_v40  ;;  %7876 = vmatprep.mubr.bf16.mxu0 %v8835_v26  ;;  %v3561_v61 = vrot.slane %v3559_v59, 5  ;;  %v1925_v53 = vrot.slane %v1923_v43, 4 }
 0x1eb   : > { %1451 = vst [vmem:[#allocation2 + $0xc4] sm:$0xf] %v1287_v15  ;;  %1454 = vst [vmem:[#allocation2 + $0xc8] sm:$0x1] %v1453_v23  ;;  %v1270_v45 = vsel %vm9719_vm6, %v1262_v34, %v1269_v9  ;;  %v1446_v22 = vsel %vm9725_vm7, %v1271_v30, %v1445_v0  ;;  %v1926_v19 = vshll.u32 %v1850_v35, 16  ;;  %v1932_v36 = vshll.u32 %v1851_v31, 16 }
 0x1ec   : > { %1444 = vst [vmem:[#allocation2 + $0xb8] sm:$0xf] %v1270_v45  ;;  %1447 = vst [vmem:[#allocation2 + $0xbc] sm:$0x1] %v1446_v22  ;;  %8017 = vmatmul.mubr.bf16.gmra.mrb[24].mxu1 %v8836_v3  ;;  %v3556_v17 = vor.u32 %v3555_v25, %v3551_v49  ;;  %v7122_v18 = vcombine.low %v1911_v13, %v1921_v56  ;;  %v1936_v34 = vshrl.u32 %v1851_v31, 16  ;;  %v1942_v47 = vshll.u32 %v1852_v48, 16 }
 0x1ed   : > { %v1928_v29 = vrot.slane %v1926_v19, 5  ;;  %v1934_v54 = vrot.slane %v1932_v36, 5  ;;  %v1855_v46 = vld [vmem:[#allocation2 + $0x20] sm:$0x1]  ;;  %v1947_v42 = vshrl.u32 %v1853_v37, 16  ;;  %v1950_v27 = vshll.u32 %v1853_v37, 16 }
 0x1ee   : > { %v3552_v0 = vsel %vm9977_vm10, %v3547_v38, %v3551_v49  ;;  %v3557_v12 = vrot.slane %v3556_v17, 4  ;;  %v1938_v60 = vrot.slane %v1936_v34, 4  ;;  %v1956_v50 = vshll.u32 %v1854_v6, 16  ;;  %v3495_v43 = vld [vmem:[#allocation2 + $0x1c] sm:$0xf] }
 0x1ef   : > { %v1929_v32 = vor.u32 %v1928_v29, %v1925_v53  ;;  %v1949_v28 = vrot.slane %v1947_v42, 4  ;;  %v1952_v35 = vrot.slane %v1950_v27, 5  ;;  %v1960_v10 = vshrl.u32 %v1854_v6, 16  ;;  %v3496_v45 = vld [vmem:[#allocation2 + $0x20] sm:$0x1] }
 0x1f0   : > { %v3562_v59 = vsel %vm9977_vm10, %v3557_v12, %v3561_v61  ;;  %v1939_v31 = vor.u32 %v1938_v60, %v1934_v54  ;;  %v1958_v41 = vrot.slane %v1956_v50, 5  ;;  %v1966_v62 = vshll.u32 %v1855_v46, 16  ;;  %v3497_v61 = vld [vmem:[#allocation2 + $0x24] sm:$0xf]  ;;  %v3498_v34 = vld [vmem:[#allocation2 + $0x28] sm:$0xf] }
 0x1f1   : > { %v1930_v9 = vrot.slane %v1929_v32, 4  ;;  %v1944_v30 = vrot.slane %v1942_v47, 5  ;;  %v1953_v44 = vor.u32 %v1952_v35, %v1949_v28  ;;  %v1962_v13 = vrot.slane %v1960_v10, 4  ;;  %v3499_v42 = vld [vmem:[#allocation2 + $0x2c] sm:$0x1] }
 0x1f2   : > { %v7210_v15 = vcombine.low %v3552_v0, %v3562_v59  ;;  %v1940_v23 = vrot.slane %v1939_v31, 4  ;;  %v1968_v48 = vrot.slane %v1966_v62, 5  ;;  %v8842_v22 = vld [vmem:[#allocation2 + $0xc0] sm:$0xff]   ;;  %v3564_v38 = vshrl.u32 %v3494_v5, 16  ;;  %v1857_v62 = vld [vmem:[#allocation2 + $0x28] sm:$0xf] }
 0x1f3   : > { %v8838_v37 = vld [vmem:[#allocation2 + $0xb4] sm:$0xff]   ;;  %v1935_v26 = vsel %vm9977_vm10, %v1930_v9, %v1934_v54  ;;  %v1954_v49 = vrot.slane %v1953_v44, 4  ;;  %v1963_v56 = vor.u32 %v1962_v13, %v1958_v41  ;;  %v3567_v25 = vshll.u32 %v3494_v5, 16  ;;  %v1856_v60 = vld [vmem:[#allocation2 + $0x24] sm:$0xf] }
 0x1f4   : > { %v8840_v40 = vld [vmem:[#allocation2 + $0xb4] sm:$0xff]   ;;  %7877 = vmatmul.mubr.bf16.gmra.mrb[60].mxu0 %v8838_v37  ;;  %v1945_v3 = vsel %vm9977_vm10, %v1940_v23, %v1944_v30  ;;  %v3573_v6 = vshll.u32 %v3495_v43, 16  ;;  %v3577_v17 = vshrl.u32 %v3495_v43, 16  ;;  %v3566_v47 = vrot.slane %v3564_v38, 4  ;;  %v8850_v44 = vld [vmem:[#allocation8 + $0x88] sm:$0xff]  }
 0x1f5   : > { %8020 = vmatprep.mubr.bf16.mxu1 %v8840_v40  ;;  %7896 = vmatprep.mubr.bf16.mxu0 %v7122_v18  ;;  %v7123_v53 = vcombine.low %v1935_v26, %v1945_v3  ;;  %v1959_v19 = vsel %vm9977_vm10, %v1954_v49, %v1958_v41  ;;  %v1964_v36 = vrot.slane %v1963_v56, 4  ;;  %v3569_v29 = vrot.slane %v3567_v25, 5  ;;  %v1858_v23 = vld [vmem:[#allocation2 + $0x2c] sm:$0x1] }
 0x1f6   : > { %8021 = vmatmul.mubr.bf16.gmra.mrb[28].mxu1 %v8842_v22  ;;  %v3575_v54 = vrot.slane %v3573_v6, 5  ;;  %v3583_v46 = vshll.u32 %v3496_v45, 16  ;;  %v3579_v0 = vrot.slane %v3577_v17, 4  ;;  %v3588_v12 = vshrl.u32 %v3497_v61, 16  ;;  %v1859_v45 = vld [vmem:[#allocation2 + $0x30] sm:$0xf] }
 0x1f7   : > { %8040 = vmatprep.mubr.bf16.mxu1 %v7210_v15  ;;  %v1969_v27 = vsel %vm9977_vm10, %v1964_v36, %v1968_v48  ;;  %v3591_v18 = vshll.u32 %v3497_v61, 16  ;;  %v3570_v32 = vor.u32 %v3569_v29, %v3566_v47  ;;  %v3597_v35 = vshll.u32 %v3498_v34, 16  ;;  %v1860_v6 = vld [vmem:[#allocation2 + $0x34] sm:$0xf]  ;;  %v8845_v17 = vld [vmem:[#allocation8 + $0x148] sm:$0xff]  }
 0x1f8   : > { %v7124_v50 = vcombine.low %v1959_v19, %v1969_v27  ;;  %v3585_v28 = vrot.slane %v3583_v46, 5  ;;  %v3580_v10 = vor.u32 %v3579_v0, %v3575_v54  ;;  %v3590_v59 = vrot.slane %v3588_v12, 4  ;;  %v1861_v46 = vld [vmem:[#allocation2 + $0x38] sm:$0x1] }
 0x1f9   : > { %v3593_v31 = vrot.slane %v3591_v18, 5  ;;  %v3601_v41 = vshrl.u32 %v3498_v34, 16  ;;  %v3571_v5 = vrot.slane %v3570_v32, 4  ;;  %v3599_v43 = vrot.slane %v3597_v35, 5  ;;  %v8851_v34 = vld [vmem:[#allocation8 + $0x90] sm:$0xff]  }
 0x1fa   : > { %v3607_v9 = vshll.u32 %v3499_v42, 16  ;;  %v1971_v30 = vshrl.u32 %v1856_v60, 16  ;;  %v3581_v13 = vrot.slane %v3580_v10, 4  ;;  %v1974_v40 = vshll.u32 %v1856_v60, 16  ;;  %v3501_v35 = vld [vmem:[#allocation2 + $0x34] sm:$0xf] }
 0x1fb   : > { %v3594_v37 = vor.u32 %v3593_v31, %v3590_v59  ;;  %v3603_v15 = vrot.slane %v3601_v41, 4  ;;  %v3576_v26 = vsel %vm9977_vm10, %v3571_v5, %v3575_v54  ;;  %v1980_v48 = vshll.u32 %v1857_v62, 16  ;;  %v8853_v5 = vld [vmem:[#allocation8 + $0x98] sm:$0xff]  }
 0x1fc   : > { %7897 = vmatmul.mubr.bf16.vlgmr.msra.gmra.mrb[32].mxu0 %v7123_v53  ;;  %v3609_v49 = vrot.slane %v3607_v9, 5  ;;  %v1973_v56 = vrot.slane %v1971_v30, 4  ;;  %v3586_v22 = vsel %vm9977_vm10, %v3581_v13, %v3585_v28  ;;  %v1976_v25 = vrot.slane %v1974_v40, 5 }
 0x1fd   : > { %7900 = vmatprep.mubr.bf16.mxu0 %v7124_v50  ;;  %v3595_v3 = vrot.slane %v3594_v37, 4  ;;  %v3604_v38 = vor.u32 %v3603_v15, %v3599_v43  ;;  %7929 = vmatpush3.bf16.msra.mxu0 %v9918_v2  ;;  %v7211_v61 = vcombine.low %v3576_v26, %v3586_v22  ;;  %v1982_v19 = vrot.slane %v1980_v48, 5  ;;  %v3500_v2 = vld [vmem:[#allocation2 + $0x30] sm:$0xf]  ;;  %v3502_v15 = vld [vmem:[#allocation2 + $0x38] sm:$0x1] }
 0x1fe   : > { %v1984_v53 = vshrl.u32 %v1857_v62, 16  ;;  %v1990_v36 = vshll.u32 %v1858_v23, 16  ;;  %7930 = vmatprep.subr.bf16.mxu0 %v8850_v44  ;;  %v1977_v54 = vor.u32 %v1976_v25, %v1973_v56  ;;  %v1995_v42 = vshrl.u32 %v1859_v45, 16  ;;  %v8846_v62 = vld [vmem:[#allocation8 + $0x150] sm:$0xff]   ;;  %v3503_v48 = vld [vmem:[#allocation2 + $0x3c] sm:$0xf] }
 0x1ff   : > { %v3600_v47 = vsel %vm9977_vm10, %v3595_v3, %v3599_v43  ;;  %v3605_v29 = vrot.slane %v3604_v38, 4  ;;  %8041 = vmatmul.mubr.bf16.vlgmr.msra.gmra.mrb[0].mxu1 %v7211_v61  ;;  %v1998_v12 = vshll.u32 %v1859_v45, 16  ;;  %v2004_v18 = vshll.u32 %v1860_v6, 16  ;;  %v3504_v25 = vld [vmem:[#allocation2 + $0x40] sm:$0xf] }
 0x200   : > { %v1986_v27 = vrot.slane %v1984_v53, 4  ;;  %v1992_v0 = vrot.slane %v1990_v36, 5  ;;  %8073 = vmatpush3.bf16.msra.mxu1 %v9904_v16  ;;  %v1978_v50 = vrot.slane %v1977_v54, 4  ;;  %v1997_v32 = vrot.slane %v1995_v42, 4 }
 0x201   : > { %v3610_v60 = vsel %vm9977_vm10, %v3605_v29, %v3609_v49  ;;  %v2008_v28 = vshrl.u32 %v1860_v6, 16  ;;  %7931 = vmatpush3.bf16.msra.mxu0 %v8850_v44  ;;  %8074 = vmatprep.subr.bf16.mxu1 %v8845_v17  ;;  %v2000_v31 = vrot.slane %v1998_v12, 5  ;;  %v2006_v41 = vrot.slane %v2004_v18, 5  ;;  %v8847_v6 = vld [vmem:[#allocation8 + $0x158] sm:$0xff]   ;;  %v1862_v18 = vld [vmem:[#allocation2 + $0x3c] sm:$0xf] }
 0x202   : > { %v7212_v10 = vcombine.low %v3600_v47, %v3610_v60  ;;  %v1987_v59 = vor.u32 %v1986_v27, %v1982_v19  ;;  %7932 = vmatprep.subr.bf16.mxu0 %v8851_v34  ;;  %v1983_v43 = vsel %vm9977_vm10, %v1978_v50, %v1982_v19  ;;  %v2014_v9 = vshll.u32 %v1861_v46, 16  ;;  %v8854_v47 = vld [vmem:[#allocation8 + $0xa0] sm:$0xff]  }
 0x203   : > { %v2010_v16 = vrot.slane %v2008_v28, 4  ;;  %v3612_v30 = vshrl.u32 %v3500_v2, 16  ;;  %v2001_v37 = vor.u32 %v2000_v31, %v1997_v32  ;;  %v3615_v23 = vshll.u32 %v3500_v2, 16  ;;  %v1863_v28 = vld [vmem:[#allocation2 + $0x40] sm:$0xf] }
 0x204   : > { %8044 = vmatprep.mubr.bf16.mxu1 %v7212_v10  ;;  %v1988_v13 = vrot.slane %v1987_v59, 4  ;;  %v3621_v44 = vshll.u32 %v3501_v35, 16  ;;  %v2016_v26 = vrot.slane %v2014_v9, 5  ;;  %v3625_v56 = vshrl.u32 %v3501_v35, 16  ;;  %8075 = vmatpush3.bf16.msra.mxu1 %v8845_v17  ;;  %v8849_v35 = vld [vmem:[#allocation8 + $0x160] sm:$0xff]  }
 0x205   : > { %v2011_v40 = vor.u32 %v2010_v16, %v2006_v41  ;;  %v3614_v49 = vrot.slane %v3612_v30, 4  ;;  %7933 = vmatpush3.bf16.msra.mxu0 %v8851_v34  ;;  %v2002_v22 = vrot.slane %v2001_v37, 4  ;;  %v3617_v3 = vrot.slane %v3615_v23, 5  ;;  %8076 = vmatprep.subr.bf16.mxu1 %v8846_v62  ;;  %v3505_v34 = vld [vmem:[#allocation2 + $0x44] sm:$0x1] }
 0x206   : > { %v1993_v45 = vsel %vm9977_vm10, %v1988_v13, %v1992_v0  ;;  %v3623_v38 = vrot.slane %v3621_v44, 5  ;;  %7934 = vmatprep.subr.bf16.mxu0 %v8853_v5  ;;  %v3627_v53 = vrot.slane %v3625_v56, 4  ;;  %v3631_v36 = vshll.u32 %v3502_v15, 16  ;;  %v1865_v44 = vld [vmem:[#allocation2 + $0x48] sm:$0xf] }
 0x207   : > { %v7125_v61 = vcombine.low %v1983_v43, %v1993_v45  ;;  %v2012_v19 = vrot.slane %v2011_v40, 4  ;;  %v2007_v17 = vsel %vm9977_vm10, %v2002_v22, %v2006_v41  ;;  %v3618_v29 = vor.u32 %v3617_v3, %v3614_v49  ;;  %v8856_v43 = vld [vmem:[#allocation8 + $0xa8] sm:$0xff]  }
 0x208   : > { %v3636_v54 = vshrl.u32 %v3503_v48, 16  ;;  %v3639_v46 = vshll.u32 %v3503_v48, 16  ;;  %v3628_v27 = vor.u32 %v3627_v53, %v3623_v38  ;;  %v3633_v0 = vrot.slane %v3631_v36, 5  ;;  %8077 = vmatpush3.bf16.msra.mxu1 %v8846_v62  ;;  %v1864_v62 = vld [vmem:[#allocation2 + $0x44] sm:$0x1] }
 0x209   : > { %7901 = vmatmul.mubr.bf16.gmra.mrb[36].mxu0 %v7125_v61  ;;  %v2017_v42 = vsel %vm9977_vm10, %v2012_v19, %v2016_v26  ;;  %v3645_v12 = vshll.u32 %v3504_v25, 16  ;;  %v3619_v60 = vrot.slane %v3618_v29, 4  ;;  %8078 = vmatprep.subr.bf16.mxu1 %v8847_v6  ;;  %v3649_v31 = vshrl.u32 %v3504_v25, 16  ;;  %v1866_v48 = vld [vmem:[#allocation2 + $0x4c] sm:$0xf]  ;;  %v8852_v45 = vld [vmem:[#allocation8 + $0x168] sm:$0xff]  }
 0x20a   : > { %v7126_v2 = vcombine.low %v2007_v17, %v2017_v42  ;;  %v3638_v50 = vrot.slane %v3636_v54, 4  ;;  %v3641_v32 = vrot.slane %v3639_v46, 5  ;;  %7935 = vmatpush3.bf16.msra.mxu0 %v8853_v5  ;;  %v3629_v10 = vrot.slane %v3628_v27, 4  ;;  %v8857_v61 = vld [vmem:[#allocation8 + $0xb0] sm:$0xff]  }
 0x20b   : > { %v3647_v59 = vrot.slane %v3645_v12, 5  ;;  %v3655_v41 = vshll.u32 %v3505_v34, 16  ;;  %7936 = vmatprep.subr.bf16.mxu0 %v8854_v47  ;;  %v3624_v16 = vsel %vm9977_vm10, %v3619_v60, %v3623_v38  ;;  %v2019_v30 = vshrl.u32 %v1862_v18, 16 }
 0x20c   : > { %7904 = vmatprep.mubr.bf16.mxu0 %v7126_v2  ;;  %v3642_v9 = vor.u32 %v3641_v32, %v3638_v50  ;;  %v2022_v13 = vshll.u32 %v1862_v18, 16  ;;  %v3634_v37 = vsel %vm9977_vm10, %v3629_v10, %v3633_v0  ;;  %v3651_v15 = vrot.slane %v3649_v31, 4  ;;  %8079 = vmatpush3.bf16.msra.mxu1 %v8847_v6  ;;  %v1867_v6 = vld [vmem:[#allocation2 + $0x50] sm:$0x1]  ;;  %v3506_v18 = vld [vmem:[#allocation2 + $0x48] sm:$0xf] }
 0x20d   : > { %v3657_v23 = vrot.slane %v3655_v41, 5  ;;  %v2028_v5 = vshll.u32 %v1863_v28, 16  ;;  %v7213_v40 = vcombine.low %v3624_v16, %v3634_v37  ;;  %v2021_v49 = vrot.slane %v2019_v30, 4  ;;  %8080 = vmatprep.subr.bf16.mxu1 %v8849_v35  ;;  %v3508_v41 = vld [vmem:[#allocation2 + $0x50] sm:$0x1] }
 0x20e   : > { %v3643_v26 = vrot.slane %v3642_v9, 4  ;;  %v2024_v56 = vrot.slane %v2022_v13, 5  ;;  %7937 = vmatpush3.bf16.msra.mxu0 %v8854_v47  ;;  %v3652_v22 = vor.u32 %v3651_v15, %v3647_v59  ;;  %v2032_v38 = vshrl.u32 %v1863_v28, 16  ;;  %v8855_v47 = vld [vmem:[#allocation8 + $0x170] sm:$0xff]   ;;  %v8859_v16 = vld [vmem:[#allocation8 + $0xb8] sm:$0xff]  }
 0x20f   : > { %v2030_v3 = vrot.slane %v2028_v5, 5  ;;  %v2038_v25 = vshll.u32 %v1864_v62, 16  ;;  %7938 = vmatprep.subr.bf16.mxu0 %v8856_v43  ;;  %8045 = vmatmul.mubr.bf16.gmra.mrb[4].mxu1 %v7213_v40  ;;  %v2043_v36 = vshrl.u32 %v1865_v44, 16  ;;  %v2046_v17 = vshll.u32 %v1865_v44, 16  ;;  %v3507_v28 = vld [vmem:[#allocation2 + $0x4c] sm:$0xf] }
 0x210   : > { %v3648_v19 = vsel %vm9977_vm10, %v3643_v26, %v3647_v59  ;;  %v2025_v53 = vor.u32 %v2024_v56, %v2021_v49  ;;  %v3653_v29 = vrot.slane %v3652_v22, 4  ;;  %v2034_v34 = vrot.slane %v2032_v38, 4  ;;  %8081 = vmatpush3.bf16.msra.mxu1 %v8849_v35  ;;  %v3509_v5 = vld [vmem:[#allocation2 + $0x54] sm:$0xf] }
 0x211   : > { %v2040_v54 = vrot.slane %v2038_v25, 5  ;;  %v2052_v46 = vshll.u32 %v1866_v48, 16  ;;  %v2045_v27 = vrot.slane %v2043_v36, 4  ;;  %v2048_v0 = vrot.slane %v2046_v17, 5  ;;  %8082 = vmatprep.subr.bf16.mxu1 %v8852_v45  ;;  %v8858_v44 = vld [vmem:[#allocation8 + $0x178] sm:$0xff]  }
 0x212   : > { %v2026_v42 = vrot.slane %v2025_v53, 4  ;;  %v2056_v12 = vshrl.u32 %v1866_v48, 16  ;;  %7939 = vmatpush3.bf16.msra.mxu0 %v8856_v43  ;;  %v3658_v2 = vsel %vm9977_vm10, %v3653_v29, %v3657_v23  ;;  %v2035_v60 = vor.u32 %v2034_v34, %v2030_v3  ;;  %v3510_v48 = vld [vmem:[#allocation2 + $0x58] sm:$0xf] }
 0x213   : > { %v2054_v50 = vrot.slane %v2052_v46, 5  ;;  %v2062_v32 = vshll.u32 %v1867_v6, 16  ;;  %7940 = vmatprep.subr.bf16.mxu0 %v8857_v61  ;;  %v7214_v10 = vcombine.low %v3648_v19, %v3658_v2  ;;  %v2049_v59 = vor.u32 %v2048_v0, %v2045_v27  ;;  %v3511_v6 = vld [vmem:[#allocation2 + $0x5c] sm:$0x1] }
 0x214   : > { %v2031_v35 = vsel %vm9977_vm10, %v2026_v42, %v2030_v3  ;;  %v2058_v31 = vrot.slane %v2056_v12, 4  ;;  %v2036_v9 = vrot.slane %v2035_v60, 4  ;;  %v3660_v30 = vshrl.u32 %v3506_v18, 16  ;;  %8083 = vmatpush3.bf16.msra.mxu1 %v8852_v45  ;;  %v10043_v46 = vld [vmem:[#allocation8 + $0x180] sm:$0xff]  }
 0x215   : > { %v2064_v62 = vrot.slane %v2062_v32, 5  ;;  %v3663_v43 = vshll.u32 %v3506_v18, 16  ;;  %8048 = vmatprep.mubr.bf16.mxu1 %v7214_v10  ;;  %v2050_v13 = vrot.slane %v2049_v59, 4  ;;  %v3669_v15 = vshll.u32 %v3507_v28, 16  ;;  %8084 = vmatprep.subr.bf16.mxu1 %v8855_v47  ;;  %v1869_v18 = vld [vmem:[#allocation2 + $0x58] sm:$0xf] }
 0x216   : > { %v2059_v37 = vor.u32 %v2058_v31, %v2054_v50  ;;  %v3673_v23 = vshrl.u32 %v3507_v28, 16  ;;  %v2041_v40 = vsel %vm9977_vm10, %v2036_v9, %v2040_v54  ;;  %v3662_v26 = vrot.slane %v3660_v30, 4  ;;  %7941 = vmatpush3.bf16.msra.mxu0 %v8857_v61  ;;  %v1868_v54 = vld [vmem:[#allocation2 + $0x54] sm:$0xf]  ;;  %v1870_v9 = vld [vmem:[#allocation2 + $0x5c] sm:$0x1] }
 0x217   : > { %v3665_v49 = vrot.slane %v3663_v43, 5  ;;  %v3679_v56 = vshll.u32 %v3508_v41, 16  ;;  %v7127_v22 = vcombine.low %v2031_v35, %v2041_v40  ;;  %v2055_v45 = vsel %vm9977_vm10, %v2050_v13, %v2054_v50  ;;  %7942 = vmatprep.subr.bf16.mxu0 %v8859_v16  ;;  %v1871_v30 = vld [vmem:[#allocation2 + $0x60] sm:$0xf] }
 0x218   : > { %v2060_v3 = vrot.slane %v2059_v37, 4  ;;  %v3671_v38 = vrot.slane %v3669_v15, 5  ;;  %v3675_v19 = vrot.slane %v3673_v23, 4  ;;  %v3684_v36 = vshrl.u32 %v3509_v5, 16  ;;  %8085 = vmatpush3.bf16.msra.mxu1 %v8855_v47  ;;  %v1872_v15 = vld [vmem:[#allocation2 + $0x64] sm:$0xf] }
 0x219   : > { %v3666_v25 = vor.u32 %v3665_v49, %v3662_v26  ;;  %v3681_v53 = vrot.slane %v3679_v56, 5  ;;  %7905 = vmatmul.mubr.bf16.gmra.mrb[40].mxu0 %v7127_v22  ;;  %v3687_v29 = vshll.u32 %v3509_v5, 16  ;;  %v3693_v34 = vshll.u32 %v3510_v48, 16  ;;  %8086 = vmatprep.subr.bf16.mxu1 %v8858_v44 }
 0x21a   : > { %v2065_v17 = vsel %vm9977_vm10, %v2060_v3, %v2064_v62  ;;  %v3697_v61 = vshrl.u32 %v3510_v48, 16  ;;  %v3676_v0 = vor.u32 %v3675_v19, %v3671_v38  ;;  %v3686_v12 = vrot.slane %v3684_v36, 4  ;;  %7943 = vmatpush3.bf16.msra.mxu0 %v8859_v16  ;;  %v1873_v3 = vld [vmem:[#allocation2 + $0x68] sm:$0x1]  ;;  %v3512_v19 = vld [vmem:[#allocation2 + $0x60] sm:$0xf] }
 0x21b   : > { %v7128_v42 = vcombine.low %v2055_v45, %v2065_v17  ;;  %v3667_v27 = vrot.slane %v3666_v25, 4  ;;  %v3689_v2 = vrot.slane %v3687_v29, 5  ;;  %v3695_v60 = vrot.slane %v3693_v34, 5  ;;  %v3513_v29 = vld [vmem:[#allocation2 + $0x64] sm:$0xf] }
 0x21c   : > { %v3699_v47 = vrot.slane %v3697_v61, 4  ;;  %v3703_v50 = vshll.u32 %v3511_v6, 16  ;;  %v3677_v28 = vrot.slane %v3676_v0, 4  ;;  %v2067_v10 = vshrl.u32 %v1868_v54, 16  ;;  %8087 = vmatpush3.bf16.msra.mxu1 %v8858_v44 }
 0x21d   : > { %7908 = vmatprep.mubr.bf16.mxu0 %v7128_v42  ;;  %v3672_v32 = vsel %vm9977_vm10, %v3667_v27, %v3671_v38  ;;  %v2070_v35 = vshll.u32 %v1868_v54, 16  ;;  %v3690_v59 = vor.u32 %v3689_v2, %v3686_v12  ;;  %v2076_v62 = vshll.u32 %v1869_v18, 16  ;;  %8120 = vmatprep.subr.bf16.mxu1 %v10043_v46 }
 0x21e   : > { %v3700_v31 = vor.u32 %v3699_v47, %v3695_v60  ;;  %v3705_v41 = vrot.slane %v3703_v50, 5  ;;  %v3682_v16 = vsel %vm9977_vm10, %v3677_v28, %v3681_v53  ;;  %v2069_v43 = vrot.slane %v2067_v10, 4  ;;  %v3515_v28 = vld [vmem:[#allocation2 + $0x6c] sm:$0xf] }
 0x21f   : > { %v2072_v13 = vrot.slane %v2070_v35, 5  ;;  %v2080_v37 = vshrl.u32 %v1869_v18, 16  ;;  %v7215_v23 = vcombine.low %v3672_v32, %v3682_v16  ;;  %v3691_v5 = vrot.slane %v3690_v59, 4  ;;  %v3514_v18 = vld [vmem:[#allocation2 + $0x68] sm:$0x1] }
 0x220   : > { %v3701_v40 = vrot.slane %v3700_v31, 4  ;;  %v2078_v26 = vrot.slane %v2076_v62, 5  ;;  %v2086_v56 = vshll.u32 %v1870_v9, 16  ;;  %v2091_v48 = vshrl.u32 %v1871_v30, 16  ;;  %v10058_v16 = vld [vmem:[#allocation2 + $0x70] sm:$0xf] }
 0x221   : > { %v2073_v44 = vor.u32 %v2072_v13, %v2069_v43  ;;  %v2082_v49 = vrot.slane %v2080_v37, 4  ;;  %8049 = vmatmul.mubr.bf16.gmra.mrb[8].mxu1 %v7215_v23  ;;  %v3696_v22 = vsel %vm9977_vm10, %v3691_v5, %v3695_v60  ;;  %v2094_v38 = vshll.u32 %v1871_v30, 16 }
 0x222   : > { %v3706_v45 = vsel %vm9977_vm10, %v3701_v40, %v3705_v41  ;;  %v2100_v25 = vshll.u32 %v1872_v15, 16  ;;  %v2088_v17 = vrot.slane %v2086_v56, 5  ;;  %v2093_v34 = vrot.slane %v2091_v48, 4 }
 0x223   : > { %v7216_v53 = vcombine.low %v3696_v22, %v3706_v45  ;;  %v2074_v6 = vrot.slane %v2073_v44, 4  ;;  %v2083_v36 = vor.u32 %v2082_v49, %v2078_v26  ;;  %v2096_v61 = vrot.slane %v2094_v38, 5  ;;  %v1874_v45 = vld [vmem:[#allocation2 + $0x6c] sm:$0xf] }
 0x224   : > { %v2102_v54 = vrot.slane %v2100_v25, 5  ;;  %v2104_v42 = vshrl.u32 %v1872_v15, 16  ;;  %v2110_v12 = vshll.u32 %v1873_v3, 16  ;;  %v3708_v2 = vshrl.u32 %v3512_v19, 16 }
 0x225   : > { %8052 = vmatprep.mubr.bf16.mxu1 %v7216_v53  ;;  %v2079_v27 = vsel %vm9977_vm10, %v2074_v6, %v2078_v26  ;;  %v2084_v0 = vrot.slane %v2083_v36, 4  ;;  %v2097_v60 = vor.u32 %v2096_v61, %v2093_v34  ;;  %v3711_v50 = vshll.u32 %v3512_v19, 16  ;;  %v3517_v26 = vld [vmem:[#allocation2 + $0x74] sm:$0x1]  ;;  %v10066_v53 = vld [vmem:[#allocation2 + $0x70] sm:$0xf] }
 0x226   : > { %v2106_v47 = vrot.slane %v2104_v42, 4  ;;  %v3717_v32 = vshll.u32 %v3513_v29, 16  ;;  %v2112_v35 = vrot.slane %v2110_v12, 5  ;;  %v3710_v59 = vrot.slane %v3708_v2, 4  ;;  %v1876_v42 = vld [vmem:[#allocation2 + $0x74] sm:$0x1] }
 0x227   : > { %v2089_v10 = vsel %vm9977_vm10, %v2084_v0, %v2088_v17  ;;  %v3721_v31 = vshrl.u32 %v3513_v29, 16  ;;  %v2098_v9 = vrot.slane %v2097_v60, 4  ;;  %v3713_v30 = vrot.slane %v3711_v50, 5  ;;  %v1877_v60 = vld [vmem:[#allocation2 + $0x78] sm:$0xf] }
 0x228   : > { %v7129_v41 = vcombine.low %v2079_v27, %v2089_v10  ;;  %v2107_v62 = vor.u32 %v2106_v47, %v2102_v54  ;;  %v3719_v43 = vrot.slane %v3717_v32, 5  ;;  %v3727_v37 = vshll.u32 %v3514_v18, 16  ;;  %v10073_v10 = vld [vmem:[#allocation2 + $0x7c] sm:$0xf] }
 0x229   : > { %v3723_v13 = vrot.slane %v3721_v31, 4  ;;  %v3732_v15 = vshrl.u32 %v3515_v28, 16  ;;  %v2103_v23 = vsel %vm9977_vm10, %v2098_v9, %v2102_v54  ;;  %v3714_v40 = vor.u32 %v3713_v30, %v3710_v59  ;;  %v10078_v30 = vld [vmem:[#allocation2 + $0x80] sm:$0x1] }
 0x22a   : > { %7909 = vmatmul.mubr.bf16.gmra.mrb[44].mxu0 %v7129_v41  ;;  %v2108_v5 = vrot.slane %v2107_v62, 4  ;;  %v3735_v44 = vshll.u32 %v3515_v28, 16  ;;  %v3729_v56 = vrot.slane %v3727_v37, 5  ;;  %v3741_v22 = vshll.u32 %v10058_v16, 16 }
 0x22b   : > { %v3724_v49 = vor.u32 %v3723_v13, %v3719_v43  ;;  %v3734_v48 = vrot.slane %v3732_v15, 4  ;;  %v3715_v38 = vrot.slane %v3714_v40, 4  ;;  %v3745_v19 = vshrl.u32 %v10058_v16, 16  ;;  %v3518_v40 = vld [vmem:[#allocation2 + $0x78] sm:$0xf] }
 0x22c   : > { %v2113_v3 = vsel %vm9977_vm10, %v2108_v5, %v2112_v35  ;;  %v3737_v25 = vrot.slane %v3735_v44, 5  ;;  %v3743_v17 = vrot.slane %v3741_v22, 5  ;;  %v3751_v29 = vshll.u32 %v3517_v26, 16 }
 0x22d   : > { %v7130_v6 = vcombine.low %v2103_v23, %v2113_v3  ;;  %v3725_v36 = vrot.slane %v3724_v49, 4  ;;  %v3720_v34 = vsel %vm9977_vm10, %v3715_v38, %v3719_v43  ;;  %v3747_v54 = vrot.slane %v3745_v19, 4 }
 0x22e   : > { %v3738_v61 = vor.u32 %v3737_v25, %v3734_v48  ;;  %v2115_v27 = vshrl.u32 %v1874_v45, 16  ;;  %v3753_v12 = vrot.slane %v3751_v29, 5  ;;  %v2118_v18 = vshll.u32 %v1874_v45, 16  ;;  %v10084_v48 = vld [vmem:[#allocation2 + $0x7c] sm:$0xf] }
 0x22f   : > { %7912 = vmatprep.mubr.bf16.mxu0 %v7130_v6  ;;  %v3730_v0 = vsel %vm9977_vm10, %v3725_v36, %v3729_v56  ;;  %v2124_v2 = vshll.u32 %v10066_v53, 16  ;;  %v3748_v32 = vor.u32 %v3747_v54, %v3743_v17  ;;  %v2128_v31 = vshrl.u32 %v10066_v53, 16  ;;  %v10086_v25 = vld [vmem:[#allocation2 + $0x80] sm:$0x1]  ;;  %v3521_v29 = vld [vmem:[#allocation2 + $0x84] sm:$0xf] }
 0x230   : > { %v7217_v47 = vcombine.low %v3720_v34, %v3730_v0  ;;  %v3739_v50 = vrot.slane %v3738_v61, 4  ;;  %v2117_v28 = vrot.slane %v2115_v27, 4  ;;  %v2120_v35 = vrot.slane %v2118_v18, 5  ;;  %v10092_v27 = vld [vmem:[#allocation2 + $0x88] sm:$0xf] }
 0x231   : > { %v2126_v59 = vrot.slane %v2124_v2, 5  ;;  %v2134_v41 = vshll.u32 %v1876_v42, 16  ;;  %v3749_v62 = vrot.slane %v3748_v32, 4  ;;  %v2139_v43 = vshrl.u32 %v1877_v60, 16 }
 0x232   : > { %8053 = vmatmul.mubr.bf16.gmra.mrb[12].mxu1 %v7217_v47  ;;  %v3744_v9 = vsel %vm9977_vm10, %v3739_v50, %v3743_v17  ;;  %v2142_v13 = vshll.u32 %v1877_v60, 16  ;;  %v2121_v37 = vor.u32 %v2120_v35, %v2117_v28  ;;  %v2130_v15 = vrot.slane %v2128_v31, 4  ;;  %v10097_v28 = vld [vmem:[#allocation2 + $0x8c] sm:$0x1] }
 0x233   : > { %v2136_v23 = vrot.slane %v2134_v41, 5  ;;  %v2148_v5 = vshll.u32 %v10073_v10, 16  ;;  %v3754_v26 = vsel %vm9977_vm10, %v3749_v62, %v3753_v12  ;;  %v2141_v44 = vrot.slane %v2139_v43, 4 }
 0x234   : > { %v2144_v49 = vrot.slane %v2142_v13, 5  ;;  %v2152_v56 = vshrl.u32 %v10073_v10, 16  ;;  %v7218_v22 = vcombine.low %v3744_v9, %v3754_v26  ;;  %v2122_v45 = vrot.slane %v2121_v37, 4  ;;  %v1880_v9 = vld [vmem:[#allocation2 + $0x84] sm:$0xf] }
 0x235   : > { %v2131_v3 = vor.u32 %v2130_v15, %v2126_v59  ;;  %v2150_v38 = vrot.slane %v2148_v5, 5  ;;  %v2158_v36 = vshll.u32 %v10078_v30, 16  ;;  %v3756_v17 = vshrl.u32 %v3518_v40, 16  ;;  %v10102_v15 = vld [vmem:[#allocation2 + $0x88] sm:$0xf] }
 0x236   : > { %v2145_v19 = vor.u32 %v2144_v49, %v2141_v44  ;;  %v2154_v6 = vrot.slane %v2152_v56, 4  ;;  %8056 = vmatprep.mubr.bf16.mxu1 %v7218_v22  ;;  %v2127_v34 = vsel %vm9977_vm10, %v2122_v45, %v2126_v59  ;;  %v3759_v54 = vshll.u32 %v3518_v40, 16 }
 0x237   : > { %v2132_v61 = vrot.slane %v2131_v3, 4  ;;  %v3765_v42 = vshll.u32 %v10084_v48, 16  ;;  %v2160_v18 = vrot.slane %v2158_v36, 5  ;;  %v3758_v2 = vrot.slane %v3756_v17, 4  ;;  %v1883_v36 = vld [vmem:[#allocation2 + $0x90] sm:$0xf] }
 0x238   : > { %v2146_v0 = vrot.slane %v2145_v19, 4  ;;  %v2155_v12 = vor.u32 %v2154_v6, %v2150_v38  ;;  %v3761_v47 = vrot.slane %v3759_v54, 5  ;;  %v3769_v32 = vshrl.u32 %v10084_v48, 16  ;;  %v10109_v6 = vld [vmem:[#allocation2 + $0x8c] sm:$0x1] }
 0x239   : > { %v2137_v60 = vsel %vm9977_vm10, %v2132_v61, %v2136_v23  ;;  %v3767_v50 = vrot.slane %v3765_v42, 5  ;;  %v3775_v41 = vshll.u32 %v10086_v25, 16  ;;  %v3780_v13 = vshrl.u32 %v3521_v29, 16  ;;  %v10113_v54 = vld [vmem:[#allocation2 + $0x94] sm:$0xf] }
 0x23a   : > { %v7131_v35 = vcombine.low %v2127_v34, %v2137_v60  ;;  %v2151_v59 = vsel %vm9977_vm10, %v2146_v0, %v2150_v38  ;;  %v2156_v31 = vrot.slane %v2155_v12, 4  ;;  %v3762_v62 = vor.u32 %v3761_v47, %v3758_v2 }
 0x23b   : > { %v3771_v43 = vrot.slane %v3769_v32, 4  ;;  %v3783_v37 = vshll.u32 %v3521_v29, 16  ;;  %v3777_v5 = vrot.slane %v3775_v41, 5  ;;  %v3789_v40 = vshll.u32 %v10092_v27, 16  ;;  %v10119_v41 = vld [vmem:[#allocation2 + $0x98] sm:$0x1] }
 0x23c   : > { %7913 = vmatmul.mubr.bf16.gmra.mrb[48].mxu0 %v7131_v35  ;;  %v2161_v23 = vsel %vm9977_vm10, %v2156_v31, %v2160_v18  ;;  %v3793_v26 = vshrl.u32 %v10092_v27, 16  ;;  %v3763_v49 = vrot.slane %v3762_v62, 4  ;;  %v3782_v22 = vrot.slane %v3780_v13, 4 }
 0x23d   : > { %v7132_v44 = vcombine.low %v2151_v59, %v2161_v23  ;;  %v3772_v56 = vor.u32 %v3771_v43, %v3767_v50  ;;  %v3785_v45 = vrot.slane %v3783_v37, 5  ;;  %v3791_v3 = vrot.slane %v3789_v40, 5 }
 0x23e   : > { %v3795_v38 = vrot.slane %v3793_v26, 4  ;;  %v3799_v19 = vshll.u32 %v10097_v28, 16  ;;  %v3768_v17 = vsel %vm9977_vm10, %v3763_v49, %v3767_v50  ;;  %v2163_v34 = vshrl.u32 %v1880_v9, 16 }
 0x23f   : > { %7916 = vmatprep.mubr.bf16.mxu0 %v7132_v44  ;;  %v3773_v29 = vrot.slane %v3772_v56, 4  ;;  %v2166_v61 = vshll.u32 %v1880_v9, 16  ;;  %v3786_v42 = vor.u32 %v3785_v45, %v3782_v22  ;;  %v2172_v18 = vshll.u32 %v10102_v15, 16  ;;  %v3524_v9 = vld [vmem:[#allocation2 + $0x90] sm:$0xf] }
 0x240   : > { %v3796_v0 = vor.u32 %v3795_v38, %v3791_v3  ;;  %v3801_v12 = vrot.slane %v3799_v19, 5  ;;  %v2165_v60 = vrot.slane %v2163_v34, 4  ;;  %v2176_v32 = vshrl.u32 %v10102_v15, 16  ;;  %v10127_v44 = vld [vmem:[#allocation2 + $0x94] sm:$0xf] }
 0x241   : > { %v3778_v2 = vsel %vm9977_vm10, %v3773_v29, %v3777_v5  ;;  %v2168_v47 = vrot.slane %v2166_v61, 5  ;;  %v3787_v59 = vrot.slane %v3786_v42, 4  ;;  %v2174_v31 = vrot.slane %v2172_v18, 5  ;;  %v10130_v34 = vld [vmem:[#allocation2 + $0x98] sm:$0x1] }
 0x242   : > { %v7219_v35 = vcombine.low %v3768_v17, %v3778_v2  ;;  %v3797_v50 = vrot.slane %v3796_v0, 4  ;;  %v2178_v43 = vrot.slane %v2176_v32, 4  ;;  %v2182_v13 = vshll.u32 %v10109_v6, 16 }
 0x243   : > { %v2169_v62 = vor.u32 %v2168_v47, %v2165_v60  ;;  %v2187_v37 = vshrl.u32 %v1883_v36, 16  ;;  %v3792_v23 = vsel %vm9977_vm10, %v3787_v59, %v3791_v3  ;;  %v2190_v40 = vshll.u32 %v1883_v36, 16  ;;  %v3527_v3 = vld [vmem:[#allocation2 + $0x9c] sm:$0xf]  ;;  %v10136_v47 = vld [vmem:[#allocation2 + $0xa0] sm:$0xf] }
 0x244   : > { %8057 = vmatmul.mubr.bf16.gmra.mrb[16].mxu1 %v7219_v35  ;;  %v3802_v5 = vsel %vm9977_vm10, %v3797_v50, %v3801_v12  ;;  %v2196_v26 = vshll.u32 %v10113_v54, 16  ;;  %v2179_v22 = vor.u32 %v2178_v43, %v2174_v31  ;;  %v2184_v45 = vrot.slane %v2182_v13, 5 }
 0x245   : > { %v7220_v49 = vcombine.low %v3792_v23, %v3802_v5  ;;  %v2170_v56 = vrot.slane %v2169_v62, 4  ;;  %v2189_v38 = vrot.slane %v2187_v37, 4  ;;  %v2192_v19 = vrot.slane %v2190_v40, 5  ;;  %v10141_v37 = vld [vmem:[#allocation2 + $0xa4] sm:$0x1] }
 0x246   : > { %v2198_v17 = vrot.slane %v2196_v26, 5  ;;  %v2200_v29 = vshrl.u32 %v10113_v54, 16  ;;  %v2180_v61 = vrot.slane %v2179_v22, 4  ;;  %v2206_v42 = vshll.u32 %v10119_v41, 16 }
 0x247   : > { %8060 = vmatprep.mubr.bf16.mxu1 %v7220_v49  ;;  %v2175_v36 = vsel %vm9977_vm10, %v2170_v56, %v2174_v31  ;;  %v3804_v0 = vshrl.u32 %v3524_v9, 16  ;;  %v2193_v12 = vor.u32 %v2192_v19, %v2189_v38  ;;  %v3807_v2 = vshll.u32 %v3524_v9, 16 }
 0x248   : > { %v2202_v18 = vrot.slane %v2200_v29, 4  ;;  %v3813_v60 = vshll.u32 %v10127_v44, 16  ;;  %v2185_v32 = vsel %vm9977_vm10, %v2180_v61, %v2184_v45  ;;  %v2208_v35 = vrot.slane %v2206_v42, 5  ;;  %v1886_v45 = vld [vmem:[#allocation2 + $0x9c] sm:$0xf] }
 0x249   : > { %v3806_v59 = vrot.slane %v3804_v0, 4  ;;  %v3817_v50 = vshrl.u32 %v10127_v44, 16  ;;  %v7133_v62 = vcombine.low %v2175_v36, %v2185_v32  ;;  %v2194_v31 = vrot.slane %v2193_v12, 4 }
 0x24a   : > { %v2203_v43 = vor.u32 %v2202_v18, %v2198_v17  ;;  %v3809_v13 = vrot.slane %v3807_v2, 5  ;;  %v3815_v23 = vrot.slane %v3813_v60, 5  ;;  %v3823_v9 = vshll.u32 %v10130_v34, 16  ;;  %v10150_v18 = vld [vmem:[#allocation2 + $0xa0] sm:$0xf] }
 0x24b   : > { %v3819_v5 = vrot.slane %v3817_v50, 4  ;;  %v3828_v40 = vshrl.u32 %v3527_v3, 16  ;;  %7917 = vmatmul.mubr.bf16.gmra.mrb[52].mxu0 %v7133_v62  ;;  %v2199_v26 = vsel %vm9977_vm10, %v2194_v31, %v2198_v17  ;;  %v3831_v22 = vshll.u32 %v3527_v3, 16  ;;  %v10155_v62 = vld [vmem:[#allocation2 + $0xa4] sm:$0x1] }
 0x24c   : > { %v2204_v49 = vrot.slane %v2203_v43, 4  ;;  %v3810_v56 = vor.u32 %v3809_v13, %v3806_v59  ;;  %v3825_v19 = vrot.slane %v3823_v9, 5  ;;  %v3837_v36 = vshll.u32 %v10136_v47, 16  ;;  %v1889_v9 = vld [vmem:[#allocation2 + $0xa8] sm:$0xf] }
 0x24d   : > { %v3820_v38 = vor.u32 %v3819_v5, %v3815_v23  ;;  %v3830_v29 = vrot.slane %v3828_v40, 4  ;;  %v3833_v0 = vrot.slane %v3831_v22, 5  ;;  %v3841_v12 = vshrl.u32 %v10136_v47, 16  ;;  %v10160_v22 = vld [vmem:[#allocation2 + $0xac] sm:$0xf] }
 0x24e   : > { %v2209_v61 = vsel %vm9977_vm10, %v2204_v49, %v2208_v35  ;;  %v3811_v42 = vrot.slane %v3810_v56, 4  ;;  %v3839_v60 = vrot.slane %v3837_v36, 5  ;;  %v3847_v3 = vshll.u32 %v10141_v37, 16 }
 0x24f   : > { %v7134_v2 = vcombine.low %v2199_v26, %v2209_v61  ;;  %v3821_v17 = vrot.slane %v3820_v38, 4  ;;  %v3834_v59 = vor.u32 %v3833_v0, %v3830_v29  ;;  %v3843_v50 = vrot.slane %v3841_v12, 4  ;;  %v10166_v61 = vld [vmem:[#allocation2 + $0xb0] sm:$0x1] }
 0x250   : > { %v3816_v32 = vsel %vm9977_vm10, %v3811_v42, %v3815_v23  ;;  %v2211_v31 = vshrl.u32 %v1886_v45, 16  ;;  %v3849_v43 = vrot.slane %v3847_v3, 5  ;;  %v2214_v13 = vshll.u32 %v1886_v45, 16 }
 0x251   : > { %7920 = vmatprep.mubr.bf16.mxu0 %v7134_v2  ;;  %v3826_v35 = vsel %vm9977_vm10, %v3821_v17, %v3825_v19  ;;  %v2220_v5 = vshll.u32 %v10150_v18, 16  ;;  %v3835_v26 = vrot.slane %v3834_v59, 4  ;;  %v3844_v49 = vor.u32 %v3843_v50, %v3839_v60 }
 0x252   : > { %v7221_v40 = vcombine.low %v3816_v32, %v3826_v35  ;;  %v2213_v56 = vrot.slane %v2211_v31, 4  ;;  %v2216_v23 = vrot.slane %v2214_v13, 5  ;;  %v2224_v29 = vshrl.u32 %v10150_v18, 16  ;;  %v3530_v32 = vld [vmem:[#allocation2 + $0xa8] sm:$0xf] }
 0x253   : > { %v2222_v38 = vrot.slane %v2220_v5, 5  ;;  %v2230_v36 = vshll.u32 %v10155_v62, 16  ;;  %v3840_v19 = vsel %vm9977_vm10, %v3835_v26, %v3839_v60  ;;  %v3845_v45 = vrot.slane %v3844_v49, 4  ;;  %v10172_v13 = vld [vmem:[#allocation2 + $0xac] sm:$0xf] }
 0x254   : > { %8061 = vmatmul.mubr.bf16.gmra.mrb[20].mxu1 %v7221_v40  ;;  %v2235_v42 = vshrl.u32 %v1889_v9, 16  ;;  %v2238_v0 = vshll.u32 %v1889_v9, 16  ;;  %v2217_v12 = vor.u32 %v2216_v23, %v2213_v56  ;;  %v2226_v2 = vrot.slane %v2224_v29, 4 }
 0x255   : > { %v2232_v17 = vrot.slane %v2230_v36, 5  ;;  %v2244_v3 = vshll.u32 %v10160_v22, 16  ;;  %v3850_v59 = vsel %vm9977_vm10, %v3845_v45, %v3849_v43  ;;  %v2248_v35 = vshrl.u32 %v10160_v22, 16  ;;  %v10177_v36 = vld [vmem:[#allocation2 + $0xb0] sm:$0x1] }
 0x256   : > { %v2237_v50 = vrot.slane %v2235_v42, 4  ;;  %v2240_v31 = vrot.slane %v2238_v0, 5  ;;  %v7222_v60 = vcombine.low %v3840_v19, %v3850_v59  ;;  %v2218_v5 = vrot.slane %v2217_v12, 4 }
 0x257   : > { %v2227_v40 = vor.u32 %v2226_v2, %v2222_v38  ;;  %v2246_v26 = vrot.slane %v2244_v3, 5  ;;  %v2250_v49 = vrot.slane %v2248_v35, 4  ;;  %v2254_v56 = vshll.u32 %v10166_v61, 16  ;;  %v3533_v3 = vld [vmem:[#allocation2 + $0xb4] sm:$0xf] }
 0x258   : > { %v2241_v9 = vor.u32 %v2240_v31, %v2237_v50  ;;  %v3852_v23 = vshrl.u32 %v3530_v32, 16  ;;  %8064 = vmatprep.mubr.bf16.mxu1 %v7222_v60  ;;  %v2223_v29 = vsel %vm9977_vm10, %v2218_v5, %v2222_v38  ;;  %v3855_v45 = vshll.u32 %v3530_v32, 16  ;;  %v10183_v60 = vld [vmem:[#allocation2 + $0xb8] sm:$0xf] }
 0x259   : > { %v2228_v43 = vrot.slane %v2227_v40, 4  ;;  %v3861_v42 = vshll.u32 %v10172_v13, 16  ;;  %v2251_v19 = vor.u32 %v2250_v49, %v2246_v26  ;;  %v2256_v12 = vrot.slane %v2254_v56, 5  ;;  %v10188_v56 = vld [vmem:[#allocation2 + $0xbc] sm:$0x1] }
 0x25a   : > { %v2242_v0 = vrot.slane %v2241_v9, 4  ;;  %v3854_v2 = vrot.slane %v3852_v23, 4  ;;  %v3857_v50 = vrot.slane %v3855_v45, 5  ;;  %v3865_v35 = vshrl.u32 %v10172_v13, 16 }
 0x25b   : > { %v2233_v59 = vsel %vm9977_vm10, %v2228_v43, %v2232_v17  ;;  %v3863_v31 = vrot.slane %v3861_v42, 5  ;;  %v2252_v5 = vrot.slane %v2251_v19, 4  ;;  %v3871_v40 = vshll.u32 %v10177_v36, 16  ;;  %v1892_v42 = vld [vmem:[#allocation2 + $0xb4] sm:$0xf] }
 0x25c   : > { %v7135_v38 = vcombine.low %v2223_v29, %v2233_v59  ;;  %v2247_v32 = vsel %vm9977_vm10, %v2242_v0, %v2246_v26  ;;  %v3858_v9 = vor.u32 %v3857_v50, %v3854_v2  ;;  %v3867_v49 = vrot.slane %v3865_v35, 4  ;;  %v10194_v2 = vld [vmem:[#allocation2 + $0xb8] sm:$0xf] }
 0x25d   : > { %v3876_v23 = vshrl.u32 %v3533_v3, 16  ;;  %v3879_v55 = vshll.u32 %v3533_v3, 16  ;;  %v2257_v17 = vsel %vm9977_vm10, %v2252_v5, %v2256_v12  ;;  %v3873_v43 = vrot.slane %v3871_v40, 5 }
 0x25e   : > { %7921 = vmatmul.mubr.bf16.gmra.mrb[56].mxu0 %v7135_v38  ;;  %v3885_v45 = vshll.u32 %v10183_v60, 16  ;;  %v3889_v29 = vshrl.u32 %v10183_v60, 16  ;;  %v7136_v26 = vcombine.low %v2247_v32, %v2257_v17  ;;  %v3859_v0 = vrot.slane %v3858_v9, 4  ;;  %v10199_v9 = vld [vmem:[#allocation2 + $0xbc] sm:$0x1] }
 0x25f   : > { %v3868_v19 = vor.u32 %v3867_v49, %v3863_v31  ;;  %v3878_v59 = vrot.slane %v3876_v23, 4  ;;  %v3881_v50 = vrot.slane %v3879_v55, 5  ;;  %v3895_v3 = vshll.u32 %v10188_v56, 16  ;;  %v3536_v23 = vld [vmem:[#allocation2 + $0xc0] sm:$0xf] }
 0x260   : > { %v3887_v35 = vrot.slane %v3885_v45, 5  ;;  %v3891_v52 = vrot.slane %v3889_v29, 4  ;;  %7924 = vmatprep.mubr.bf16.mxu0 %v7136_v26  ;;  %v3864_v12 = vsel %vm9977_vm10, %v3859_v0, %v3863_v31  ;;  %v2259_v5 = vshrl.u32 %v1892_v42, 16  ;;  %v10205_v26 = vld [vmem:[#allocation2 + $0xc4] sm:$0xf] }
 0x261   : > { %v3869_v38 = vrot.slane %v3868_v19, 4  ;;  %v2262_v40 = vshll.u32 %v1892_v42, 16  ;;  %v3882_v24 = vor.u32 %v3881_v50, %v3878_v59  ;;  %v3897_v32 = vrot.slane %v3895_v3, 5 }
 0x262   : > { %v3892_v21 = vor.u32 %v3891_v52, %v3887_v35  ;;  %v2268_v49 = vshll.u32 %v10194_v2, 16  ;;  %v2261_v17 = vrot.slane %v2259_v5, 4  ;;  %v2272_v29 = vshrl.u32 %v10194_v2, 16 }
 0x263   : > { %v3874_v55 = vsel %vm9977_vm10, %v3869_v38, %v3873_v43  ;;  %v2264_v45 = vrot.slane %v2262_v40, 5  ;;  %v3883_v0 = vrot.slane %v3882_v24, 4  ;;  %v2278_v50 = vshll.u32 %v10199_v9, 16 }
 0x264   : > { %v7223_v31 = vcombine.low %v3864_v12, %v3874_v55  ;;  %v3893_v42 = vrot.slane %v3892_v21, 4  ;;  %v2270_v19 = vrot.slane %v2268_v49, 5  ;;  %v2274_v59 = vrot.slane %v2272_v29, 4  ;;  %v10213_v21 = vld [vmem:[#allocation2 + $0xc8] sm:$0x1] }
 0x265   : > { %v2265_v52 = vor.u32 %v2264_v45, %v2261_v17  ;;  %v3900_v3 = vshrl.u32 %v3536_v23, 16  ;;  %v3888_v20 = vsel %vm9977_vm10, %v3883_v0, %v3887_v35  ;;  %v3903_v38 = vshll.u32 %v3536_v23, 16  ;;  %v4245_v29 = vld [vmem:[#allocation2 + $0xc] sm:$0xe]  ;;  %v2604_v0 = vld [vmem:[#allocation2] sm:$0xe] }
 0x266   : > { %8065 = vmatmul.mubr.bf16.gmra.mrb[24].mxu1 %v7223_v31  ;;  %v3898_v43 = vsel %vm9977_vm10, %v3893_v42, %v3897_v32  ;;  %v3909_v5 = vshll.u32 %v10205_v26, 16  ;;  %v2275_v24 = vor.u32 %v2274_v59, %v2270_v19  ;;  %v3913_v45 = vshrl.u32 %v10205_v26, 16 }
 0x267   : > { %v7224_v40 = vcombine.low %v3888_v20, %v3898_v43  ;;  %v2266_v12 = vrot.slane %v2265_v52, 4  ;;  %v3902_v49 = vrot.slane %v3900_v3, 4  ;;  %v3905_v55 = vrot.slane %v3903_v38, 5  ;;  %v8917_v3 = vld [vmem:[#allocation2 + $0x10] sm:$0xf] }
 0x268   : > { %v3911_v17 = vrot.slane %v3909_v5, 5  ;;  %v2276_v31 = vrot.slane %v2275_v24, 4  ;;  %v2280_v35 = vrot.slane %v2278_v50, 5  ;;  %v3915_v23 = vrot.slane %v3913_v45, 4 }
 0x269   : > { %8068 = vmatprep.mubr.bf16.mxu1 %v7224_v40  ;;  %v3906_v32 = vor.u32 %v3905_v55, %v3902_v49  ;;  %v3919_v42 = vshll.u32 %v10213_v21, 16  ;;  %v2271_v20 = vsel %vm9977_vm10, %v2266_v12, %v2270_v19  ;;  %v7234_v59 = vrot.slane %v4245_v29, 9  ;;  %v8918_v55 = vld [vmem:[#allocation2 + $0x14] sm:$0x1]  ;;  %v8920_v19 = vld [vmem:[#allocation2 + $0x8] sm:$0x1] }
 0x26a   : > { %v2281_v52 = vsel %vm9977_vm10, %v2276_v31, %v2280_v35  ;;  %v4311_v43 = vrot.slane %v8917_v3, 5  ;;  %v3916_v40 = vor.u32 %v3915_v23, %v3911_v17  ;;  %v7146_v24 = vrot.slane %v2604_v0, 9  ;;  %v2605_v35 = vld [vmem:[#allocation2 + $0xc] sm:$0xe]  ;;  %v8921_v3 = vld [vmem:[#allocation2 + $0x10] sm:$0xf] }
 0x26b   : > { %v7137_v38 = vcombine.low %v2271_v20, %v2281_v52  ;;  %v3907_v5 = vrot.slane %v3906_v32, 4  ;;  %v4314_v45 = vrot.slane %v8918_v55, 5  ;;  %v2676_v12 = vrot.slane %v8920_v19, 5  ;;  %v2606_v55 = vld [vmem:[#allocation2 + $0x18] sm:$0xe] }
 0x26c   : > { %v4313_v49 = vrot.slane %v4311_v43, 4  ;;  %v3917_v31 = vrot.slane %v3916_v40, 4  ;;  %v3921_v29 = vrot.slane %v3919_v42, 5  ;;  %v2680_v20 = vrot.slane %v8921_v3, 5  ;;  %v8922_v40 = vld [vmem:[#allocation2 + $0x14] sm:$0x1] }
 0x26d   : > { %7925 = vmatmul.mubr.bf16.gmra.mrb[60].mxu0 %v7137_v38  ;;  %v4312_v32 = vsel %vm10221_vm13, %v7234_v59, %v4311_v43  ;;  %v2674_v0 = vsel %vm10221_vm13, %v7146_v24, %v2673_v7  ;;  %v2675_v52 = vrot.slane %v2673_v7, 4  ;;  %v3912_v8 = vsel %vm9977_vm10, %v3907_v5, %v3911_v17  ;;  %v4247_v5 = vld [vmem:[#allocation2 + $0x24] sm:$0xe] }
 0x26e   : > { %v4315_v23 = vsel %vm10221_vm13, %v4313_v49, %v4314_v45  ;;  %v3922_v42 = vsel %vm9977_vm10, %v3917_v31, %v3921_v29  ;;  %v2682_v38 = vrot.slane %v2680_v20, 4  ;;  %v2683_v19 = vrot.slane %v8922_v40, 5  ;;  %v8923_v49 = vld [vmem:[#allocation2 + $0x1c] sm:$0xf] }
 0x26f   : > { %v7225_v3 = vcombine.low %v3912_v8, %v3922_v42  ;;  %v2677_v59 = vsel %vm10221_vm13, %v2675_v52, %v2676_v12  ;;  %v7147_v43 = vrot.slane %v2605_v35, 9  ;;  %v2687_v45 = vrot.slane %v8923_v49, 5  ;;  %v8924_v8 = vld [vmem:[#allocation2 + $0x20] sm:$0x1]  ;;  %v8925_v40 = vld [vmem:[#allocation2 + $0x1c] sm:$0xf] }
 0x270   : > { %v7250_v24 = vcombine.low %v4312_v32, %v4315_v23  ;;  %v7162_v7 = vcombine.low %v2674_v0, %v2677_v59  ;;  %v2684_v11 = vsel %vm10221_vm13, %v2682_v38, %v2683_v19  ;;  %v7148_v17 = vrot.slane %v2606_v55, 9  ;;  %v8926_v0 = vld [vmem:[#allocation2 + $0x28] sm:$0xf]  ;;  %v2607_v55 = vld [vmem:[#allocation2 + $0x24] sm:$0xe] }
 0x271   : > { %8069 = vmatmul.mubr.bf16.gmra.mrb[28].mxu1 %v7225_v3  ;;  %v2681_v31 = vsel %vm10221_vm13, %v7147_v43, %v2680_v20  ;;  %v2689_v29 = vrot.slane %v2687_v45, 4  ;;  %v2690_v42 = vrot.slane %v8924_v8, 5  ;;  %v4318_v12 = vrot.slane %v8925_v40, 5  ;;  %v8927_v20 = vld [vmem:[#allocation2 + $0x20] sm:$0x1] }
 0x272   : > { %8088 = vmatprep.mubr.bf16.mxu1 %v7250_v24  ;;  %7944 = vmatprep.mubr.bf16.mxu0 %v7162_v7  ;;  %v7163_v35 = vcombine.low %v2681_v31, %v2684_v11  ;;  %v2688_v32 = vsel %vm10221_vm13, %v7148_v17, %v2687_v45  ;;  %v7235_v23 = vrot.slane %v4246_v1, 9  ;;  %v4325_v52 = vrot.slane %v8926_v0, 5  ;;  %v8928_v24 = vld [vmem:[#allocation2 + $0x2c] sm:$0x1]  ;;  %v8929_v11 = vld [vmem:[#allocation2 + $0x28] sm:$0xf] }
 0x273   : > { %v2691_v38 = vsel %vm10221_vm13, %v2689_v29, %v2690_v42  ;;  %v4320_v19 = vrot.slane %v4318_v12, 4  ;;  %v4321_v3 = vrot.slane %v8927_v20, 5  ;;  %v7236_v59 = vrot.slane %v4247_v5, 9  ;;  %v2608_v8 = vld [vmem:[#allocation2 + $0x30] sm:$0xe]  ;;  %v8861_v20 = vld [vmem:[#allocation8 + $0x188] sm:$0xff]  }
 0x274   : > { %v7164_v43 = vcombine.low %v2688_v32, %v2691_v38  ;;  %v4327_v49 = vrot.slane %v4325_v52, 4  ;;  %v4328_v7 = vrot.slane %v8928_v24, 5  ;;  %v2694_v31 = vrot.slane %v8929_v11, 5  ;;  %v8930_v29 = vld [vmem:[#allocation2 + $0x34] sm:$0xf] }
 0x275   : > { %7945 = vmatmul.mubr.bf16.vlgmr.msra.gmra.mrb[32].mxu0 %v7163_v35  ;;  %v4319_v1 = vsel %vm10221_vm13, %v7235_v23, %v4318_v12  ;;  %v4322_v45 = vsel %vm10221_vm13, %v4320_v19, %v4321_v3  ;;  %v7149_v17 = vrot.slane %v2607_v55, 9  ;;  %v2701_v42 = vrot.slane %v8930_v29, 5  ;;  %v8931_v32 = vld [vmem:[#allocation2 + $0x2c] sm:$0x1]  ;;  %v8932_v23 = vld [vmem:[#allocation2 + $0x38] sm:$0x1] }
 0x276   : > { %7948 = vmatprep.mubr.bf16.mxu0 %v7164_v43  ;;  %v4326_v5 = vsel %vm10221_vm13, %v7236_v59, %v4325_v52  ;;  %v4329_v40 = vsel %vm10221_vm13, %v4327_v49, %v4328_v7  ;;  %v2696_v35 = vrot.slane %v2694_v31, 4  ;;  %v2697_v0 = vrot.slane %v8931_v32, 5  ;;  %v4248_v19 = vld [vmem:[#allocation2 + $0x30] sm:$0xe]  ;;  %v8933_v43 = vld [vmem:[#allocation2 + $0x34] sm:$0xf] }
 0x277   : > { %v7251_v38 = vcombine.low %v4319_v1, %v4322_v45  ;;  %v7150_v24 = vrot.slane %v2608_v8, 9  ;;  %v2703_v12 = vrot.slane %v2701_v42, 4  ;;  %v2704_v11 = vrot.slane %v8932_v23, 5  ;;  %v4249_v7 = vld [vmem:[#allocation2 + $0x3c] sm:$0xe] }
 0x278   : > { %v7252_v55 = vcombine.low %v4326_v5, %v4329_v40  ;;  %v2698_v3 = vsel %vm10221_vm13, %v2696_v35, %v2697_v0  ;;  %v4332_v29 = vrot.slane %v8933_v43, 5  ;;  %v2695_v52 = vsel %vm10221_vm13, %v7149_v17, %v2694_v31  ;;  %v8934_v8 = vld [vmem:[#allocation2 + $0x40] sm:$0xf]  ;;  %v8935_v35 = vld [vmem:[#allocation2 + $0x38] sm:$0x1] }
 0x279   : > { %8089 = vmatmul.mubr.bf16.vlgmr.msra.gmra.mrb[0].mxu1 %v7251_v38  ;;  %v2702_v59 = vsel %vm10221_vm13, %v7150_v24, %v2701_v42  ;;  %v2705_v49 = vsel %vm10221_vm13, %v2703_v12, %v2704_v11  ;;  %v4339_v1 = vrot.slane %v8934_v8, 5  ;;  %v7165_v45 = vcombine.low %v2695_v52, %v2698_v3  ;;  %v8936_v17 = vld [vmem:[#allocation2 + $0x44] sm:$0x1]  ;;  %v2609_v42 = vld [vmem:[#allocation2 + $0x3c] sm:$0xe]  ;;  %v8862_v12 = vld [vmem:[#allocation8 + $0x190] sm:$0xff]  }
 0x27a   : > { %8121 = vmatpush3.bf16.msra.mxu1 %v10043_v46  ;;  %8092 = vmatprep.mubr.bf16.mxu1 %v7252_v55  ;;  %v7237_v5 = vrot.slane %v4248_v19, 9  ;;  %v4334_v40 = vrot.slane %v4332_v29, 4  ;;  %v4335_v32 = vrot.slane %v8935_v35, 5  ;;  %v7166_v0 = vcombine.low %v2702_v59, %v2705_v49  ;;  %v8937_v24 = vld [vmem:[#allocation2 + $0x40] sm:$0xf] }
 0x27b   : > { %8122 = vmatprep.subr.bf16.mxu1 %v8861_v20  ;;  %v4341_v31 = vrot.slane %v4339_v1, 4  ;;  %v4342_v38 = vrot.slane %v8936_v17, 5  ;;  %v2708_v23 = vrot.slane %v8937_v24, 5  ;;  %v7238_v46 = vrot.slane %v4249_v7, 9  ;;  %v2610_v55 = vld [vmem:[#allocation2 + $0x48] sm:$0xe] }
 0x27c   : > { %v4336_v11 = vsel %vm10221_vm13, %v4334_v40, %v4335_v32  ;;  %v8938_v3 = vld [vmem:[#allocation2 + $0x4c] sm:$0xf]  ;;  %v4333_v43 = vsel %vm10221_vm13, %v7237_v5, %v4332_v29  ;;  %v8939_v49 = vld [vmem:[#allocation2 + $0x44] sm:$0x1]  ;;  %v7151_v35 = vrot.slane %v2609_v42, 9  ;;  %v7152_v29 = vrot.slane %v2610_v55, 9 }
 0x27d   : > { %7949 = vmatmul.mubr.bf16.gmra.mrb[36].mxu0 %v7165_v45  ;;  %v2715_v19 = vrot.slane %v8938_v3, 5  ;;  %v4343_v52 = vsel %vm10221_vm13, %v4341_v31, %v4342_v38  ;;  %v2710_v59 = vrot.slane %v2708_v23, 4  ;;  %v2711_v8 = vrot.slane %v8939_v49, 5  ;;  %v8940_v7 = vld [vmem:[#allocation2 + $0x50] sm:$0x1] }
 0x27e   : > { %7952 = vmatprep.mubr.bf16.mxu0 %v7166_v0  ;;  %8123 = vmatpush3.bf16.msra.mxu1 %v8861_v20  ;;  %v4340_v45 = vsel %vm10221_vm13, %v7238_v46, %v4339_v1  ;;  %v2718_v32 = vrot.slane %v8940_v7, 5  ;;  %v7253_v17 = vcombine.low %v4333_v43, %v4336_v11  ;;  %v8941_v5 = vld [vmem:[#allocation2 + $0x4c] sm:$0xf]  ;;  %v8863_v31 = vld [vmem:[#allocation8 + $0x198] sm:$0xff]   ;;  %v4250_v3 = vld [vmem:[#allocation2 + $0x48] sm:$0xe]  ;;  %v2709_v42 = vsel %vm10221_vm13, %v7151_v35, %v2708_v23 }
 0x27f   : > { %v2717_v40 = vrot.slane %v2715_v19, 4  ;;  %v2712_v0 = vsel %vm10221_vm13, %v2710_v59, %v2711_v8  ;;  %8124 = vmatprep.subr.bf16.mxu1 %v8862_v12  ;;  %v4346_v24 = vrot.slane %v8941_v5, 5  ;;  %v7254_v38 = vcombine.low %v4340_v45, %v4343_v52  ;;  %v8942_v49 = vld [vmem:[#allocation2 + $0x58] sm:$0xf]  ;;  %v4251_v43 = vld [vmem:[#allocation2 + $0x54] sm:$0xe] }
 0x280   : > { %v4353_v1 = vrot.slane %v8942_v49, 5  ;;  %v2716_v11 = vsel %vm10221_vm13, %v7152_v29, %v2715_v19  ;;  %v7167_v55 = vcombine.low %v2709_v42, %v2712_v0  ;;  %v8943_v59 = vld [vmem:[#allocation2 + $0x50] sm:$0x1]  ;;  %v8944_v45 = vld [vmem:[#allocation2 + $0x58] sm:$0xf]  ;;  %v7240_v0 = vrot.slane %v4251_v43, 9 }
 0x281   : > { %v2719_v20 = vsel %vm10221_vm13, %v2717_v40, %v2718_v32  ;;  %8093 = vmatmul.mubr.bf16.gmra.mrb[4].mxu1 %v7253_v17  ;;  %v4348_v46 = vrot.slane %v4346_v24, 4  ;;  %v4349_v8 = vrot.slane %v8943_v59, 5  ;;  %v2722_v40 = vrot.slane %v8944_v45, 5  ;;  %v8945_v5 = vld [vmem:[#allocation2 + $0x5c] sm:$0x1] }
 0x282   : > { %8096 = vmatprep.mubr.bf16.mxu1 %v7254_v38  ;;  %8125 = vmatpush3.bf16.msra.mxu1 %v8862_v12  ;;  %v4355_v52 = vrot.slane %v4353_v1, 4  ;;  %v7168_v7 = vcombine.low %v2716_v11, %v2719_v20  ;;  %v7239_v32 = vrot.slane %v4250_v3, 9  ;;  %v4356_v17 = vrot.slane %v8945_v5, 5  ;;  %v2611_v49 = vld [vmem:[#allocation2 + $0x54] sm:$0xe] }
 0x283   : > { %8126 = vmatprep.subr.bf16.mxu1 %v8863_v31  ;;  %v8946_v23 = vld [vmem:[#allocation2 + $0x64] sm:$0xf]  ;;  %v4350_v19 = vsel %vm10221_vm13, %v4348_v46, %v4349_v8  ;;  %v2724_v29 = vrot.slane %v2722_v40, 4  ;;  %v2612_v38 = vld [vmem:[#allocation2 + $0x60] sm:$0xe]  ;;  %v4354_v59 = vsel %vm10221_vm13, %v7240_v0, %v4353_v1 }
 0x284   : > { %v2729_v35 = vrot.slane %v8946_v23, 5  ;;  %v4347_v12 = vsel %vm10221_vm13, %v7239_v32, %v4346_v24  ;;  %v4357_v20 = vsel %vm10221_vm13, %v4355_v52, %v4356_v17  ;;  %v8947_v3 = vld [vmem:[#allocation2 + $0x5c] sm:$0x1]  ;;  %v8948_v45 = vld [vmem:[#allocation2 + $0x68] sm:$0x1]  ;;  %v7154_v24 = vrot.slane %v2612_v38, 9 }
 0x285   : > { %7953 = vmatmul.mubr.bf16.gmra.mrb[40].mxu0 %v7167_v55  ;;  %v2725_v42 = vrot.slane %v8947_v3, 5  ;;  %v7153_v55 = vrot.slane %v2611_v49, 9  ;;  %v2732_v5 = vrot.slane %v8948_v45, 5  ;;  %v8949_v46 = vld [vmem:[#allocation2 + $0x64] sm:$0xf]  ;;  %v7255_v8 = vcombine.low %v4347_v12, %v4350_v19 }
 0x286   : > { %7956 = vmatprep.mubr.bf16.mxu0 %v7168_v7  ;;  %v2731_v11 = vrot.slane %v2729_v35, 4  ;;  %v4360_v43 = vrot.slane %v8949_v46, 5  ;;  %8127 = vmatpush3.bf16.msra.mxu1 %v8863_v31  ;;  %v4367_v32 = vrot.slane %v10058_v16, 5  ;;  %v8865_v52 = vld [vmem:[#allocation8 + $0x1a8] sm:$0xff]   ;;  %v7256_v17 = vcombine.low %v4354_v59, %v4357_v20  ;;  %v4253_v0 = vld [vmem:[#allocation2 + $0x6c] sm:$0xe] }
 0x287   : > { %v2726_v7 = vsel %vm10221_vm13, %v2724_v29, %v2725_v42  ;;  %8128 = vmatprep.subr.bf16.mxu1 %v8864_v4  ;;  %v4252_v1 = vld [vmem:[#allocation2 + $0x60] sm:$0xe]  ;;  %v2723_v31 = vsel %vm10221_vm13, %v7153_v55, %v2722_v40  ;;  %v2730_v19 = vsel %vm10221_vm13, %v7154_v24, %v2729_v35  ;;  %v2736_v38 = vrot.slane %v10066_v53, 5  ;;  %v8950_v12 = vld [vmem:[#allocation2 + $0x68] sm:$0x1] }
 0x288   : > { %v2733_v23 = vsel %vm10221_vm13, %v2731_v11, %v2732_v5  ;;  %v4362_v49 = vrot.slane %v4360_v43, 4  ;;  %v4369_v29 = vrot.slane %v4367_v32, 4  ;;  %v7169_v16 = vcombine.low %v2723_v31, %v2726_v7  ;;  %v8951_v3 = vld [vmem:[#allocation2 + $0x74] sm:$0x1]  ;;  %v2613_v11 = vld [vmem:[#allocation2 + $0x6c] sm:$0xe] }
 0x289   : > { %8097 = vmatmul.mubr.bf16.gmra.mrb[8].mxu1 %v7255_v8  ;;  %v4363_v20 = vrot.slane %v8950_v12, 5  ;;  %v4370_v42 = vrot.slane %v8951_v3, 5  ;;  %v2743_v59 = vrot.slane %v10073_v10, 5  ;;  %v7170_v45 = vcombine.low %v2730_v19, %v2733_v23  ;;  %v2614_v55 = vld [vmem:[#allocation2 + $0x78] sm:$0xe]  ;;  %v8866_v35 = vld [vmem:[#allocation8 + $0x1b0] sm:$0xff]  }
 0x28a   : > { %8100 = vmatprep.mubr.bf16.mxu1 %v7256_v17  ;;  %8129 = vmatpush3.bf16.msra.mxu1 %v8864_v4  ;;  %v7241_v5 = vrot.slane %v4252_v1, 9  ;;  %v7242_v46 = vrot.slane %v4253_v0, 9  ;;  %v2738_v40 = vrot.slane %v2736_v38, 4  ;;  %v8952_v7 = vld [vmem:[#allocation2 + $0x74] sm:$0x1]  ;;  %v7155_v23 = vrot.slane %v2613_v11, 9 }
 0x28b   : > { %8130 = vmatprep.subr.bf16.mxu1 %v8865_v52  ;;  %v4364_v53 = vsel %vm10221_vm13, %v4362_v49, %v4363_v20  ;;  %v4371_v8 = vsel %vm10221_vm13, %v4369_v29, %v4370_v42  ;;  %v2739_v24 = vrot.slane %v8952_v7, 5  ;;  %v2745_v17 = vrot.slane %v2743_v59, 4  ;;  %v4254_v19 = vld [vmem:[#allocation2 + $0x78] sm:$0xe]  ;;  %v8867_v3 = vld [vmem:[#allocation8 + $0x1b8] sm:$0xff]  }
 0x28c   : > { %v4361_v4 = vsel %vm10221_vm13, %v7241_v5, %v4360_v43  ;;  %v4368_v10 = vsel %vm10221_vm13, %v7242_v46, %v4367_v32  ;;  %v4374_v1 = vrot.slane %v10084_v48, 5  ;;  %v7156_v49 = vrot.slane %v2614_v55, 9  ;;  %v4255_v32 = vld [vmem:[#allocation2 + $0x84] sm:$0xe] }
 0x28d   : > { %7957 = vmatmul.mubr.bf16.gmra.mrb[44].mxu0 %v7169_v16  ;;  %v2740_v0 = vsel %vm10221_vm13, %v2738_v40, %v2739_v24  ;;  %v2746_v31 = vrot.slane %v10078_v30, 5  ;;  %v4381_v29 = vrot.slane %v10092_v27, 5  ;;  %v7257_v16 = vcombine.low %v4361_v4, %v4364_v53  ;;  %v2615_v30 = vld [vmem:[#allocation2 + $0x84] sm:$0xe]  ;;  %v2616_v53 = vld [vmem:[#allocation2 + $0x90] sm:$0xe] }
 0x28e   : > { %7960 = vmatprep.mubr.bf16.mxu0 %v7170_v45  ;;  %8131 = vmatpush3.bf16.msra.mxu1 %v8865_v52  ;;  %v7258_v12 = vcombine.low %v4368_v10, %v4371_v8  ;;  %v2737_v43 = vsel %vm10221_vm13, %v7155_v23, %v2736_v38  ;;  %v4376_v20 = vrot.slane %v4374_v1, 4  ;;  %v4377_v42 = vrot.slane %v10086_v25, 5 }
 0x28f   : > { %8132 = vmatprep.subr.bf16.mxu1 %v8866_v35  ;;  %v2747_v48 = vsel %vm10221_vm13, %v2745_v17, %v2746_v31  ;;  %v4383_v11 = vrot.slane %v4381_v29, 4  ;;  %v2750_v45 = vrot.slane %v10102_v15, 5  ;;  %v7171_v27 = vcombine.low %v2737_v43, %v2740_v0 }
 0x290   : > { %v2744_v52 = vsel %vm10221_vm13, %v7156_v49, %v2743_v59  ;;  %v7243_v5 = vrot.slane %v4254_v19, 9  ;;  %v2757_v38 = vrot.slane %v10113_v54, 5  ;;  %v4378_v46 = vsel %vm10221_vm13, %v4376_v20, %v4377_v42  ;;  %v10324_v59 = vld [vmem:[#allocation8 + $0x1c0] sm:$0xff]  }
 0x291   : > { %8101 = vmatmul.mubr.bf16.gmra.mrb[12].mxu1 %v7257_v16  ;;  %v7244_v40 = vrot.slane %v4255_v32, 9  ;;  %v4384_v55 = vrot.slane %v10097_v28, 5  ;;  %v2752_v25 = vrot.slane %v2750_v45, 4  ;;  %v7172_v8 = vcombine.low %v2744_v52, %v2747_v48  ;;  %v2618_v48 = vld [vmem:[#allocation2 + $0xa8] sm:$0xe] }
 0x292   : > { %8104 = vmatprep.mubr.bf16.mxu1 %v7258_v12  ;;  %8133 = vmatpush3.bf16.msra.mxu1 %v8866_v35  ;;  %v4375_v15 = vsel %vm10221_vm13, %v7243_v5, %v4374_v1  ;;  %v7157_v7 = vrot.slane %v2615_v30, 9  ;;  %v2759_v24 = vrot.slane %v2757_v38, 4  ;;  %v2753_v17 = vrot.slane %v10109_v6, 5  ;;  %v4256_v1 = vld [vmem:[#allocation2 + $0x90] sm:$0xe] }
 0x293   : > { %8134 = vmatprep.subr.bf16.mxu1 %v8867_v3  ;;  %v4385_v54 = vsel %vm10221_vm13, %v4383_v11, %v4384_v55  ;;  %v2760_v28 = vrot.slane %v10119_v41, 5  ;;  %v4388_v4 = vrot.slane %v10127_v44, 5  ;;  %v7259_v35 = vcombine.low %v4375_v15, %v4378_v46  ;;  %v4257_v44 = vld [vmem:[#allocation2 + $0x9c] sm:$0xe] }
 0x294   : > { %v4382_v10 = vsel %vm10221_vm13, %v7244_v40, %v4381_v29  ;;  %v7158_v23 = vrot.slane %v2616_v53, 9  ;;  %v4395_v0 = vrot.slane %v10136_v47, 5  ;;  %v2751_v49 = vsel %vm10221_vm13, %v7157_v7, %v2750_v45  ;;  %v2617_v12 = vld [vmem:[#allocation2 + $0x9c] sm:$0xe] }
 0x295   : > { %7961 = vmatmul.mubr.bf16.gmra.mrb[48].mxu0 %v7171_v27  ;;  %v2754_v31 = vsel %vm10221_vm13, %v2752_v25, %v2753_v17  ;;  %v2761_v6 = vsel %vm10221_vm13, %v2759_v24, %v2760_v28  ;;  %v4390_v41 = vrot.slane %v4388_v4, 4  ;;  %v7260_v19 = vcombine.low %v4382_v10, %v4385_v54  ;;  %v2619_v54 = vld [vmem:[#allocation2 + $0xb4] sm:$0xe] }
 0x296   : > { %7964 = vmatprep.mubr.bf16.mxu0 %v7172_v8  ;;  %8135 = vmatpush3.bf16.msra.mxu1 %v8867_v3  ;;  %v4391_v16 = vrot.slane %v10130_v34, 5  ;;  %v4397_v29 = vrot.slane %v4395_v0, 4  ;;  %v2764_v43 = vrot.slane %v10150_v18, 5  ;;  %v2758_v47 = vsel %vm10221_vm13, %v7158_v23, %v2757_v38 }
 0x297   : > { %8168 = vmatprep.subr.bf16.mxu1 %v10324_v59  ;;  %v7245_v20 = vrot.slane %v4256_v1, 9  ;;  %v4398_v32 = vrot.slane %v10141_v37, 5  ;;  %v2771_v42 = vrot.slane %v10160_v22, 5  ;;  %v7173_v3 = vcombine.low %v2751_v49, %v2754_v31  ;;  %v4259_v37 = vld [vmem:[#allocation2 + $0xb4] sm:$0xe] }
 0x298   : > { %v7174_v11 = vcombine.low %v2758_v47, %v2761_v6  ;;  %v4392_v34 = vsel %vm10221_vm13, %v4390_v41, %v4391_v16  ;;  %v7246_v30 = vrot.slane %v4257_v44, 9  ;;  %v7159_v27 = vrot.slane %v2617_v12, 9 }
 0x299   : > { %8105 = vmatmul.mubr.bf16.gmra.mrb[16].mxu1 %v7259_v35  ;;  %v4389_v18 = vsel %vm10221_vm13, %v7245_v20, %v4388_v4  ;;  %v4399_v45 = vsel %vm10221_vm13, %v4397_v29, %v4398_v32  ;;  %v2766_v52 = vrot.slane %v2764_v43, 4  ;;  %v7160_v5 = vrot.slane %v2618_v48, 9  ;;  %v8868_v48 = vld [vmem:[#allocation2 + $0x18] sm:$0xff]  }
 0x29a   : > { %8108 = vmatprep.mubr.bf16.mxu1 %v7260_v19  ;;  %v4396_v22 = vsel %vm10221_vm13, %v7246_v30, %v4395_v0  ;;  %v2773_v38 = vrot.slane %v2771_v42, 4  ;;  %v4402_v46 = vrot.slane %v10172_v13, 5  ;;  %v7261_v40 = vcombine.low %v4389_v18, %v4392_v34  ;;  %v8875_v34 = vld [vmem:[#allocation8 + $0x1d0] sm:$0xff]   ;;  %v5131_v30 = vld [vmem:[#allocation2 + $0x1c] sm:$0xf] }
 0x29b   : > { %v2765_v55 = vsel %vm10221_vm13, %v7159_v27, %v2764_v43  ;;  %v2767_v25 = vrot.slane %v10155_v62, 5  ;;  %v4409_v53 = vrot.slane %v10183_v60, 5  ;;  %v7262_v8 = vcombine.low %v4396_v22, %v4399_v45  ;;  %v4260_v62 = vld [vmem:[#allocation2 + $0xc0] sm:$0xe]  ;;  %v5130_v18 = vld [vmem:[#allocation2 + $0x18] sm:$0xf] }
 0x29c   : > { %v2772_v15 = vsel %vm10221_vm13, %v7160_v5, %v2771_v42  ;;  %v2774_v7 = vrot.slane %v10166_v61, 5  ;;  %v7248_v24 = vrot.slane %v4259_v37, 9  ;;  %v4412_v28 = vrot.slane %v10188_v56, 5  ;;  %v4258_v56 = vld [vmem:[#allocation2 + $0xa8] sm:$0xe]  ;;  %v8873_v45 = vld [vmem:[#allocation2 + $0x3c] sm:$0xff]  }
 0x29d   : > { %7965 = vmatmul.mubr.bf16.gmra.mrb[52].mxu0 %v7173_v3  ;;  %v2768_v13 = vsel %vm10221_vm13, %v2766_v52, %v2767_v25  ;;  %v4411_v17 = vrot.slane %v4409_v53, 4  ;;  %v2778_v4 = vrot.slane %v10194_v2, 5  ;;  %v4404_v35 = vrot.slane %v4402_v46, 4  ;;  %v8870_v42 = vld [vmem:[#allocation2 + $0x24] sm:$0xff]   ;;  %v8878_v27 = vld [vmem:[#allocation8 + $0x1d8] sm:$0xff]  }
 0x29e   : > { %7968 = vmatprep.mubr.bf16.mxu0 %v7174_v11  ;;  %v2775_v60 = vsel %vm10221_vm13, %v2773_v38, %v2774_v7  ;;  %v4410_v10 = vsel %vm10221_vm13, %v7248_v24, %v4409_v53  ;;  %v4416_v61 = vrot.slane %v10205_v26, 5  ;;  %v7161_v1 = vrot.slane %v2619_v54, 9  ;;  %v8872_v3 = vld [vmem:[#allocation8 + $0x1c8] sm:$0xff]   ;;  %v8871_v11 = vld [vmem:[#allocation2 + $0x30] sm:$0xff]   ;;  %v8874_v22 = vld [vmem:[#allocation2 + $0x48] sm:$0xff]  }
 0x29f   : > { %v4413_v23 = vsel %vm10221_vm13, %v4411_v17, %v4412_v28  ;;  %v2780_v0 = vrot.slane %v2778_v4, 4  ;;  %v2781_v49 = vrot.slane %v10199_v9, 5  ;;  %v7249_v31 = vrot.slane %v4260_v62, 9  ;;  %v5133_v37 = vld [vmem:[#allocation2 + $0x24] sm:$0xf]  ;;  %v8876_v28 = vld [vmem:[#allocation2 + $0x54] sm:$0xff]  }
 0x2a0   : > { %v7264_v2 = vcombine.low %v4410_v10, %v4413_v23  ;;  %v4418_v6 = vrot.slane %v4416_v61, 4  ;;  %v4419_v41 = vrot.slane %v10213_v21, 5  ;;  %v7175_v44 = vcombine.low %v2765_v55, %v2768_v13  ;;  %v8881_v55 = vld [vmem:[#allocation8 + $0x1e0] sm:$0xff]   ;;  %v5132_v54 = vld [vmem:[#allocation2 + $0x20] sm:$0x1] }
 0x2a1   : > { %8109 = vmatmul.mubr.bf16.gmra.mrb[20].mxu1 %v7261_v40  ;;  %v4405_v19 = vrot.slane %v10177_v36, 5  ;;  %v2779_v26 = vsel %vm10221_vm13, %v7161_v1, %v2778_v4  ;;  %v2782_v16 = vsel %vm10221_vm13, %v2780_v0, %v2781_v49  ;;  %v7176_v29 = vcombine.low %v2772_v15, %v2775_v60  ;;  %v8884_v4 = vld [vmem:[#allocation8 + $0x1e8] sm:$0xff]   ;;  %v10396_v0 = vld [vmem:[#allocation2 + $0x34] sm:$0xf]  ;;  %v5135_v49 = vld [vmem:[#allocation2 + $0x2c] sm:$0x1] }
 0x2a2   : > { %8112 = vmatprep.mubr.bf16.mxu1 %v7262_v8  ;;  %v7177_v12 = vcombine.low %v2779_v26, %v2782_v16  ;;  %v4417_v9 = vsel %vm10221_vm13, %v7249_v31, %v4416_v61  ;;  %v4420_v43 = vsel %vm10221_vm13, %v4418_v6, %v4419_v41  ;;  %v7247_v21 = vrot.slane %v4258_v56, 9  ;;  %v8877_v60 = vld [vmem:[#allocation2 + $0x60] sm:$0xff]   ;;  %v5136_v61 = vld [vmem:[#allocation2 + $0x30] sm:$0xf] }
 0x2a3   : > { %v4406_v47 = vsel %vm10221_vm13, %v4404_v35, %v4405_v19  ;;  %v7265_v36 = vcombine.low %v4417_v9, %v4420_v43  ;;  %v5188_v52 = vshll.u32 %v5131_v30, 16  ;;  %v5179_v5 = vshrl.u32 %v5130_v18, 16  ;;  %v10399_v19 = vld [vmem:[#allocation2 + $0x38] sm:$0x1]  ;;  %v8879_v43 = vld [vmem:[#allocation2 + $0x6c] sm:$0xff]  }
 0x2a4   : > { %v4403_v20 = vsel %vm10221_vm13, %v7247_v21, %v4402_v46  ;;  %v5182_v38 = vshll.u32 %v5130_v18, 16  ;;  %v5134_v46 = vld [vmem:[#allocation2 + $0x28] sm:$0xf]  ;;  %v5206_v40 = vshll.u32 %v5133_v37, 16  ;;  %v5198_v1 = vshll.u32 %v5132_v54, 16 }
 0x2a5   : > { %7969 = vmatmul.mubr.bf16.gmra.mrb[56].mxu0 %v7175_v44  ;;  %v7263_v32 = vcombine.low %v4403_v20, %v4406_v47  ;;  %v10391_v25 = vrot.slane %v5188_v52, 5  ;;  %v5212_v8 = vshll.u32 %v5134_v46, 16  ;;  %v5216_v15 = vshrl.u32 %v5134_v46, 16  ;;  %v10405_v47 = vld [vmem:[#allocation2 + $0x40] sm:$0xf] }
 0x2a6   : > { %7972 = vmatprep.mubr.bf16.mxu0 %v7176_v29  ;;  %v5181_v7 = vrot.slane %v5179_v5, 4  ;;  %v5184_v24 = vrot.slane %v5182_v38, 5  ;;  %v5208_v17 = vrot.slane %v5206_v40, 5  ;;  %v5227_v6 = vshrl.u32 %v5136_v61, 16  ;;  %v5142_v46 = vld [vmem:[#allocation2 + $0x48] sm:$0xf] }
 0x2a7   : > { %v10394_v35 = vrot.slane %v5212_v8, 5  ;;  %v5218_v10 = vrot.slane %v5216_v15, 4  ;;  %v5230_v41 = vshll.u32 %v5136_v61, 16  ;;  %v5236_v26 = vshll.u32 %v10396_v0, 16  ;;  %v5145_v8 = vld [vmem:[#allocation2 + $0x54] sm:$0xf] }
 0x2a8   : > { %v5185_v23 = vor.u32 %v5184_v24, %v5181_v7  ;;  %v5240_v16 = vshrl.u32 %v10396_v0, 16  ;;  %v5222_v9 = vshll.u32 %v5135_v49, 16  ;;  %v10443_v61 = vld [vmem:[#allocation2 + $0x44] sm:$0x1]  ;;  %v5299_v49 = vshrl.u32 %v5145_v8, 16 }
 0x2a9   : > { %8113 = vmatmul.mubr.bf16.gmra.mrb[24].mxu1 %v7263_v32  ;;  %v5219_v44 = vor.u32 %v5218_v10, %v10394_v35  ;;  %v5229_v32 = vrot.slane %v5227_v6, 4  ;;  %v5278_v10 = vshll.u32 %v5142_v46, 16  ;;  %v10450_v6 = vld [vmem:[#allocation2 + $0x64] sm:$0xf] }
 0x2aa   : > { %8116 = vmatprep.mubr.bf16.mxu1 %v7264_v2  ;;  %v8887_v2 = vld [vmem:[#allocation8 + $0x1f0] sm:$0xff]   ;;  %v5186_v29 = vrot.slane %v5185_v23, 4  ;;  %v5242_v18 = vrot.slane %v5240_v16, 4  ;;  %v5224_v52 = vrot.slane %v5222_v9, 5 }
 0x2ad   : > { %7973 = vmatmul.mubr.bf16.gmra.mrb[60].mxu0 %v7177_v12  ;;  %v5200_v12 = vrot.slane %v5198_v1, 5 }
 0x2ae   : > { %8280 = vmatprep.mubr.bf16.mxu0 %v9512_v39  ;;  %v5192_v39 = vshrl.u32 %v5131_v30, 16  ;;  %v10414_v30 = vrot.slane %v5236_v26, 5  ;;  %v8883_v26 = vld [vmem:[#allocation2 + $0x90] sm:$0xff]  }
 0x2b0   : > { %v5194_v53 = vrot.slane %v5192_v39, 4  ;;  %v5139_v39 = vld [vmem:[#allocation2 + $0x3c] sm:$0xf]  ;;  %v5243_v54 = vor.u32 %v5242_v18, %v10414_v30  ;;  %v5332_v18 = vshll.u32 %v10450_v6, 16 }
 0x2b1   : > { %8117 = vmatmul.mubr.bf16.gmra.mrb[28].mxu1 %v7265_v36  ;;  %v8890_v36 = vld [vmem:[#allocation8 + $0x1f8] sm:$0xff]  }
 0x2b2   : > { %8136 = vmatprep.mubr.bf16.mxu1 %v8868_v48  ;;  %v5195_v62 = vor.u32 %v5194_v53, %v10391_v25  ;;  %v5232_v48 = vrot.slane %v5230_v41, 5 }
 0x2b4   : > { %v5196_v31 = vrot.slane %v5195_v62, 4 }
 0x2b6   : > { %v5201_v20 = vsel %vm9977_vm10, %v5196_v31, %v5200_v12 }
 0x2b9   : > { %8137 = vmatmul.mubr.bf16.vlgmr.msra.gmra.mrb[0].mxu1 %v8870_v42  ;;  %v5246_v42 = vshll.u32 %v10399_v19, 16 }
 0x2ba   : > { %8169 = vmatpush3.bf16.msra.mxu1 %v10324_v59  ;;  %8140 = vmatprep.mubr.bf16.mxu1 %v8871_v11  ;;  %v5203_v59 = vshrl.u32 %v5133_v37, 16  ;;  %v8880_v11 = vld [vmem:[#allocation2 + $0x78] sm:$0xff]   ;;  %v5260_v37 = vshll.u32 %v10405_v47, 16 }
 0x2bb   : > { %8170 = vmatprep.subr.bf16.mxu1 %v8872_v3  ;;  %v10433_v53 = vrot.slane %v5246_v42, 5  ;;  %v10457_v42 = vld [vmem:[#allocation2 + $0x5c] sm:$0x1] }
 0x2bc   : > { %v5205_v13 = vrot.slane %v5203_v59, 4  ;;  %v10441_v62 = vrot.slane %v5260_v37, 5  ;;  %v5336_v37 = vshrl.u32 %v10450_v6, 16 }
 0x2be   : > { %8171 = vmatpush3.bf16.msra.mxu1 %v8872_v3  ;;  %v5209_v56 = vor.u32 %v5208_v17, %v5205_v13  ;;  %v10410_v3 = vld [vmem:[#allocation2 + $0x4c] sm:$0xf]  ;;  %v5251_v13 = vshrl.u32 %v5139_v39, 16  ;;  %v5254_v17 = vshll.u32 %v5139_v39, 16 }
 0x2bf   : > { %8172 = vmatprep.subr.bf16.mxu1 %v8875_v34  ;;  %v5284_v59 = vshll.u32 %v10410_v3, 16  ;;  %v5288_v40 = vshrl.u32 %v10410_v3, 16 }
 0x2c0   : > { %v10403_v21 = vrot.slane %v5209_v56, 4  ;;  %v5302_v56 = vshll.u32 %v5145_v8, 16  ;;  %v5253_v12 = vrot.slane %v5251_v13, 4  ;;  %v5256_v9 = vrot.slane %v5254_v17, 5  ;;  %v10472_v13 = vld [vmem:[#allocation2 + $0x70] sm:$0xf] }
 0x2c1   : > { %8141 = vmatmul.mubr.bf16.gmra.mrb[4].mxu1 %v8873_v45  ;;  %v10416_v45 = vld [vmem:[#allocation2 + $0x58] sm:$0xf]  ;;  %v10445_v23 = vrot.slane %v5284_v59, 5  ;;  %v5290_v1 = vrot.slane %v5288_v40, 4 }
 0x2c2   : > { %8144 = vmatprep.mubr.bf16.mxu1 %v8874_v22  ;;  %8173 = vmatpush3.bf16.msra.mxu1 %v8875_v34  ;;  %v10412_v34 = vrot.slane %v5219_v44, 4  ;;  %v5264_v22 = vshrl.u32 %v10405_v47, 16  ;;  %v5215_v38 = vsel %vm9977_vm10, %v10403_v21, %v10394_v35  ;;  %v5308_v15 = vshll.u32 %v10416_v45, 16 }
 0x2c3   : > { %8174 = vmatprep.subr.bf16.mxu1 %v8878_v27  ;;  %v5312_v7 = vshrl.u32 %v10416_v45, 16  ;;  %v5275_v35 = vshrl.u32 %v5142_v46, 16  ;;  %v5270_v21 = vshll.u32 %v10443_v61, 16  ;;  %v5257_v8 = vor.u32 %v5256_v9, %v5253_v12  ;;  %v5154_v12 = vld [vmem:[#allocation2 + $0x78] sm:$0xf] }
 0x2c4   : > { %v5225_v24 = vsel %vm9977_vm10, %v10412_v34, %v5224_v52  ;;  %v5304_v34 = vrot.slane %v5302_v56, 5 }
 0x2c5   : > { %v5314_v31 = vrot.slane %v5312_v7, 4 }
 0x2c6   : > { %8175 = vmatpush3.bf16.msra.mxu1 %v8878_v27  ;;  %v5191_v27 = vsel %vm9977_vm10, %v5186_v29, %v10391_v25  ;;  %v5233_v25 = vor.u32 %v5232_v48, %v5229_v32  ;;  %v5244_v29 = vrot.slane %v5243_v54, 4  ;;  %v5280_v32 = vrot.slane %v5278_v10, 5 }
 0x2c7   : > { %8176 = vmatprep.subr.bf16.mxu1 %v8881_v55  ;;  %v10423_v5 = vcombine.low %v5191_v27, %v5201_v20  ;;  %v5277_v20 = vrot.slane %v5275_v35, 4  ;;  %v5291_v48 = vor.u32 %v5290_v1, %v10445_v23  ;;  %v5318_v54 = vshll.u32 %v10457_v42, 16  ;;  %v8886_v1 = vld [vmem:[#allocation2 + $0xa8] sm:$0xff]  }
 0x2c8   : > { %v5234_v16 = vrot.slane %v5233_v25, 4  ;;  %v5249_v59 = vsel %vm9977_vm10, %v5244_v29, %v10433_v53  ;;  %v5151_v25 = vld [vmem:[#allocation2 + $0x6c] sm:$0xf]  ;;  %v5338_v35 = vrot.slane %v5336_v37, 4  ;;  %v5371_v37 = vshrl.u32 %v5154_v12, 16 }
 0x2c9   : > { %8145 = vmatmul.mubr.bf16.gmra.mrb[8].mxu1 %v8876_v28  ;;  %v5148_v28 = vld [vmem:[#allocation2 + $0x60] sm:$0xf]  ;;  %v5281_v7 = vor.u32 %v5280_v32, %v5277_v20  ;;  %v5347_v10 = vshrl.u32 %v5151_v25, 16  ;;  %v5350_v56 = vshll.u32 %v5151_v25, 16  ;;  %v5320_v29 = vrot.slane %v5318_v54, 5 }
 0x2ca   : > { %8148 = vmatprep.mubr.bf16.mxu1 %v8877_v60  ;;  %8177 = vmatpush3.bf16.msra.mxu1 %v8881_v55  ;;  %v10431_v55 = vld [vmem:[#allocation8 + $0x200] sm:$0xff]   ;;  %v5266_v60 = vrot.slane %v5264_v22, 4  ;;  %v5323_v41 = vshrl.u32 %v5148_v28, 16  ;;  %v5326_v44 = vshll.u32 %v5148_v28, 16  ;;  %v10462_v22 = vcombine.low %v5215_v38, %v5225_v24 }
 0x2cb   : > { %8178 = vmatprep.subr.bf16.mxu1 %v8884_v4  ;;  %v5239_v46 = vsel %vm9977_vm10, %v5234_v16, %v10414_v30  ;;  %v5292_v24 = vrot.slane %v5291_v48, 4  ;;  %v10474_v28 = vrot.slane %v5332_v18, 5  ;;  %v8885_v30 = vld [vmem:[#allocation2 + $0x9c] sm:$0xff]   ;;  %v5282_v16 = vrot.slane %v5281_v7, 4 }
 0x2cc   : > { %v5325_v52 = vrot.slane %v5323_v41, 4  ;;  %v5328_v39 = vrot.slane %v5326_v44, 5  ;;  %v5360_v41 = vshrl.u32 %v10472_v13, 16  ;;  %v10480_v44 = vcombine.low %v5239_v46, %v5249_v59  ;;  %v10487_v32 = vld [vmem:[#allocation2 + $0x7c] sm:$0xf] }
 0x2cd   : > { %v10494_v18 = vrot.slane %v5347_v10, 4  ;;  %v5287_v59 = vsel %vm9977_vm10, %v5282_v16, %v10445_v23  ;;  %v5374_v25 = vshll.u32 %v5154_v12, 16  ;;  %v5896_v10 = vld [vmem:[#allocation2 + $0xa8] sm:$0xe] }
 0x2ce   : > { %8179 = vmatpush3.bf16.msra.mxu1 %v8884_v4  ;;  %v8882_v4 = vld [vmem:[#allocation2 + $0x84] sm:$0xff]   ;;  %v5329_v53 = vor.u32 %v5328_v39, %v5325_v52  ;;  %v10500_v39 = vrot.slane %v5360_v41, 4 }
 0x2cf   : > { %8180 = vmatprep.subr.bf16.mxu1 %v8887_v2  ;;  %v10540_v41 = vrot.slane %v5374_v25, 5 }
 0x2d1   : > { %8149 = vmatmul.mubr.bf16.gmra.mrb[12].mxu1 %v8879_v43  ;;  %v5267_v43 = vor.u32 %v5266_v60, %v10441_v62  ;;  %v10476_v60 = vld [vmem:[#allocation2 + $0x68] sm:$0x1] }
 0x2d2   : > { %8152 = vmatprep.mubr.bf16.mxu1 %v8880_v11  ;;  %8181 = vmatpush3.bf16.msra.mxu1 %v8887_v2  ;;  %v10448_v2 = vrot.slane %v5308_v15, 5  ;;  %v5301_v11 = vrot.slane %v5299_v49, 4  ;;  %v5272_v15 = vrot.slane %v5270_v21, 5  ;;  %v5342_v20 = vshll.u32 %v10476_v60, 16 }
 0x2d3   : > { %8182 = vmatprep.subr.bf16.mxu1 %v8890_v36  ;;  %v5268_v38 = vrot.slane %v5267_v43, 4 }
 0x2d4   : > { %v5315_v27 = vor.u32 %v5314_v31, %v10448_v2  ;;  %v5305_v17 = vor.u32 %v5304_v34, %v5301_v11  ;;  %v5356_v31 = vshll.u32 %v10472_v13, 16  ;;  %v10491_v11 = vrot.slane %v5329_v53, 4 }
 0x2d5   : > { %v5273_v9 = vsel %vm9977_vm10, %v5268_v38, %v5272_v15  ;;  %v5339_v34 = vor.u32 %v5338_v35, %v10474_v28  ;;  %v5384_v38 = vshrl.u32 %v10487_v32, 16  ;;  %v10529_v53 = vrot.slane %v5342_v20, 5  ;;  %v5886_v35 = vld [vmem:[#allocation2 + $0x30] sm:$0xe]  ;;  %v5888_v20 = vld [vmem:[#allocation2 + $0x48] sm:$0xe] }
 0x2d6   : > { %8183 = vmatpush3.bf16.msra.mxu1 %v8890_v36  ;;  %v10454_v36 = vld [vmem:[#allocation2 + $0x50] sm:$0x1]  ;;  %v5306_v21 = vrot.slane %v5305_v17, 4  ;;  %v10498_v52 = vrot.slane %v5356_v31, 5  ;;  %v8889_v17 = vld [vmem:[#allocation2 + $0xc0] sm:$0xff]  }
 0x2d7   : > { %8216 = vmatprep.subr.bf16.mxu1 %v10431_v55  ;;  %v5294_v40 = vshll.u32 %v10454_v36, 16  ;;  %v5887_v31 = vld [vmem:[#allocation2 + $0x3c] sm:$0xe]  ;;  %v10546_v12 = vrot.slane %v5384_v38, 4  ;;  %v8891_v38 = vld [vmem:[#allocation2 + $0xcc] sm:$0xff]  }
 0x2d8   : > { %v5311_v54 = vsel %vm9977_vm10, %v5306_v21, %v10448_v2  ;;  %v5971_v21 = vrot.slane %v10405_v47, 5 }
 0x2d9   : > { %8153 = vmatmul.mubr.bf16.gmra.mrb[16].mxu1 %v8882_v4  ;;  %v5316_v4 = vrot.slane %v5315_v27, 4  ;;  %v5296_v49 = vrot.slane %v5294_v40, 5  ;;  %v10496_v27 = vrot.slane %v5350_v56, 5  ;;  %v10508_v40 = vld [vmem:[#allocation2 + $0x74] sm:$0x1] }
 0x2da   : > { %8156 = vmatprep.mubr.bf16.mxu1 %v8883_v26  ;;  %v5258_v26 = vrot.slane %v5257_v8, 4  ;;  %v5380_v8 = vshll.u32 %v10487_v32, 16  ;;  %v10538_v56 = vld [vmem:[#allocation2 + $0x88] sm:$0xf] }
 0x2db   : > { %v5297_v43 = vsel %vm9977_vm10, %v5292_v24, %v5296_v49  ;;  %v5321_v48 = vsel %vm9977_vm10, %v5316_v4, %v5320_v29  ;;  %v8888_v24 = vld [vmem:[#allocation2 + $0xb4] sm:$0xff]   ;;  %v10527_v4 = vrot.slane %v5339_v34, 4  ;;  %v10536_v49 = vrot.slane %v5371_v37, 4 }
 0x2dc   : > { %v5263_v46 = vsel %vm9977_vm10, %v5258_v26, %v10441_v62  ;;  %v10513_v7 = vcombine.low %v5287_v59, %v5297_v43  ;;  %v10519_v62 = vld [vmem:[#allocation2 + $0x84] sm:$0xf]  ;;  %v10521_v23 = vcombine.low %v5311_v54, %v5321_v48  ;;  %v10542_v26 = vrot.slane %v5380_v8, 5  ;;  %v5889_v59 = vld [vmem:[#allocation2 + $0x54] sm:$0xe] }
 0x2dd   : > { %v10511_v15 = vcombine.low %v5263_v46, %v5273_v9  ;;  %v5964_v29 = vrot.slane %v10396_v0, 5  ;;  %v7324_v43 = vrot.slane %v5886_v35, 9  ;;  %v5967_v37 = vrot.slane %v10399_v19, 5  ;;  %v10633_v48 = vld [vmem:[#allocation2 + $0xa4] sm:$0x1] }
 0x2de   : > { %v7325_v46 = vrot.slane %v5887_v31, 9  ;;  %v5973_v8 = vrot.slane %v5971_v21, 4  ;;  %v5974_v54 = vrot.slane %v10443_v61, 5  ;;  %v7326_v19 = vrot.slane %v5888_v20, 9  ;;  %v8893_v9 = vld [vmem:[#allocation8 + $0x208] sm:$0xff]  }
 0x2df   : > { %v5966_v34 = vrot.slane %v5964_v29, 4  ;;  %v10555_v0 = vsel %vm10221_vm13, %v7324_v43, %v5964_v29  ;;  %v7327_v61 = vrot.slane %v5889_v59, 9  ;;  %v5985_v29 = vrot.slane %v10416_v45, 5  ;;  %v5890_v43 = vld [vmem:[#allocation2 + $0x60] sm:$0xe] }
 0x2e0   : > { %v10571_v31 = vsel %vm10221_vm13, %v5973_v8, %v5974_v54  ;;  %v5988_v59 = vrot.slane %v10457_v42, 5  ;;  %v5992_v45 = vrot.slane %v10450_v6, 5  ;;  %v6006_v35 = vrot.slane %v10487_v32, 5 }
 0x2e1   : > { %8157 = vmatmul.mubr.bf16.gmra.mrb[20].mxu1 %v8885_v30  ;;  %v10560_v47 = vsel %vm10221_vm13, %v5966_v34, %v5967_v37  ;;  %v5891_v37 = vld [vmem:[#allocation2 + $0x6c] sm:$0xe]  ;;  %v5987_v8 = vrot.slane %v5985_v29, 4  ;;  %v5892_v34 = vld [vmem:[#allocation2 + $0x78] sm:$0xe] }
 0x2e2   : > { %8160 = vmatprep.mubr.bf16.mxu1 %v8886_v1  ;;  %v5994_v6 = vrot.slane %v5992_v45, 4 }
 0x2e3   : > { %v10598_v42 = vsel %vm10221_vm13, %v5987_v8, %v5988_v59  ;;  %v10613_v8 = vld [vmem:[#allocation2 + $0x98] sm:$0x1] }
 0x2e4   : > { %11206 = vst [vmem:[#allocation31_spill] sm:$0xff] %v10598_v42  ;;  %v6023_v1 = vrot.slane %v10613_v8, 5  ;;  %v10718_v42 = vld [vmem:[#allocation2 + $0xd4] sm:$0x1] }
 0x2e9   : > { %8161 = vmatmul.mubr.bf16.gmra.mrb[24].mxu1 %v8888_v24  ;;  %v10564_v24 = vsel %vm10221_vm13, %v7325_v46, %v5971_v21  ;;  %v10583_v46 = vsel %vm10221_vm13, %v7327_v61, %v5985_v29  ;;  %v5893_v29 = vld [vmem:[#allocation2 + $0x84] sm:$0xe]  ;;  %v10611_v61 = vld [vmem:[#allocation2 + $0x94] sm:$0xf] }
 0x2ea   : > { %8164 = vmatprep.mubr.bf16.mxu1 %v8889_v17  ;;  %v5978_v17 = vrot.slane %v10410_v3, 5  ;;  %v5981_v3 = vrot.slane %v10454_v36, 5  ;;  %11204 = vst [vmem:[#allocation29_spill] sm:$0xff] %v10583_v46  ;;  %v5999_v36 = vrot.slane %v10472_v13, 5  ;;  %v7330_v13 = vrot.slane %v5892_v34, 9 }
 0x2eb   : > { %v7331_v25 = vrot.slane %v5893_v29, 9  ;;  %v6020_v34 = vrot.slane %v10611_v61, 5 }
 0x2ec   : > { %v10578_v21 = vsel %vm10221_vm13, %v7326_v19, %v5978_v17  ;;  %v5980_v20 = vrot.slane %v5978_v17, 4  ;;  %v7328_v19 = vrot.slane %v5890_v43, 9  ;;  %v5995_v17 = vrot.slane %v10476_v60, 5  ;;  %v10602_v43 = vld [vmem:[#allocation2 + $0x8c] sm:$0x1] }
 0x2ed   : > { %v6001_v60 = vrot.slane %v5999_v36, 4  ;;  %v10639_v32 = vsel %vm10221_vm13, %v7330_v13, %v6006_v35  ;;  %v6016_v16 = vrot.slane %v10602_v43, 5 }
 0x2ee   : > { %v10589_v54 = vsel %vm10221_vm13, %v5980_v20, %v5981_v3  ;;  %v10600_v20 = vld [vmem:[#allocation2 + $0x80] sm:$0x1]  ;;  %v6002_v3 = vrot.slane %v10508_v40, 5  ;;  %11211 = vst [vmem:[#allocation36_spill] sm:$0xff] %v10639_v32 }
 0x2ef   : > { %11205 = vst [vmem:[#allocation30_spill] sm:$0xff] %v10589_v54 }
 0x2f0   : > { %v10630_v30 = vsel %vm10221_vm13, %v6001_v60, %v6002_v3  ;;  %v10642_v60 = vld [vmem:[#allocation2 + $0xac] sm:$0xf] }
 0x2f1   : > { %8165 = vmatmul.mubr.bf16.gmra.mrb[28].mxu1 %v8891_v38  ;;  %v7329_v38 = vrot.slane %v5891_v37, 9  ;;  %v10617_v37 = vsel %vm10221_vm13, %v5994_v6, %v5995_v17  ;;  %11210 = vst [vmem:[#allocation35_spill] sm:$0xff] %v10630_v30  ;;  %v6013_v17 = vrot.slane %v10538_v56, 5  ;;  %v5894_v6 = vld [vmem:[#allocation2 + $0x90] sm:$0xe] }
 0x2f2   : > { %8184 = vmatprep.mubr.bf16.mxu1 %v10423_v5  ;;  %v10608_v5 = vsel %vm10221_vm13, %v7328_v19, %v5992_v45  ;;  %11208 = vst [vmem:[#allocation33_spill] sm:$0xff] %v10617_v37  ;;  %v10624_v45 = vld [vmem:[#allocation2 + $0xa0] sm:$0xf]  ;;  %v5895_v19 = vld [vmem:[#allocation2 + $0x9c] sm:$0xe] }
 0x2f3   : > { %11207 = vst [vmem:[#allocation32_spill] sm:$0xff] %v10608_v5  ;;  %v10621_v59 = vsel %vm10221_vm13, %v7329_v38, %v5999_v36  ;;  %v6008_v36 = vrot.slane %v6006_v35, 4  ;;  %v6009_v38 = vrot.slane %v10600_v20, 5  ;;  %v10646_v29 = vsel %vm10221_vm13, %v7331_v25, %v6013_v17  ;;  %v10657_v30 = vld [vmem:[#allocation2 + $0xb8] sm:$0xf] }
 0x2f4   : > { %11209 = vst [vmem:[#allocation34_spill] sm:$0xff] %v10621_v59  ;;  %11212 = vst [vmem:[#allocation37_spill] sm:$0xff] %v10646_v29  ;;  %v6015_v3 = vrot.slane %v6013_v17, 4  ;;  %v7332_v35 = vrot.slane %v5894_v6, 9  ;;  %v6027_v2 = vrot.slane %v10624_v45, 5  ;;  %v6022_v59 = vrot.slane %v6020_v34, 4 }
 0x2f5   : > { %v10652_v13 = vsel %vm10221_vm13, %v6008_v36, %v6009_v38  ;;  %v7333_v36 = vrot.slane %v5895_v19, 9  ;;  %v5897_v38 = vld [vmem:[#allocation2 + $0xb4] sm:$0xe]  ;;  %v10667_v6 = vld [vmem:[#allocation2 + $0xb0] sm:$0x1]  ;;  %v8894_v19 = vld [vmem:[#allocation8 + $0x210] sm:$0xff]  }
 0x2f6   : > { %11213 = vst [vmem:[#allocation38_spill] sm:$0xff] %v10652_v13  ;;  %v10663_v17 = vsel %vm10221_vm13, %v6015_v3, %v6016_v16  ;;  %v10669_v37 = vld [vmem:[#allocation2 + $0xbc] sm:$0x1]  ;;  %v10675_v25 = vsel %vm10221_vm13, %v7332_v35, %v6020_v34  ;;  %v6029_v16 = vrot.slane %v6027_v2, 4  ;;  %v6030_v3 = vrot.slane %v10633_v48, 5  ;;  %v11235_v50 = vld [vmem:[#allocation30_spill] sm:$0xff] }
 0x2f7   : > { %11214 = vst [vmem:[#allocation39_spill] sm:$0xff] %v10663_v17  ;;  %11215 = vst [vmem:[#allocation40_spill] sm:$0xff] %v10675_v25  ;;  %v10678_v13 = vld [vmem:[#allocation2 + $0xc4] sm:$0xf]  ;;  %v6034_v17 = vrot.slane %v10642_v60, 5  ;;  %v7335_v29 = vrot.slane %v5897_v38, 9 }
 0x2f8   : > { %v10693_v35 = vsel %vm10221_vm13, %v6029_v16, %v6030_v3  ;;  %v6041_v32 = vrot.slane %v10657_v30, 5  ;;  %v5898_v5 = vld [vmem:[#allocation2 + $0xc0] sm:$0xe]  ;;  %v6037_v34 = vrot.slane %v10667_v6, 5  ;;  %v10705_v16 = vld [vmem:[#allocation2 + $0xd0] sm:$0xf] }
 0x2f9   : > { %8185 = vmatmul.mubr.bf16.vlgmr.msra.gmra.mrb[0].mxu1 %v10462_v22  ;;  %v7334_v22 = vrot.slane %v5896_v10, 9  ;;  %11218 = vst [vmem:[#allocation43_spill] sm:$0xff] %v10693_v35  ;;  %v6048_v25 = vrot.slane %v10678_v13, 5  ;;  %v5160_v35 = vld [vmem:[#allocation2 + $0x90] sm:$0xf] }
 0x2fa   : > { %8217 = vmatpush3.bf16.msra.mxu1 %v10431_v55  ;;  %8188 = vmatprep.mubr.bf16.mxu1 %v10480_v44  ;;  %v10682_v55 = vsel %vm10221_vm13, %v6022_v59, %v6023_v1  ;;  %v10686_v44 = vsel %vm10221_vm13, %v7333_v36, %v6027_v2  ;;  %v5899_v1 = vld [vmem:[#allocation2 + $0xcc] sm:$0xe]  ;;  %v10696_v59 = vld [vmem:[#allocation2 + $0xc8] sm:$0x1]  ;;  %v6036_v36 = vrot.slane %v6034_v17, 4  ;;  %v10709_v38 = vsel %vm10221_vm13, %v7335_v29, %v6041_v32  ;;  %v8895_v2 = vld [vmem:[#allocation8 + $0x218] sm:$0xff]  }
 0x2fb   : > { %8218 = vmatprep.subr.bf16.mxu1 %v8893_v9  ;;  %11216 = vst [vmem:[#allocation41_spill] sm:$0xff] %v10682_v55  ;;  %11217 = vst [vmem:[#allocation42_spill] sm:$0xff] %v10686_v44  ;;  %v10702_v10 = vsel %vm10221_vm13, %v7334_v22, %v6034_v17  ;;  %v6043_v3 = vrot.slane %v6041_v32, 4  ;;  %v6044_v55 = vrot.slane %v10669_v37, 5  ;;  %v7336_v22 = vrot.slane %v5898_v5, 9  ;;  %v8896_v5 = vld [vmem:[#allocation8 + $0x220] sm:$0xff]  }
 0x2fc   : > { %v10715_v17 = vsel %vm10221_vm13, %v6036_v36, %v6037_v34  ;;  %v6055_v44 = vrot.slane %v10705_v16, 5  ;;  %v6050_v46 = vrot.slane %v6048_v25, 4  ;;  %v6051_v54 = vrot.slane %v10696_v59, 5 }
 0x2fd   : > { %v10724_v29 = vsel %vm10221_vm13, %v6043_v3, %v6044_v55  ;;  %v6058_v36 = vrot.slane %v10718_v42, 5  ;;  %v5419_v55 = vshrl.u32 %v5160_v35, 16  ;;  %v5422_v3 = vshll.u32 %v5160_v35, 16  ;;  %v8900_v35 = vld [vmem:[#allocation11] sm:$0xff]  }
 0x2fe   : > { %8219 = vmatpush3.bf16.msra.mxu1 %v8893_v9  ;;  %v7337_v9 = vrot.slane %v5899_v1, 9  ;;  %v6057_v1 = vrot.slane %v6055_v44, 4  ;;  %v10738_v32 = vsel %vm10221_vm13, %v7336_v22, %v6048_v25  ;;  %v8901_v25 = vld [vmem:[#allocation11 + $0x8] sm:$0xff]   ;;  %8264 = vmatprep.subr.bf16.mxu0 %v8900_v35 }
 0x2ff   : > { %8220 = vmatprep.subr.bf16.mxu1 %v8894_v19  ;;  %11219 = vst [vmem:[#allocation44_spill] sm:$0xff] %v10738_v32  ;;  %8265 = vmatpush3.bf16.msra.mxu0 %v8900_v35 }
 0x300   : > { %v10732_v34 = vsel %vm10221_vm13, %v7337_v9, %v6055_v44  ;;  %v5428_v9 = vshll.u32 %v10611_v61, 16  ;;  %v5432_v44 = vshrl.u32 %v10611_v61, 16  ;;  %v5377_v61 = vor.u32 %v10540_v41, %v10536_v49  ;;  %8266 = vmatprep.subr.bf16.mxu0 %v8901_v25 }
 0x301   : > { %8189 = vmatmul.mubr.bf16.gmra.mrb[4].mxu1 %v10511_v15  ;;  %v10742_v15 = vsel %vm10221_vm13, %v6050_v46, %v6051_v54  ;;  %v5345_v46 = vsel %vm9977_vm10, %v10527_v4, %v10529_v53  ;;  %v11222_v54 = vor.u32 %v10500_v39, %v10498_v52  ;;  %v5387_v4 = vor.u32 %v10546_v12, %v10542_v26 }
 0x302   : > { %8192 = vmatprep.mubr.bf16.mxu1 %v10513_v7  ;;  %8221 = vmatpush3.bf16.msra.mxu1 %v8894_v19  ;;  %11220 = vst [vmem:[#allocation45_spill] sm:$0xff] %v10742_v15  ;;  %v10750_v19 = vsel %vm10221_vm13, %v6057_v1, %v6058_v36  ;;  %v11223_v1 = vor.u32 %v10496_v27, %v10494_v18  ;;  %v11224_v15 = vshll.u32 %v10508_v40, 16  ;;  %v5390_v53 = vshll.u32 %v10600_v20, 16 }
 0x303   : > { %8222 = vmatprep.subr.bf16.mxu1 %v8895_v2  ;;  %11221 = vst [vmem:[#allocation46_spill] sm:$0xff] %v10750_v19  ;;  %v5364_v22 = vrot.slane %v11222_v54, 4  ;;  %v11225_v39 = vshrl.u32 %v10519_v62, 16  ;;  %v11226_v41 = vshll.u32 %v10519_v62, 16  ;;  %v11227_v7 = vshll.u32 %v10538_v56, 16  ;;  %v8897_v19 = vld [vmem:[#allocation8 + $0x228] sm:$0xff]   ;;  %8267 = vmatpush3.bf16.msra.mxu0 %v8901_v25 }
 0x304   : > { %v5354_v36 = vrot.slane %v11223_v1, 4  ;;  %v5368_v32 = vrot.slane %v11224_v15, 5  ;;  %v11228_v27 = vshrl.u32 %v10538_v56, 16  ;;  %v5163_v15 = vld [vmem:[#allocation2 + $0x9c] sm:$0xf]  ;;  %v5421_v12 = vrot.slane %v5419_v55, 4 }
 0x305   : > { %v5397_v49 = vrot.slane %v11225_v39, 4  ;;  %v5400_v54 = vrot.slane %v11226_v41, 5  ;;  %v10777_v18 = vrot.slane %v11227_v7, 5  ;;  %v5424_v20 = vrot.slane %v5422_v3, 5  ;;  %v8902_v41 = vld [vmem:[#allocation11 + $0x10] sm:$0xff]  }
 0x306   : > { %8223 = vmatpush3.bf16.msra.mxu1 %v8895_v2  ;;  %v5410_v40 = vrot.slane %v11228_v27, 4  ;;  %v10781_v1 = vrot.slane %v5428_v9, 5  ;;  %v5434_v2 = vrot.slane %v5432_v44, 4  ;;  %v11229_v62 = vsel %vm9977_vm10, %v10491_v11, %v10474_v28  ;;  %8268 = vmatprep.subr.bf16.mxu0 %v8902_v41 }
 0x307   : > { %8224 = vmatprep.subr.bf16.mxu1 %v8896_v5  ;;  %v7304_v7 = vcombine.low %v11229_v62, %v5345_v46  ;;  %v5369_v56 = vsel %vm9977_vm10, %v5364_v22, %v5368_v32  ;;  %v5378_v39 = vrot.slane %v5377_v61, 4  ;;  %v5359_v55 = vsel %vm9977_vm10, %v5354_v36, %v10498_v52  ;;  %v8898_v22 = vld [vmem:[#allocation8 + $0x230] sm:$0xff]   ;;  %v8899_v62 = vld [vmem:[#allocation8 + $0x238] sm:$0xff]   ;;  %8269 = vmatpush3.bf16.msra.mxu0 %v8902_v41 }
 0x308   : > { %v5388_v3 = vrot.slane %v5387_v4, 4  ;;  %v5401_v9 = vor.u32 %v5400_v54, %v5397_v49  ;;  %v5411_v44 = vor.u32 %v5410_v40, %v10777_v18  ;;  %v5443_v35 = vshrl.u32 %v5163_v15, 16  ;;  %v5166_v36 = vld [vmem:[#allocation2 + $0xa8] sm:$0xf]  ;;  %v8903_v4 = vld [vmem:[#allocation11 + $0x18] sm:$0xff]  }
 0x309   : > { %8193 = vmatmul.mubr.bf16.gmra.mrb[8].mxu1 %v10521_v23  ;;  %v5446_v28 = vshll.u32 %v5163_v15, 16  ;;  %v7305_v11 = vcombine.low %v5359_v55, %v5369_v56  ;;  %v5392_v46 = vrot.slane %v5390_v53, 5  ;;  %v5425_v27 = vor.u32 %v5424_v20, %v5421_v12  ;;  %8270 = vmatprep.subr.bf16.mxu0 %v8903_v4  ;;  %v8904_v55 = vld [vmem:[#allocation11 + $0x20] sm:$0xff]  }
 0x30a   : > { %8196 = vmatprep.mubr.bf16.mxu1 %v7304_v7  ;;  %8225 = vmatpush3.bf16.msra.mxu1 %v8896_v5  ;;  %v5435_v32 = vor.u32 %v5434_v2, %v10781_v1  ;;  %v5383_v52 = vsel %vm9977_vm10, %v5378_v39, %v10542_v26  ;;  %v5414_v23 = vshll.u32 %v10602_v43, 16  ;;  %v5452_v61 = vshll.u32 %v10624_v45, 16 }
 0x30b   : > { %8226 = vmatprep.subr.bf16.mxu1 %v8897_v19  ;;  %v5456_v5 = vshrl.u32 %v10624_v45, 16  ;;  %v5393_v53 = vsel %vm9977_vm10, %v5388_v3, %v5392_v46  ;;  %v5438_v49 = vshll.u32 %v10613_v8, 16  ;;  %v5476_v25 = vshll.u32 %v10642_v60, 16  ;;  %8271 = vmatpush3.bf16.msra.mxu0 %v8903_v4 }
 0x30c   : > { %v5480_v54 = vshrl.u32 %v10642_v60, 16  ;;  %v5402_v40 = vrot.slane %v5401_v9, 4  ;;  %v5412_v26 = vrot.slane %v5411_v44, 4  ;;  %v5445_v15 = vrot.slane %v5443_v35, 4  ;;  %8272 = vmatprep.subr.bf16.mxu0 %v8904_v55 }
 0x30d   : > { %v5448_v43 = vrot.slane %v5446_v28, 5  ;;  %v5426_v12 = vrot.slane %v5425_v27, 4  ;;  %v5436_v20 = vrot.slane %v5435_v32, 4  ;;  %v5467_v45 = vshrl.u32 %v5166_v36, 16 }
 0x30e   : > { %8227 = vmatpush3.bf16.msra.mxu1 %v8897_v19  ;;  %v5470_v2 = vshll.u32 %v5166_v36, 16  ;;  %v7306_v7 = vcombine.low %v5383_v52, %v5393_v53  ;;  %v5416_v56 = vrot.slane %v5414_v23, 5  ;;  %v10807_v39 = vrot.slane %v5452_v61, 5  ;;  %v5169_v19 = vld [vmem:[#allocation2 + $0xb4] sm:$0xf] }
 0x30f   : > { %8228 = vmatprep.subr.bf16.mxu1 %v8898_v22  ;;  %v5458_v8 = vrot.slane %v5456_v5, 4  ;;  %v5440_v60 = vrot.slane %v5438_v49, 5  ;;  %v10809_v3 = vrot.slane %v5476_v25, 5  ;;  %v5482_v9 = vrot.slane %v5480_v54, 4  ;;  %8273 = vmatpush3.bf16.msra.mxu0 %v8904_v55 }
 0x310   : > { %v5407_v44 = vsel %vm9977_vm10, %v5402_v40, %v10777_v18  ;;  %v5417_v41 = vsel %vm9977_vm10, %v5412_v26, %v5416_v56  ;;  %v5449_v35 = vor.u32 %v5448_v43, %v5445_v15  ;;  %v5462_v28 = vshll.u32 %v10633_v48, 16  ;;  %v5172_v48 = vld [vmem:[#allocation2 + $0xc0] sm:$0xf]  ;;  %v5175_v43 = vld [vmem:[#allocation2 + $0xcc] sm:$0xf] }
 0x311   : > { %8197 = vmatmul.mubr.bf16.gmra.mrb[12].mxu1 %v7305_v11  ;;  %v5431_v11 = vsel %vm9977_vm10, %v5426_v12, %v10781_v1  ;;  %v5441_v46 = vsel %vm9977_vm10, %v5436_v20, %v5440_v60  ;;  %v5469_v27 = vrot.slane %v5467_v45, 4  ;;  %v5472_v32 = vrot.slane %v5470_v2, 5 }
 0x312   : > { %8200 = vmatprep.mubr.bf16.mxu1 %v7306_v7  ;;  %8229 = vmatpush3.bf16.msra.mxu1 %v8898_v22  ;;  %v5459_v18 = vor.u32 %v5458_v8, %v10807_v39  ;;  %v5491_v52 = vshrl.u32 %v5169_v19, 16  ;;  %v5500_v23 = vshll.u32 %v10657_v30, 16  ;;  %v5504_v61 = vshrl.u32 %v10657_v30, 16  ;;  %v8905_v22 = vld [vmem:[#allocation11 + $0x28] sm:$0xff]   ;;  %v8906_v7 = vld [vmem:[#allocation11 + $0x30] sm:$0xff]  }
 0x313   : > { %8230 = vmatprep.subr.bf16.mxu1 %v8899_v62  ;;  %v5483_v5 = vor.u32 %v5482_v9, %v10809_v3  ;;  %v5494_v1 = vshll.u32 %v5169_v19, 16  ;;  %v5524_v36 = vshll.u32 %v10678_v13, 16  ;;  %v5528_v53 = vshrl.u32 %v10678_v13, 16  ;;  %8274 = vmatprep.subr.bf16.mxu0 %v8905_v22 }
 0x314   : > { %v7307_v49 = vcombine.low %v5407_v44, %v5417_v41  ;;  %v7308_v25 = vcombine.low %v5431_v11, %v5441_v46  ;;  %v5450_v4 = vrot.slane %v5449_v35, 4  ;;  %v5464_v54 = vrot.slane %v5462_v28, 5  ;;  %8275 = vmatpush3.bf16.msra.mxu0 %v8905_v22 }
 0x315   : > { %v5473_v40 = vor.u32 %v5472_v32, %v5469_v27  ;;  %v5486_v26 = vshll.u32 %v10667_v6, 16  ;;  %v5515_v15 = vshrl.u32 %v5172_v48, 16  ;;  %v5518_v30 = vshll.u32 %v5172_v48, 16  ;;  %8276 = vmatprep.subr.bf16.mxu0 %v8906_v7  ;;  %v8907_v27 = vld [vmem:[#allocation11 + $0x38] sm:$0xff]  }
 0x316   : > { %8231 = vmatpush3.bf16.msra.mxu1 %v8899_v62  ;;  %v5460_v12 = vrot.slane %v5459_v18, 4  ;;  %v5493_v20 = vrot.slane %v5491_v52, 4  ;;  %v10829_v45 = vrot.slane %v5500_v23, 5  ;;  %v5506_v2 = vrot.slane %v5504_v61, 4 }
 0x317   : > { %v5484_v13 = vrot.slane %v5483_v5, 4  ;;  %v5496_v56 = vrot.slane %v5494_v1, 5  ;;  %v5526_v8 = vrot.slane %v5524_v36, 5  ;;  %v5530_v60 = vrot.slane %v5528_v53, 4 }
 0x318   : > { %v5539_v62 = vshrl.u32 %v5175_v43, 16  ;;  %v5542_v9 = vshll.u32 %v5175_v43, 16  ;;  %v5548_v6 = vshll.u32 %v10705_v16, 16  ;;  %v5552_v19 = vshrl.u32 %v10705_v16, 16  ;;  %8277 = vmatpush3.bf16.msra.mxu0 %v8906_v7 }
 0x319   : > { %8201 = vmatmul.mubr.bf16.gmra.mrb[16].mxu1 %v7307_v49  ;;  %v5474_v55 = vrot.slane %v5473_v40, 4  ;;  %v5488_v44 = vrot.slane %v5486_v26, 5  ;;  %v5517_v41 = vrot.slane %v5515_v15, 4  ;;  %v5520_v35 = vrot.slane %v5518_v30, 5  ;;  %8278 = vmatprep.subr.bf16.mxu0 %v8907_v27 }
 0x31a   : > { %8204 = vmatprep.mubr.bf16.mxu1 %v7308_v25  ;;  %v5455_v28 = vsel %vm9977_vm10, %v5450_v4, %v10807_v39  ;;  %v5465_v11 = vsel %vm9977_vm10, %v5460_v12, %v5464_v54  ;;  %v5507_v46 = vor.u32 %v5506_v2, %v10829_v45  ;;  %v5497_v16 = vor.u32 %v5496_v56, %v5493_v20  ;;  %v8908_v25 = vld [vmem:[#allocation9] sm:$0xff]  }
 0x31b   : > { %v5489_v32 = vsel %vm9977_vm10, %v5484_v13, %v5488_v44  ;;  %v5510_v18 = vshll.u32 %v10669_v37, 16  ;;  %v5531_v52 = vor.u32 %v5530_v60, %v5526_v8  ;;  %v5541_v23 = vrot.slane %v5539_v62, 4  ;;  %v8953_v20 = vld [vmem:[#allocation2 + $0x1c] sm:$0xf]  ;;  %v8954_v44 = vld [vmem:[#allocation2 + $0x20] sm:$0x1] }
 0x31c   : > { %v5544_v61 = vrot.slane %v5542_v9, 5  ;;  %v5550_v48 = vrot.slane %v5548_v6, 5  ;;  %v5554_v22 = vrot.slane %v5552_v19, 4  ;;  %v7309_v5 = vcombine.low %v5455_v28, %v5465_v11  ;;  %8279 = vmatpush3.bf16.msra.mxu0 %v8907_v27  ;;  %v8910_v6 = vld [vmem:[#allocation9 + $0x10] sm:$0xff]  }
 0x31d   : > { %v5479_v39 = vsel %vm9977_vm10, %v5474_v55, %v10809_v3  ;;  %v5521_v1 = vor.u32 %v5520_v35, %v5517_v41  ;;  %v5534_v36 = vshll.u32 %v10696_v59, 16  ;;  %v5508_v49 = vrot.slane %v5507_v46, 4  ;;  %8312 = vmatprep.subr.bf16.mxu0 %v8908_v25  ;;  %v8909_v3 = vld [vmem:[#allocation9 + $0x8] sm:$0xff]  }
 0x31e   : > { %v7310_v53 = vcombine.low %v5479_v39, %v5489_v32  ;;  %v5512_v37 = vrot.slane %v5510_v18, 5  ;;  %v5532_v4 = vrot.slane %v5531_v52, 4  ;;  %v5498_v54 = vrot.slane %v5497_v16, 4  ;;  %v8912_v16 = vld [vmem:[#allocation9 + $0x20] sm:$0xff]   ;;  %v5885_v18 = vld [vmem:[#allocation2 + $0x24] sm:$0xe] }
 0x31f   : > { %v5545_v40 = vor.u32 %v5544_v61, %v5541_v23  ;;  %v5555_v26 = vor.u32 %v5554_v22, %v5550_v48  ;;  %v5558_v15 = vshll.u32 %v10718_v42, 16  ;;  %v5522_v30 = vrot.slane %v5521_v1, 4  ;;  %8281 = vmatmul.mubr.bf16.vlgmr.msra.gmra.mrb[64].mxu0 %v9554_v14  ;;  %v5884_v14 = vld [vmem:[#allocation2 + $0x18] sm:$0xe]  ;;  %v8956_v52 = vld [vmem:[#allocation2 + $0x2c] sm:$0x1] }
 0x320   : > { %v5536_v43 = vrot.slane %v5534_v36, 5  ;;  %v5513_v59 = vsel %vm9977_vm10, %v5508_v49, %v5512_v37  ;;  %v5950_v2 = vrot.slane %v8953_v20, 5  ;;  %v5503_v7 = vsel %vm9977_vm10, %v5498_v54, %v10829_v45  ;;  %8313 = vmatpush3.bf16.msra.mxu0 %v8908_v25  ;;  %8284 = vmatprep.mubr.bf16.mxu0 %v9572_v33  ;;  %v8911_v33 = vld [vmem:[#allocation9 + $0x18] sm:$0xff]   ;;  %v8914_v39 = vld [vmem:[#allocation9 + $0x30] sm:$0xff]   ;;  %v11237_v25 = vld [vmem:[#allocation24_spill] sm:$0xff] }
 0x321   : > { %8205 = vmatmul.mubr.bf16.gmra.mrb[20].mxu1 %v7309_v5  ;;  %v5546_v13 = vrot.slane %v5545_v40, 4  ;;  %v5556_v56 = vrot.slane %v5555_v26, 4  ;;  %v5560_v42 = vrot.slane %v5558_v15, 5  ;;  %v7311_v60 = vcombine.low %v5503_v7, %v5513_v59  ;;  %8314 = vmatprep.subr.bf16.mxu0 %v8909_v3  ;;  %v11230_v5 = vld [vmem:[#allocation20_spill] sm:$0xff]  ;;  %v11232_v36 = vld [vmem:[#allocation22_spill] sm:$0xff]  ;;  %v11240_v54 = vld [vmem:[#allocation31_spill] sm:$0xff] }
 0x322   : > { %8208 = vmatprep.mubr.bf16.mxu1 %v7310_v53  ;;  %v5537_v12 = vsel %vm9977_vm10, %v5532_v4, %v5536_v43  ;;  %v5527_v62 = vsel %vm9977_vm10, %v5522_v30, %v5526_v8  ;;  %v5952_v19 = vrot.slane %v5950_v2, 4  ;;  %v5953_v41 = vrot.slane %v8954_v44, 5  ;;  %v8955_v8 = vld [vmem:[#allocation2 + $0x28] sm:$0xf]  ;;  %v11233_v53 = vld [vmem:[#allocation23_spill] sm:$0xff]  ;;  %v11242_v15 = vld [vmem:[#allocation32_spill] sm:$0xff] }
 0x323   : > { %v7312_v9 = vcombine.low %v5527_v62, %v5537_v12  ;;  %v5551_v45 = vsel %vm9977_vm10, %v5546_v13, %v5550_v48  ;;  %v5561_v55 = vsel %vm9977_vm10, %v5556_v56, %v5560_v42  ;;  %v5957_v35 = vrot.slane %v8955_v8, 5  ;;  %v8913_v48 = vld [vmem:[#allocation9 + $0x28] sm:$0xff]   ;;  %v11239_v4 = vld [vmem:[#allocation29_spill] sm:$0xff]  ;;  %v11246_v59 = vld [vmem:[#allocation27_spill] sm:$0xff] }
 0x324   : > { %8315 = vmatpush3.bf16.msra.mxu0 %v8909_v3  ;;  %v7313_v28 = vcombine.low %v5551_v45, %v5561_v55  ;;  %v7322_v11 = vrot.slane %v5884_v14, 9  ;;  %v5954_v46 = vsel %vm10221_vm13, %v5952_v19, %v5953_v41  ;;  %v5960_v23 = vrot.slane %v8956_v52, 5  ;;  %v11243_v30 = vld [vmem:[#allocation33_spill] sm:$0xff]  ;;  %v11247_v12 = vld [vmem:[#allocation34_spill] sm:$0xff]  ;;  %v11248_v20 = vld [vmem:[#allocation35_spill] sm:$0xff] }
 0x325   : > { %8316 = vmatprep.subr.bf16.mxu0 %v8910_v6  ;;  %v5959_v32 = vrot.slane %v5957_v35, 4  ;;  %v7323_v61 = vrot.slane %v5885_v18, 9  ;;  %v11231_v1 = vcombine.low %v10555_v0, %v10560_v47  ;;  %v11236_v49 = vcombine.low %v10578_v21, %v11235_v50  ;;  %v11238_v0 = vld [vmem:[#allocation25_spill] sm:$0xff]  ;;  %v11250_v13 = vld [vmem:[#allocation36_spill] sm:$0xff]  ;;  %v11251_v56 = vld [vmem:[#allocation38_spill] sm:$0xff] }
 0x326   : > { %v5951_v27 = vsel %vm10221_vm13, %v7322_v11, %v5950_v2  ;;  %v11241_v40 = vcombine.low %v11239_v4, %v11240_v54  ;;  %v11244_v43 = vcombine.low %v11242_v15, %v11243_v30  ;;  %v11249_v2 = vcombine.low %v11247_v12, %v11248_v20  ;;  %v11253_v62 = vld [vmem:[#allocation28_spill] sm:$0xff]  ;;  %v11255_v45 = vld [vmem:[#allocation37_spill] sm:$0xff]  ;;  %v11256_v55 = vld [vmem:[#allocation39_spill] sm:$0xff] }
 0x327   : > { %8285 = vmatmul.mubr.bf16.gmra.mrb[68].mxu0 %v9606_v57  ;;  %v7338_v63 = vcombine.low %v5951_v27, %v5954_v46  ;;  %v5961_v57 = vsel %vm10221_vm13, %v5959_v32, %v5960_v23  ;;  %v11252_v42 = vcombine.low %v11250_v13, %v11251_v56  ;;  %v11257_v14 = vcombine.low %v11255_v45, %v11256_v55  ;;  %v11258_v41 = vld [vmem:[#allocation40_spill] sm:$0xff]  ;;  %v11259_v8 = vld [vmem:[#allocation41_spill] sm:$0xff]  ;;  %v11262_v27 = vld [vmem:[#allocation42_spill] sm:$0xff] }
 0x328   : > { %8288 = vmatprep.mubr.bf16.mxu0 %v9608_v58  ;;  %8317 = vmatpush3.bf16.msra.mxu0 %v8910_v6  ;;  %v5958_v58 = vsel %vm10221_vm13, %v7323_v61, %v5957_v35  ;;  %v11254_v6 = vld [vmem:[#allocation19_spill] sm:$0xff]  ;;  %v11260_v35 = vcombine.low %v11258_v41, %v11259_v8  ;;  %v11265_v18 = vcombine.low %v10702_v10, %v10715_v17  ;;  %v8915_v54 = vld [vmem:[#allocation9 + $0x38] sm:$0xff]  }
 0x329   : > { %8209 = vmatmul.mubr.bf16.gmra.mrb[24].mxu1 %v7311_v60  ;;  %8318 = vmatprep.subr.bf16.mxu0 %v8911_v33  ;;  %v7339_v22 = vcombine.low %v5958_v58, %v5961_v57  ;;  %v11266_v57 = vcombine.low %v10709_v38, %v10724_v29  ;;  %v11267_v58 = vld [vmem:[#allocation44_spill] sm:$0xff] }
 0x32a   : > { %8212 = vmatprep.mubr.bf16.mxu1 %v7312_v9 }
 0x32c   : > { %8319 = vmatpush3.bf16.msra.mxu0 %v8911_v33 }
 0x32d   : > { %8320 = vmatprep.subr.bf16.mxu0 %v8912_v16 }
 0x32f   : > { %8289 = vmatmul.mubr.bf16.gmra.mrb[72].mxu0 %v9643_v51  ;;  %v11234_v51 = vcombine.low %v10564_v24, %v10571_v31  ;;  %v11245_v31 = vld [vmem:[#allocation26_spill] sm:$0xff] }
 0x330   : > { %8292 = vmatprep.mubr.bf16.mxu0 %v11230_v5  ;;  %8321 = vmatpush3.bf16.msra.mxu0 %v8912_v16 }
 0x331   : > { %8213 = vmatmul.mubr.bf16.gmra.mrb[28].mxu1 %v7313_v28  ;;  %8322 = vmatprep.subr.bf16.mxu0 %v8913_v48  ;;  %v11261_v28 = vld [vmem:[#allocation21_spill] sm:$0xff] }
 0x332   : > { %8232 = vmatprep.mubr.bf16.mxu1 %v7338_v63  ;;  %v11263_v63 = vld [vmem:[#allocation43_spill] sm:$0xff] }
 0x333   : > { %v11264_v32 = vcombine.low %v11262_v27, %v11263_v63 }
 0x334   : > { %8323 = vmatpush3.bf16.msra.mxu0 %v8913_v48 }
 0x335   : > { %8324 = vmatprep.subr.bf16.mxu0 %v8914_v39 }
 0x337   : > { %8293 = vmatmul.mubr.bf16.gmra.mrb[76].mxu0 %v11232_v36 }
 0x338   : > { %8296 = vmatprep.mubr.bf16.mxu0 %v11233_v53  ;;  %8325 = vmatpush3.bf16.msra.mxu0 %v8914_v39 }
 0x339   : > { %8233 = vmatmul.mubr.bf16.vlgmr.msra.gmra.mrb[0].mxu1 %v7339_v22  ;;  %v11268_v22 = vld [vmem:[#allocation45_spill] sm:$0xff]  ;;  %8326 = vmatprep.subr.bf16.mxu0 %v8915_v54 }
 0x33a   : > { %8236 = vmatprep.mubr.bf16.mxu1 %v11231_v1  ;;  %v11269_v5 = vcombine.low %v11267_v58, %v11268_v22  ;;  %v11270_v1 = vld [vmem:[#allocation46_spill] sm:$0xff] }
 0x33b   : > { %v11271_v36 = vcombine.low %v10732_v34, %v11270_v1 }
 0x33c   : > { %8327 = vmatpush3.bf16.msra.mxu0 %v8915_v54 }
 0x33f   : > { %8297 = vmatmul.mubr.bf16.gmra.mrb[80].mxu0 %v11237_v25 }
 0x340   : > { %8300 = vmatprep.mubr.bf16.mxu0 %v11238_v0 }
 0x341   : > { %8237 = vmatmul.mubr.bf16.gmra.mrb[4].mxu1 %v11234_v51 }
 0x342   : > { %8240 = vmatprep.mubr.bf16.mxu1 %v11236_v49 }
 0x347   : > { %8301 = vmatmul.mubr.bf16.gmra.mrb[84].mxu0 %v11245_v31 }
 0x348   : > { %v7946_v37 = vpop.f32.mrb[32].mxu0  ;;  %8304 = vmatprep.mubr.bf16.mxu0 %v11246_v59 }
 0x349   : > { %v2946_v47 = vpop.f32.mrb[33].mxu0  ;;  %8241 = vmatmul.mubr.bf16.gmra.mrb[8].mxu1 %v11241_v40  ;;  %v10978_v40 = vld [vmem:[%s11129_s6] ss:$0 sm:$0xff] }
 0x34a   : > { %v7947_v26 = vpop.f32.mrb[34].mxu0  ;;  %8244 = vmatprep.mubr.bf16.mxu1 %v11244_v43  ;;  %v8360_v15 = vadd.f32 %v7946_v37, %v10978_v40  ;;  %v8362_v30 = vadd.f32 %v10978_v40, %v2946_v47 }
 0x34b   : > { %v2949_v24 = vpop.f32.mrb[35].mxu0  ;;  %v8364_v31 = vadd.f32 %v7947_v26, %v10978_v40 }
 0x34c   : > { %v8366_v20 = vadd.f32 %v10978_v40, %v2949_v24 }
 0x34f   : > { %8305 = vmatmul.mubr.bf16.gmra.mrb[88].mxu0 %v11253_v62 }
 0x350   : > { %v7950_v21 = vpop.f32.mrb[36].mxu0  ;;  %8308 = vmatprep.mubr.bf16.mxu0 %v11254_v6 }
 0x351   : > { %v2962_v3 = vpop.f32.mrb[37].mxu0  ;;  %8245 = vmatmul.mubr.bf16.gmra.mrb[12].mxu1 %v11249_v2  ;;  %v8368_v37 = vadd.f32 %v7950_v21, %v10978_v40 }
 0x352   : > { %v7951_v7 = vpop.f32.mrb[38].mxu0  ;;  %8248 = vmatprep.mubr.bf16.mxu1 %v11252_v42  ;;  %v8370_v47 = vadd.f32 %v10978_v40, %v2962_v3 }
 0x353   : > { %v10901_v60 = vpop.f32.mrb[39].mxu0 }
 0x354   : > { %v8374_v27 = vadd.f32 %v10978_v40, %v10901_v60 }
 0x357   : > { %8309 = vmatmul.mubr.bf16.gmra.mrb[92].mxu0 %v11261_v28 }
 0x358   : > { %v10904_v9 = vpop.f32.mrb[40].mxu0 }
 0x359   : > { %v10907_v19 = vpop.f32.mrb[41].mxu0  ;;  %8249 = vmatmul.mubr.bf16.gmra.mrb[16].mxu1 %v11257_v14  ;;  %v8376_v1 = vadd.f32 %v10904_v9, %v10978_v40 }
 0x35a   : > { %v10912_v44 = vpop.f32.mrb[42].mxu0  ;;  %8252 = vmatprep.mubr.bf16.mxu1 %v11260_v35  ;;  %v8372_v35 = vadd.f32 %v7951_v7, %v10978_v40 }
 0x35b   : > { %v10917_v33 = vpop.f32.mrb[43].mxu0 }
 0x360   : > { %v10920_v11 = vpop.f32.mrb[44].mxu0 }
 0x361   : > { %v10922_v46 = vpop.f32.mrb[45].mxu0  ;;  %8253 = vmatmul.mubr.bf16.gmra.mrb[20].mxu1 %v11264_v32 }
 0x362   : > { %v10927_v16 = vpop.f32.mrb[46].mxu0  ;;  %8256 = vmatprep.mubr.bf16.mxu1 %v11265_v18 }
 0x363   : > { %v10932_v52 = vpop.f32.mrb[47].mxu0 }
 0x368   : > { %v10934_v23 = vpop.f32.mrb[48].mxu0 }
 0x369   : > { %v10936_v61 = vpop.f32.mrb[49].mxu0  ;;  %8257 = vmatmul.mubr.bf16.gmra.mrb[24].mxu1 %v11266_v57 }
 0x36a   : > { %v10941_v48 = vpop.f32.mrb[50].mxu0  ;;  %8260 = vmatprep.mubr.bf16.mxu1 %v11269_v5 }
 0x36b   : > { %v10946_v39 = vpop.f32.mrb[51].mxu0 }
 0x370   : > { %v10948_v10 = vpop.f32.mrb[52].mxu0 }
 0x371   : > { %v10950_v17 = vpop.f32.mrb[53].mxu0  ;;  %8261 = vmatmul.mubr.bf16.gmra.mrb[28].mxu1 %v11271_v36  ;;  %v8378_v36 = vadd.f32 %v10978_v40, %v10907_v19 }
 0x372   : > { %v10955_v53 = vpop.f32.mrb[54].mxu0 }
 0x373   : > { %v10957_v38 = vpop.f32.mrb[55].mxu0 }
 0x378   : > { %v10959_v29 = vpop.f32.mrb[56].mxu0 }
 0x379   : > { %v10961_v51 = vpop.f32.mrb[57].mxu0 }
 0x37a   : > { %v10963_v50 = vpop.f32.mrb[58].mxu0 }
 0x37b   : > { %v10965_v49 = vpop.f32.mrb[59].mxu0 }
 0x380   : > { %v10967_v25 = vpop.f32.mrb[60].mxu0 }
 0x381   : > { %v10969_v0 = vpop.f32.mrb[61].mxu0 }
 0x382   : > { %v10971_v4 = vpop.f32.mrb[62].mxu0 }
 0x383   : > { %v10973_v34 = vpop.f32.mrb[63].mxu0 }
 0x40c   : > { %v8234_v43 = vpop.f32.mrb[0].mxu1 }
 0x40d   : > { %v8361_v59 = vadd.f32 %v8360_v15, %v8234_v43  ;;  %v6223_v12 = vpop.f32.mrb[1].mxu1  ;;  %v8380_v15 = vadd.f32 %v10912_v44, %v10978_v40 }
 0x40e   : > { %v8363_v2 = vadd.f32 %v8362_v30, %v6223_v12  ;;  %v8235_v13 = vpop.f32.mrb[2].mxu1 }
 0x40f   : > { %v8365_v56 = vadd.f32 %v8364_v31, %v8235_v13  ;;  %v6226_v42 = vpop.f32.mrb[3].mxu1  ;;  %v6384_v6 = vmax.f32 %v8361_v59, 0.0  ;;  %v8382_v31 = vadd.f32 %v10978_v40, %v10917_v33 }
 0x410   : > { %v8367_v62 = vadd.f32 %v8366_v20, %v6226_v42  ;;  %v6382_v55 = vmax.f32 %v8363_v2, 0.0 }
 0x411   : > { %v6385_v45 = vmax.f32 %v8365_v56, 0.0 }
 0x412   : > { %v6383_v14 = vmax.f32 %v8367_v62, 0.0  ;;  %v8384_v62 = vadd.f32 %v10920_v11, %v10978_v40 }
 0x413   : > { %v6415_v41 = vpack.c.bf16 %v6385_v45, %v6384_v6  ;;  %v8386_v6 = vadd.f32 %v10978_v40, %v10922_v46 }
 0x414   : > { %v6414_v8 = vpack.c.bf16 %v6383_v14, %v6382_v55  ;;  %v8238_v26 = vpop.f32.mrb[4].mxu1  ;;  %v8388_v55 = vadd.f32 %v10927_v16, %v10978_v40 }
 0x415   : > { %v8369_v28 = vadd.f32 %v8368_v37, %v8238_v26  ;;  %v6239_v24 = vpop.f32.mrb[5].mxu1 }
 0x416   : > { %v8371_v63 = vadd.f32 %v8370_v47, %v6239_v24  ;;  %v8239_v32 = vpop.f32.mrb[6].mxu1  ;;  %8328 = vmatprep.mubr.bf16.mxu0 %v6414_v8 }
 0x417   : > { %v8373_v18 = vadd.f32 %v8372_v35, %v8239_v32  ;;  %v6242_v57 = vpop.f32.mrb[7].mxu1  ;;  %8329 = vmatmul.mubr.bf16.vlgmr.msra.gmra.mrb[64].mxu0 %v6415_v41  ;;  %v6388_v21 = vmax.f32 %v8369_v28, 0.0  ;;  %v8390_v41 = vadd.f32 %v10978_v40, %v10932_v52  ;;  %v8394_v32 = vadd.f32 %v10978_v40, %v10936_v61 }
 0x418   : > { %v8375_v58 = vadd.f32 %v8374_v27, %v6242_v57  ;;  %v6386_v5 = vmax.f32 %v8371_v63, 0.0  ;;  %v8392_v63 = vadd.f32 %v10934_v23, %v10978_v40  ;;  %v8396_v57 = vadd.f32 %v10941_v48, %v10978_v40 }
 0x419   : > { %v6389_v22 = vmax.f32 %v8373_v18, 0.0 }
 0x41a   : > { %v6387_v3 = vmax.f32 %v8375_v58, 0.0 }
 0x41b   : > { %v6417_v7 = vpack.c.bf16 %v6389_v22, %v6388_v21  ;;  %v8398_v22 = vadd.f32 %v10978_v40, %v10946_v39 }
 0x41c   : > { %v6416_v54 = vpack.c.bf16 %v6387_v3, %v6386_v5  ;;  %v8242_v60 = vpop.f32.mrb[8].mxu1 }
 0x41d   : > { %v8377_v30 = vadd.f32 %v8376_v1, %v8242_v60  ;;  %v6255_v43 = vpop.f32.mrb[9].mxu1 }
 0x41e   : > { %v8379_v59 = vadd.f32 %v8378_v36, %v6255_v43  ;;  %v8243_v12 = vpop.f32.mrb[10].mxu1  ;;  %8332 = vmatprep.mubr.bf16.mxu0 %v6416_v54 }
 0x41f   : > { %v8381_v20 = vadd.f32 %v8380_v15, %v8243_v12  ;;  %v6258_v2 = vpop.f32.mrb[11].mxu1  ;;  %8333 = vmatmul.mubr.bf16.gmra.mrb[68].mxu0 %v6417_v7  ;;  %v6392_v13 = vmax.f32 %v8377_v30, 0.0  ;;  %v8400_v15 = vadd.f32 %v10948_v10, %v10978_v40  ;;  %v8402_v30 = vadd.f32 %v10978_v40, %v10950_v17 }
 0x420   : > { %v8383_v9 = vadd.f32 %v8382_v31, %v6258_v2  ;;  %v6390_v19 = vmax.f32 %v8379_v59, 0.0  ;;  %v8404_v31 = vadd.f32 %v10955_v53, %v10978_v40 }
 0x421   : > { %v6393_v56 = vmax.f32 %v8381_v20, 0.0  ;;  %v8406_v20 = vadd.f32 %v10978_v40, %v10957_v38 }
 0x422   : > { %v6391_v42 = vmax.f32 %v8383_v9, 0.0 }
 0x423   : > { %v6419_v44 = vpack.c.bf16 %v6393_v56, %v6392_v13 }
 0x424   : > { %v6418_v45 = vpack.c.bf16 %v6391_v42, %v6390_v19  ;;  %v8246_v33 = vpop.f32.mrb[12].mxu1 }
 0x425   : > { %v8385_v14 = vadd.f32 %v8384_v62, %v8246_v33  ;;  %v6271_v37 = vpop.f32.mrb[13].mxu1  ;;  %v8412_v33 = vadd.f32 %v10963_v50, %v10978_v40 }
 0x426   : > { %v8387_v47 = vadd.f32 %v8386_v6, %v6271_v37  ;;  %v8247_v8 = vpop.f32.mrb[14].mxu1  ;;  %8336 = vmatprep.mubr.bf16.mxu0 %v6418_v45  ;;  %v8410_v6 = vadd.f32 %v10978_v40, %v10961_v51  ;;  %v8414_v37 = vadd.f32 %v10978_v40, %v10965_v49 }
 0x427   : > { %v8389_v26 = vadd.f32 %v8388_v55, %v8247_v8  ;;  %v6274_v35 = vpop.f32.mrb[15].mxu1  ;;  %8337 = vmatmul.mubr.bf16.gmra.mrb[72].mxu0 %v6419_v44  ;;  %v6396_v28 = vmax.f32 %v8385_v14, 0.0  ;;  %v8408_v44 = vadd.f32 %v10959_v29, %v10978_v40 }
 0x428   : > { %v8391_v11 = vadd.f32 %v8390_v41, %v6274_v35  ;;  %v6394_v46 = vmax.f32 %v8387_v47, 0.0 }
 0x429   : > { %v6397_v24 = vmax.f32 %v8389_v26, 0.0 }
 0x42a   : > { %v6395_v27 = vmax.f32 %v8391_v11, 0.0 }
 0x42b   : > { %v6421_v16 = vpack.c.bf16 %v6397_v24, %v6396_v28  ;;  %v8416_v24 = vadd.f32 %v10967_v25, %v10978_v40 }
 0x42c   : > { %v6420_v18 = vpack.c.bf16 %v6395_v27, %v6394_v46  ;;  %v8250_v52 = vpop.f32.mrb[16].mxu1  ;;  %v8418_v46 = vadd.f32 %v10978_v40, %v10969_v0 }
 0x42d   : > { %v8393_v58 = vadd.f32 %v8392_v63, %v8250_v52  ;;  %v6287_v21 = vpop.f32.mrb[17].mxu1  ;;  %v8420_v63 = vadd.f32 %v10971_v4, %v10978_v40 }
 0x42e   : > { %v8395_v5 = vadd.f32 %v8394_v32, %v6287_v21  ;;  %v8251_v3 = vpop.f32.mrb[18].mxu1  ;;  %8340 = vmatprep.mubr.bf16.mxu0 %v6420_v18  ;;  %v8422_v18 = vadd.f32 %v10978_v40, %v10973_v34 }
 0x42f   : > { %v8397_v1 = vadd.f32 %v8396_v57, %v8251_v3  ;;  %v6290_v7 = vpop.f32.mrb[19].mxu1  ;;  %8341 = vmatmul.mubr.bf16.gmra.mrb[76].mxu0 %v6421_v16  ;;  %v6400_v36 = vmax.f32 %v8393_v58, 0.0 }
 0x430   : > { %v8399_v23 = vadd.f32 %v8398_v22, %v6290_v7  ;;  %v6398_v61 = vmax.f32 %v8395_v5, 0.0 }
 0x431   : > { %v6401_v54 = vmax.f32 %v8397_v1, 0.0 }
 0x432   : > { %v6399_v60 = vmax.f32 %v8399_v23, 0.0 }
 0x433   : > { %v6423_v48 = vpack.c.bf16 %v6401_v54, %v6400_v36 }
 0x434   : > { %v6422_v43 = vpack.c.bf16 %v6399_v60, %v6398_v61  ;;  %v8254_v39 = vpop.f32.mrb[20].mxu1 }
 0x435   : > { %v8401_v59 = vadd.f32 %v8400_v15, %v8254_v39  ;;  %v6303_v12 = vpop.f32.mrb[21].mxu1 }
 0x436   : > { %v8403_v2 = vadd.f32 %v8402_v30, %v6303_v12  ;;  %v8255_v9 = vpop.f32.mrb[22].mxu1  ;;  %8344 = vmatprep.mubr.bf16.mxu0 %v6422_v43 }
 0x437   : > { %v8405_v13 = vadd.f32 %v8404_v31, %v8255_v9  ;;  %v6306_v56 = vpop.f32.mrb[23].mxu1  ;;  %8345 = vmatmul.mubr.bf16.gmra.mrb[80].mxu0 %v6423_v48  ;;  %v6404_v19 = vmax.f32 %v8401_v59, 0.0 }
 0x438   : > { %v8407_v10 = vadd.f32 %v8406_v20, %v6306_v56  ;;  %v6402_v17 = vmax.f32 %v8403_v2, 0.0 }
 0x439   : > { %v6405_v42 = vmax.f32 %v8405_v13, 0.0 }
 0x43a   : > { %v6403_v62 = vmax.f32 %v8407_v10, 0.0 }
 0x43b   : > { %v6425_v53 = vpack.c.bf16 %v6405_v42, %v6404_v19 }
 0x43c   : > { %v6424_v45 = vpack.c.bf16 %v6403_v62, %v6402_v17  ;;  %v8258_v38 = vpop.f32.mrb[24].mxu1 }
 0x43d   : > { %v8409_v55 = vadd.f32 %v8408_v44, %v8258_v38  ;;  %v6319_v14 = vpop.f32.mrb[25].mxu1 }
 0x43e   : > { %v8411_v41 = vadd.f32 %v8410_v6, %v6319_v14  ;;  %v8259_v47 = vpop.f32.mrb[26].mxu1  ;;  %8348 = vmatprep.mubr.bf16.mxu0 %v6424_v45 }
 0x43f   : > { %v8413_v8 = vadd.f32 %v8412_v33, %v8259_v47  ;;  %v6322_v26 = vpop.f32.mrb[27].mxu1  ;;  %8349 = vmatmul.mubr.bf16.gmra.mrb[84].mxu0 %v6425_v53  ;;  %v6408_v35 = vmax.f32 %v8409_v55, 0.0 }
 0x440   : > { %v8415_v29 = vadd.f32 %v8414_v37, %v6322_v26  ;;  %v6406_v51 = vmax.f32 %v8411_v41, 0.0 }
 0x441   : > { %v6409_v11 = vmax.f32 %v8413_v8, 0.0 }
 0x442   : > { %v6407_v28 = vmax.f32 %v8415_v29, 0.0 }
 0x443   : > { %v6427_v50 = vpack.c.bf16 %v6409_v11, %v6408_v35 }
 0x444   : > { %v6426_v27 = vpack.c.bf16 %v6407_v28, %v6406_v51  ;;  %v8262_v49 = vpop.f32.mrb[28].mxu1 }
 0x445   : > { %v8417_v16 = vadd.f32 %v8416_v24, %v8262_v49  ;;  %v6335_v32 = vpop.f32.mrb[29].mxu1 }
 0x446   : > { %v8419_v52 = vadd.f32 %v8418_v46, %v6335_v32  ;;  %v8263_v57 = vpop.f32.mrb[30].mxu1  ;;  %8352 = vmatprep.mubr.bf16.mxu0 %v6426_v27 }
 0x447   : > { %v8421_v58 = vadd.f32 %v8420_v63, %v8263_v57  ;;  %v6338_v25 = vpop.f32.mrb[31].mxu1  ;;  %8353 = vmatmul.mubr.bf16.gmra.mrb[88].mxu0 %v6427_v50  ;;  %v6412_v22 = vmax.f32 %v8417_v16, 0.0 }
 0x448   : > { %v8423_v21 = vadd.f32 %v8422_v18, %v6338_v25  ;;  %v6410_v5 = vmax.f32 %v8419_v52, 0.0 }
 0x449   : > { %v6413_v0 = vmax.f32 %v8421_v58, 0.0 }
 0x44a   : > { %v6411_v3 = vmax.f32 %v8423_v21, 0.0 }
 0x44b   : > { %v6429_v1 = vpack.c.bf16 %v6413_v0, %v6412_v22 }
 0x44c   : > { %v6428_v7 = vpack.c.bf16 %v6411_v3, %v6410_v5 }
 0x44e   : > { %8356 = vmatprep.mubr.bf16.mxu0 %v6428_v7 }
 0x44f   : > { %8357 = vmatmul.mubr.bf16.gmra.mrb[92].mxu0 %v6429_v1 }
 0x4ea   : > { %v8330_v4 = vpop.f32.mrb[64].mxu0 }
 0x4eb   : > { %6882 = vst [vmem:[%s11038_s21 + $0x10] sm:$0xff] %v8330_v4  ;;  %v6753_v34 = vpop.f32.mrb[65].mxu0 }
 0x4ec   : > { %6880 = vst [vmem:[%s11038_s21] sm:$0xff] %v6753_v34  ;;  %v8331_v40 = vpop.f32.mrb[66].mxu0 }
 0x4ed   : > { %6883 = vst [vmem:[%s11038_s21 + $0x18] sm:$0xff] %v8331_v40  ;;  %v6756_v23 = vpop.f32.mrb[67].mxu0 }
 0x4ee   : > { %6881 = vst [vmem:[%s11038_s21 + $0x8] sm:$0xff] %v6756_v23 }
 0x4f2   : > { %v8334_v36 = vpop.f32.mrb[68].mxu0 }
 0x4f3   : > { %6886 = vst [vmem:[%s11038_s21 + $0x30] sm:$0xff] %v8334_v36  ;;  %v6769_v54 = vpop.f32.mrb[69].mxu0 }
 0x4f4   : > { %6884 = vst [vmem:[%s11038_s21 + $0x20] sm:$0xff] %v6769_v54  ;;  %v8335_v61 = vpop.f32.mrb[70].mxu0 }
 0x4f5   : > { %6887 = vst [vmem:[%s11038_s21 + $0x38] sm:$0xff] %v8335_v61  ;;  %v6772_v60 = vpop.f32.mrb[71].mxu0 }
 0x4f6   : > { %6885 = vst [vmem:[%s11038_s21 + $0x28] sm:$0xff] %v6772_v60 }
 0x4fa   : > { %v8338_v15 = vpop.f32.mrb[72].mxu0 }
 0x4fb   : > { %6890 = vst [vmem:[%s11038_s21 + $0x50] sm:$0xff] %v8338_v15  ;;  %v6785_v48 = vpop.f32.mrb[73].mxu0 }
 0x4fc   : > { %6888 = vst [vmem:[%s11038_s21 + $0x40] sm:$0xff] %v6785_v48  ;;  %v8339_v30 = vpop.f32.mrb[74].mxu0 }
 0x4fd   : > { %6891 = vst [vmem:[%s11038_s21 + $0x58] sm:$0xff] %v8339_v30  ;;  %v6788_v43 = vpop.f32.mrb[75].mxu0 }
 0x4fe   : > { %6889 = vst [vmem:[%s11038_s21 + $0x48] sm:$0xff] %v6788_v43 }
 0x502   : > { %v8342_v39 = vpop.f32.mrb[76].mxu0 }
 0x503   : > { %6894 = vst [vmem:[%s11038_s21 + $0x70] sm:$0xff] %v8342_v39  ;;  %v6801_v31 = vpop.f32.mrb[77].mxu0 }
 0x504   : > { %6892 = vst [vmem:[%s11038_s21 + $0x60] sm:$0xff] %v6801_v31  ;;  %v8343_v59 = vpop.f32.mrb[78].mxu0 }
 0x505   : > { %6895 = vst [vmem:[%s11038_s21 + $0x78] sm:$0xff] %v8343_v59  ;;  %v6804_v12 = vpop.f32.mrb[79].mxu0 }
 0x506   : > { %6893 = vst [vmem:[%s11038_s21 + $0x68] sm:$0xff] %v6804_v12 }
 0x50a   : > { %v8346_v20 = vpop.f32.mrb[80].mxu0 }
 0x50b   : > { %6898 = vst [vmem:[%s11038_s21 + $0x90] sm:$0xff] %v8346_v20  ;;  %v6817_v2 = vpop.f32.mrb[81].mxu0 }
 0x50c   : > { %6896 = vst [vmem:[%s11038_s21 + $0x80] sm:$0xff] %v6817_v2  ;;  %v8347_v9 = vpop.f32.mrb[82].mxu0 }
 0x50d   : > { %6899 = vst [vmem:[%s11038_s21 + $0x98] sm:$0xff] %v8347_v9  ;;  %v6820_v13 = vpop.f32.mrb[83].mxu0 }
 0x50e   : > { %6897 = vst [vmem:[%s11038_s21 + $0x88] sm:$0xff] %v6820_v13 }
 0x512   : > { %v8350_v56 = vpop.f32.mrb[84].mxu0 }
 0x513   : > { %6902 = vst [vmem:[%s11038_s21 + $0xb0] sm:$0xff] %v8350_v56  ;;  %v6833_v10 = vpop.f32.mrb[85].mxu0 }
 0x514   : > { %6900 = vst [vmem:[%s11038_s21 + $0xa0] sm:$0xff] %v6833_v10  ;;  %v8351_v19 = vpop.f32.mrb[86].mxu0 }
 0x515   : > { %6903 = vst [vmem:[%s11038_s21 + $0xb8] sm:$0xff] %v8351_v19  ;;  %v6836_v42 = vpop.f32.mrb[87].mxu0 }
 0x516   : > { %6901 = vst [vmem:[%s11038_s21 + $0xa8] sm:$0xff] %v6836_v42 }
 0x51a   : > { %v8354_v17 = vpop.f32.mrb[88].mxu0 }
 0x51b   : > { %6906 = vst [vmem:[%s11038_s21 + $0xd0] sm:$0xff] %v8354_v17  ;;  %v6849_v62 = vpop.f32.mrb[89].mxu0 }
 0x51c   : > { %6904 = vst [vmem:[%s11038_s21 + $0xc0] sm:$0xff] %v6849_v62  ;;  %v8355_v44 = vpop.f32.mrb[90].mxu0 }
 0x51d   : > { %6907 = vst [vmem:[%s11038_s21 + $0xd8] sm:$0xff] %v8355_v44  ;;  %v6852_v53 = vpop.f32.mrb[91].mxu0 }
 0x51e   : > { %6905 = vst [vmem:[%s11038_s21 + $0xc8] sm:$0xff] %v6852_v53 }
 0x522   : > { %v8358_v6 = vpop.f32.mrb[92].mxu0 }
 0x523   : > { %6910 = vst [vmem:[%s11038_s21 + $0xf0] sm:$0xff] %v8358_v6  ;;  %v6865_v45 = vpop.f32.mrb[93].mxu0 }
 0x524   : > { %6908 = vst [vmem:[%s11038_s21 + $0xe0] sm:$0xff] %v6865_v45  ;;  %v8359_v38 = vpop.f32.mrb[94].mxu0 }
 0x525   : > { %6911 = vst [vmem:[%s11038_s21 + $0xf8] sm:$0xff] %v8359_v38  ;;  %v6868_v33 = vpop.f32.mrb[95].mxu0 }
 0x526   : > { %6909 = vst [vmem:[%s11038_s21 + $0xe8] sm:$0xff] %v6868_v33 }
 0x527   : > { %9112 = shalt.err (!%p9109_p13)
}
 0x528   : > { %s9113_s18 = scalar_lea.hbm %s11074_s26, 4096  ;;  %s9117_s21 = scalar_lea.hbm %s11272_s25, 8192 }
 0x529   : > { %p9114_p9 = scmp.ne.s32.totalorder %s11074_s26, %s9113_s18  ;;  %p9118_p4 = scmp.lt.u32.totalorder %s11074_s26, %s11272_s25 }
 0x52a   : > { %p9119_p8 = scmp.lt.u32.totalorder %s9117_s21, %s9113_s18  ;;  %p9121_p3 = scmp.lt.u32.totalorder %s9113_s18, %s11074_s26 }
 0x52b   : > { %p9115_p0 = pnand %p9114_p9, %p9407_p10 }
 0x52c   : > { %p9120_p6 = por %p9119_p8, %p9118_p4 }
 0x52d   : > { %p9116_p11 = pneg %p9115_p0 }
 0x52e   : > { %p9122_p5 = por %p9121_p3, %p9120_p6 }
 0x530   : > { %p9123_p7 = pnand %p9122_p5, %p9116_p11 }
 0x532   : > { %9126 = shalt.err (!%p9123_p7)
}
 0x533   : > { %s9184_s17 = smov 128   ;;  %s9185_s19 = smov 8  }
 0x534   : > { %8698 = dma.vmem_to_hbm [thread:$0]  (%p9407_p10), %s11076_s29, 4096, %s11074_s26, %s6913_s13, %s9184_s17, %s9184_s17, %s9185_s19  }
 0x535 PF: > { %s11273_s22 = sld [smem:[#allocation17_spill]]  ;;  %s11274_s9 = sld [smem:[#allocation18_spill]] }
 0x536   : > { %p11276_p1 = scmp.ge.s32.totalorder %s9173_s12, 2 }
 0x53b   : > { %s6941_s20 = sand.u32 1, %s11273_s22   ;;  %p11275_p12 = scmp.ne.s32.totalorder %s11274_s9, 0 }
 0x53c   : > { %s6942_s18 = scalar_lea.sflag [#allocation5], %s6941_s20 }
 0x53d   : > { %p8718_p2 = pnand %p11276_p1, %p11275_p12 }
 0x53f   : > { %9156 = dma.done.wait (!%p8718_p2), %s6942_s18, 4096  }
 0x540   : > { %9158 = vsyncadd (!%p8718_p2), %s6942_s18, 4294963200  ;;  %p24_p13 = scmp.ge.s32.totalorder %s9397_s14, 4   ;;  %s11277_s30 = smov %s9165_s10 }
 0x541   : > { %s11278_s10 = smov %s9169_s11  ;;  %s11279_s11 = smov %s9413_s28 }
 0x542   : > { %s11280_s12 = smov %s9397_s14  ;;  %26 = sbr.rel (!%p24_p13) target bundleno = 9 (0x9), region = 127 }
 0x549   :  { %6947 = vsyncpa [#allocation4], 1 }
 0x54a   :  { %6949 = vsyncpa [#allocation4 + $0x1], 1 }
 0x54b   :  { %6950 = vsyncpa [#allocation7], 1 }
 0x54c   :  { %6951 = vsyncpa [#allocation10], 1 }
 0x54d   :  { %6952 = vsyncpa [#allocation5], 1 }
 0x54e   :  { %6954 = vsyncpa [#allocation5 + $0x1], 1 }

</bundles_post_ra>
